<compile_context>
chip_gen: v7x
topology: tpu7x:2x2x1
jax: 0.10.0
libtpu: 0.0.40
codegen_flags: <defaults>
</compile_context>

<pallas_src>
import jax
import jax.numpy as jnp
from jax.experimental import pallas as pl
from jax.experimental.pallas import tpu as pltpu

# Original layer dims (encoder then decoder) of the PyTorch autoencoder.
DIMS = [28 * 28, 128, 64, 12, 3, 12, 64, 128, 28 * 28]
N_LAYERS = len(DIMS) - 1          # 8 linear layers
D_IN = 28 * 28                    # 784


def _autoencoder_kernel(x_ref, *refs):
    """Fused MLP forward for one (batch_tile, 784) batch tile.

    refs = (w1, b1, w2, b2, ..., wL, bL, o_ref).  All weights/biases use a
    constant block index, so they are DMA'd once and stay VMEM-resident across
    grid steps; only the batch dimension is tiled.  Matmuls hit the MXU with
    bf16 inputs and f32 accumulation; bias add / ReLU / tanh stay f32 (VPU/EUP).
    """
    o_ref = refs[-1]
    param_refs = refs[:-1]
    n_layers = len(param_refs) // 2

    h = x_ref[...]                                        # (TB, 784) f32 or bf16
    for layer in range(n_layers):
        w = param_refs[2 * layer][...]                    # (in, out) bf16
        b = param_refs[2 * layer + 1][...]                # (1, out)  f32
        h = jnp.dot(h.astype(w.dtype), w,
                    preferred_element_type=jnp.float32) + b
        if layer < n_layers - 1:
            h = jnp.maximum(h, 0.0)                       # ReLU on interior layers
        else:
            h = jnp.tanh(h)                               # final decoder activation
    o_ref[...] = h.astype(o_ref.dtype)


def _prepare_params(params, matmul_dtype):
    """Fuse the activation-free 12->3->12 bottleneck into one 12x12 linear and
    cast weights to `matmul_dtype` (biases stay f32).  No feature padding."""
    ws = [w for (w, _) in params]
    bs = [b for (_, b) in params]

    # (x @ W4 + b4) @ W5 + b5  ==  x @ (W4 @ W5) + (b4 @ W5 + b5)
    w_fused = ws[3] @ ws[4]
    b_fused = bs[3] @ ws[4] + bs[4]
    ws = ws[:3] + [w_fused] + ws[5:]
    bs = bs[:3] + [b_fused] + bs[5:]

    flat = []
    for w, b in zip(ws, bs):
        flat.append(w.astype(matmul_dtype))
        flat.append(b.astype(jnp.float32))
    return flat


def _pick_batch_tile(B, max_tile=512):
    """Rows per grid step: big for DMA amortization, but >= 2 grid steps when B
    allows it (so v7x megacore gets both TensorCores), multiple of 8 sublanes."""
    if B <= 8:
        return B                               # one full-extent block
    if B <= 2 * max_tile:
        half = (B + 1) // 2
        return ((half + 7) // 8) * 8           # exactly 2 grid steps
    return max_tile


def autoencoder_forward(x, params, *, batch_tile=None, matmul_dtype=jnp.bfloat16):
    """Run the fused autoencoder Pallas kernel.

    x:      (B, 784) float32 or bfloat16.  Any B (ragged last tile is masked).
    params: list of 8 (W, b) tuples, W: (in, out), b: (1, out), float32.
    batch_tile: rows per grid step (any multiple of 8); auto-picked if None.
    """
    B, D = x.shape
    assert D == D_IN

    if batch_tile is None:
        batch_tile = _pick_batch_tile(B)
    if batch_tile >= B:
        batch_tile = B                          # single block == full array: legal
    else:
        batch_tile = max((batch_tile // 8) * 8, 8)

    flat_params = _prepare_params(params, matmul_dtype)
    n_tiles = pl.cdiv(B, batch_tile)

    in_specs = [pl.BlockSpec((batch_tile, D_IN), lambda i: (i, 0))]
    for p in flat_params:
        # Full (untiled) block, constant index -> resident in VMEM across steps.
        in_specs.append(pl.BlockSpec(p.shape, lambda i: (0, 0)))
    out_spec = pl.BlockSpec((batch_tile, D_IN), lambda i: (i, 0))

    # Double-buffered in/out tiles + weights + intermediates, with headroom;
    # capped at 48 MiB to stay safely under v7x's 64 MiB per-TC VMEM.
    tile_bytes = batch_tile * D_IN * 4
    vmem_limit = int(min(max(12 * tile_bytes + 4 * 1024 * 1024,
                             16 * 1024 * 1024),
                         48 * 1024 * 1024))

    out = pl.pallas_call(
        _autoencoder_kernel,
        out_shape=jax.ShapeDtypeStruct((B, D_IN), jnp.float32),
        grid_spec=pltpu.PrefetchScalarGridSpec(
            num_scalar_prefetch=0,
            grid=(n_tiles,),
            in_specs=in_specs,
            out_specs=out_spec,
        ),
        compiler_params=pltpu.CompilerParams(
            dimension_semantics=("parallel",),
            vmem_limit_bytes=vmem_limit,
        ),
    )(x, *flat_params)

    return out


def init_params(key):
    """Deterministic init mimicking torch.nn.Linear (uniform +/- 1/sqrt(fan_in))."""
    params = []
    for layer in range(N_LAYERS):
        fan_in, fan_out = DIMS[layer], DIMS[layer + 1]
        key, kw, kb = jax.random.split(key, 3)
        bound = 1.0 / jnp.sqrt(jnp.float32(fan_in))
        w = jax.random.uniform(kw, (fan_in, fan_out), jnp.float32, -bound, bound)
        b = jax.random.uniform(kb, (1, fan_out), jnp.float32, -bound, bound)
        params.append((w, b))
    return params


def reference_forward_f32(x, params):
    """Pure-JAX f32 reference of the original 8-layer module (PyTorch semantics)."""
    h = x.astype(jnp.float32)
    for layer, (w, b) in enumerate(params):
        h = h @ w + b
        if layer == N_LAYERS - 1:
            h = jnp.tanh(h)
        elif layer != 3:  # layer 3 = encoder output Linear(12,3), no activation
            h = jnp.maximum(h, 0.0)
    return h


def reference_forward_mirrored(x, params, matmul_dtype=jnp.bfloat16):
    """Pure-JAX reference mirroring the kernel's fusion / bf16 choices exactly."""
    flat = _prepare_params(params, matmul_dtype)
    n_layers = len(flat) // 2
    h = x
    for layer in range(n_layers):
        w = flat[2 * layer]
        b = flat[2 * layer + 1]
        h = jnp.dot(h.astype(w.dtype), w, preferred_element_type=jnp.float32) + b
        if layer < n_layers - 1:
            h = jnp.maximum(h, 0.0)
        else:
            h = jnp.tanh(h)
    return h


if __name__ == "__main__":
    key = jax.random.PRNGKey(0)
    key, kx = jax.random.split(key)

    # Small batch that still exercises the auto tile picker (152 rows/step),
    # a 2-step grid (megacore-friendly) and a ragged last tile (148 valid rows).
    B = 300
    x = jax.random.uniform(kx, (B, D_IN), jnp.float32, -1.0, 1.0)
    params = init_params(key)

    out = autoencoder_forward(x, params)
    out = jax.block_until_ready(out)
    assert out.shape == (B, D_IN)

    # Strict check vs a reference that mirrors the kernel's bf16/fusion math.
    ref_mirror = reference_forward_mirrored(x, params, jnp.bfloat16)
    err_mirror = float(jnp.max(jnp.abs(out - ref_mirror)))
    assert err_mirror < 1e-3, err_mirror

    # Loose sanity check vs the original f32 PyTorch-equivalent forward
    # (bf16 matmul inputs introduce small, bounded deviations).
    ref_f32 = reference_forward_f32(x, params)
    err_f32 = float(jnp.max(jnp.abs(out - ref_f32)))
    assert err_f32 < 5e-2, err_f32

    print("KERNEL_OK")
</pallas_src>

<mosaic_0001>
module attributes {stable_mosaic.version = 11 : i64} {
  func.func @_autoencoder_kernel(%arg0: i32, %arg1: memref<152x784xf32, #tpu.memory_space<vmem>>, %arg2: memref<784x128xbf16, #tpu.memory_space<vmem>>, %arg3: memref<1x128xf32, #tpu.memory_space<vmem>>, %arg4: memref<128x64xbf16, #tpu.memory_space<vmem>>, %arg5: memref<1x64xf32, #tpu.memory_space<vmem>>, %arg6: memref<64x12xbf16, #tpu.memory_space<vmem>>, %arg7: memref<1x12xf32, #tpu.memory_space<vmem>>, %arg8: memref<12x12xbf16, #tpu.memory_space<vmem>>, %arg9: memref<1x12xf32, #tpu.memory_space<vmem>>, %arg10: memref<12x64xbf16, #tpu.memory_space<vmem>>, %arg11: memref<1x64xf32, #tpu.memory_space<vmem>>, %arg12: memref<64x128xbf16, #tpu.memory_space<vmem>>, %arg13: memref<1x128xf32, #tpu.memory_space<vmem>>, %arg14: memref<128x784xbf16, #tpu.memory_space<vmem>>, %arg15: memref<1x784xf32, #tpu.memory_space<vmem>>, %arg16: memref<152x784xf32, #tpu.memory_space<vmem>>) attributes {dimension_semantics = [#tpu.dimension_semantics<parallel>], iteration_bounds = array<i64: 2>, scalar_prefetch = 0 : i64, scratch_operands = 0 : i64, tpu.core_type = #tpu.core_type<tc>, window_params = [{transform_indices = @transform_0, window_bounds = array<i64: 152, 784>}, {pipeline_mode = #tpu.pipeline_mode<synchronous>, transform_indices = @transform_1, window_bounds = array<i64: 784, 128>}, {pipeline_mode = #tpu.pipeline_mode<synchronous>, transform_indices = @transform_2, window_bounds = array<i64: 1, 128>}, {pipeline_mode = #tpu.pipeline_mode<synchronous>, transform_indices = @transform_3, window_bounds = array<i64: 128, 64>}, {pipeline_mode = #tpu.pipeline_mode<synchronous>, transform_indices = @transform_4, window_bounds = array<i64: 1, 64>}, {pipeline_mode = #tpu.pipeline_mode<synchronous>, transform_indices = @transform_5, window_bounds = array<i64: 64, 12>}, {pipeline_mode = #tpu.pipeline_mode<synchronous>, transform_indices = @transform_6, window_bounds = array<i64: 1, 12>}, {pipeline_mode = #tpu.pipeline_mode<synchronous>, transform_indices = @transform_7, window_bounds = array<i64: 12, 12>}, {pipeline_mode = #tpu.pipeline_mode<synchronous>, transform_indices = @transform_8, window_bounds = array<i64: 1, 12>}, {pipeline_mode = #tpu.pipeline_mode<synchronous>, transform_indices = @transform_9, window_bounds = array<i64: 12, 64>}, {pipeline_mode = #tpu.pipeline_mode<synchronous>, transform_indices = @transform_10, window_bounds = array<i64: 1, 64>}, {pipeline_mode = #tpu.pipeline_mode<synchronous>, transform_indices = @transform_11, window_bounds = array<i64: 64, 128>}, {pipeline_mode = #tpu.pipeline_mode<synchronous>, transform_indices = @transform_12, window_bounds = array<i64: 1, 128>}, {pipeline_mode = #tpu.pipeline_mode<synchronous>, transform_indices = @transform_13, window_bounds = array<i64: 128, 784>}, {pipeline_mode = #tpu.pipeline_mode<synchronous>, transform_indices = @transform_14, window_bounds = array<i64: 1, 784>}, {transform_indices = @transform_15, window_bounds = array<i64: 152, 784>}]} {
    %c0 = arith.constant 0 : index
    %c0_0 = arith.constant 0 : index
    %0 = vector.load %arg1[%c0, %c0_0] : memref<152x784xf32, #tpu.memory_space<vmem>>, vector<152x784xf32>
    %c0_1 = arith.constant 0 : index
    %c0_2 = arith.constant 0 : index
    %1 = vector.load %arg2[%c0_1, %c0_2] : memref<784x128xbf16, #tpu.memory_space<vmem>>, vector<784x128xbf16>
    %c0_3 = arith.constant 0 : index
    %c0_4 = arith.constant 0 : index
    %2 = vector.load %arg3[%c0_3, %c0_4] : memref<1x128xf32, #tpu.memory_space<vmem>>, vector<1x128xf32>
    %3 = arith.truncf %0 : vector<152x784xf32> to vector<152x784xbf16>
    %cst = arith.constant dense<0.000000e+00> : vector<152x128xf32>
    %4 = tpu.matmul %3, %1, %cst {dimension_numbers = #tpu.dot_dimension_numbers<[1], [0], [0], [1], [0, 0, 1, 1], [], []>} : vector<152x784xbf16>, vector<784x128xbf16>, vector<152x128xf32> -> vector<152x128xf32>
    %5 = vector.broadcast %2 : vector<1x128xf32> to vector<152x128xf32>
    %6 = arith.addf %4, %5 : vector<152x128xf32>
    %cst_5 = arith.constant 0.000000e+00 : f32
    %7 = vector.broadcast %cst_5 : f32 to vector<152x128xf32>
    %8 = arith.maximumf %6, %7 : vector<152x128xf32>
    %c0_6 = arith.constant 0 : index
    %c0_7 = arith.constant 0 : index
    %9 = vector.load %arg4[%c0_6, %c0_7] : memref<128x64xbf16, #tpu.memory_space<vmem>>, vector<128x64xbf16>
    %c0_8 = arith.constant 0 : index
    %c0_9 = arith.constant 0 : index
    %10 = vector.load %arg5[%c0_8, %c0_9] : memref<1x64xf32, #tpu.memory_space<vmem>>, vector<1x64xf32>
    %11 = arith.truncf %8 : vector<152x128xf32> to vector<152x128xbf16>
    %cst_10 = arith.constant dense<0.000000e+00> : vector<152x64xf32>
    %12 = tpu.matmul %11, %9, %cst_10 {dimension_numbers = #tpu.dot_dimension_numbers<[1], [0], [0], [1], [0, 0, 1, 1], [], []>} : vector<152x128xbf16>, vector<128x64xbf16>, vector<152x64xf32> -> vector<152x64xf32>
    %13 = vector.broadcast %10 : vector<1x64xf32> to vector<152x64xf32>
    %14 = arith.addf %12, %13 : vector<152x64xf32>
    %cst_11 = arith.constant 0.000000e+00 : f32
    %15 = vector.broadcast %cst_11 : f32 to vector<152x64xf32>
    %16 = arith.maximumf %14, %15 : vector<152x64xf32>
    %c0_12 = arith.constant 0 : index
    %c0_13 = arith.constant 0 : index
    %17 = vector.load %arg6[%c0_12, %c0_13] : memref<64x12xbf16, #tpu.memory_space<vmem>>, vector<64x12xbf16>
    %c0_14 = arith.constant 0 : index
    %c0_15 = arith.constant 0 : index
    %18 = vector.load %arg7[%c0_14, %c0_15] : memref<1x12xf32, #tpu.memory_space<vmem>>, vector<1x12xf32>
    %19 = arith.truncf %16 : vector<152x64xf32> to vector<152x64xbf16>
    %cst_16 = arith.constant dense<0.000000e+00> : vector<152x12xf32>
    %20 = tpu.matmul %19, %17, %cst_16 {dimension_numbers = #tpu.dot_dimension_numbers<[1], [0], [0], [1], [0, 0, 1, 1], [], []>} : vector<152x64xbf16>, vector<64x12xbf16>, vector<152x12xf32> -> vector<152x12xf32>
    %21 = vector.broadcast %18 : vector<1x12xf32> to vector<152x12xf32>
    %22 = arith.addf %20, %21 : vector<152x12xf32>
    %cst_17 = arith.constant 0.000000e+00 : f32
    %23 = vector.broadcast %cst_17 : f32 to vector<152x12xf32>
    %24 = arith.maximumf %22, %23 : vector<152x12xf32>
    %c0_18 = arith.constant 0 : index
    %c0_19 = arith.constant 0 : index
    %25 = vector.load %arg8[%c0_18, %c0_19] : memref<12x12xbf16, #tpu.memory_space<vmem>>, vector<12x12xbf16>
    %c0_20 = arith.constant 0 : index
    %c0_21 = arith.constant 0 : index
    %26 = vector.load %arg9[%c0_20, %c0_21] : memref<1x12xf32, #tpu.memory_space<vmem>>, vector<1x12xf32>
    %27 = arith.truncf %24 : vector<152x12xf32> to vector<152x12xbf16>
    %cst_22 = arith.constant dense<0.000000e+00> : vector<152x12xf32>
    %28 = tpu.matmul %27, %25, %cst_22 {dimension_numbers = #tpu.dot_dimension_numbers<[1], [0], [0], [1], [0, 0, 1, 1], [], []>} : vector<152x12xbf16>, vector<12x12xbf16>, vector<152x12xf32> -> vector<152x12xf32>
    %29 = vector.broadcast %26 : vector<1x12xf32> to vector<152x12xf32>
    %30 = arith.addf %28, %29 : vector<152x12xf32>
    %cst_23 = arith.constant 0.000000e+00 : f32
    %31 = vector.broadcast %cst_23 : f32 to vector<152x12xf32>
    %32 = arith.maximumf %30, %31 : vector<152x12xf32>
    %c0_24 = arith.constant 0 : index
    %c0_25 = arith.constant 0 : index
    %33 = vector.load %arg10[%c0_24, %c0_25] : memref<12x64xbf16, #tpu.memory_space<vmem>>, vector<12x64xbf16>
    %c0_26 = arith.constant 0 : index
    %c0_27 = arith.constant 0 : index
    %34 = vector.load %arg11[%c0_26, %c0_27] : memref<1x64xf32, #tpu.memory_space<vmem>>, vector<1x64xf32>
    %35 = arith.truncf %32 : vector<152x12xf32> to vector<152x12xbf16>
    %cst_28 = arith.constant dense<0.000000e+00> : vector<152x64xf32>
    %36 = tpu.matmul %35, %33, %cst_28 {dimension_numbers = #tpu.dot_dimension_numbers<[1], [0], [0], [1], [0, 0, 1, 1], [], []>} : vector<152x12xbf16>, vector<12x64xbf16>, vector<152x64xf32> -> vector<152x64xf32>
    %37 = vector.broadcast %34 : vector<1x64xf32> to vector<152x64xf32>
    %38 = arith.addf %36, %37 : vector<152x64xf32>
    %cst_29 = arith.constant 0.000000e+00 : f32
    %39 = vector.broadcast %cst_29 : f32 to vector<152x64xf32>
    %40 = arith.maximumf %38, %39 : vector<152x64xf32>
    %c0_30 = arith.constant 0 : index
    %c0_31 = arith.constant 0 : index
    %41 = vector.load %arg12[%c0_30, %c0_31] : memref<64x128xbf16, #tpu.memory_space<vmem>>, vector<64x128xbf16>
    %c0_32 = arith.constant 0 : index
    %c0_33 = arith.constant 0 : index
    %42 = vector.load %arg13[%c0_32, %c0_33] : memref<1x128xf32, #tpu.memory_space<vmem>>, vector<1x128xf32>
    %43 = arith.truncf %40 : vector<152x64xf32> to vector<152x64xbf16>
    %cst_34 = arith.constant dense<0.000000e+00> : vector<152x128xf32>
    %44 = tpu.matmul %43, %41, %cst_34 {dimension_numbers = #tpu.dot_dimension_numbers<[1], [0], [0], [1], [0, 0, 1, 1], [], []>} : vector<152x64xbf16>, vector<64x128xbf16>, vector<152x128xf32> -> vector<152x128xf32>
    %45 = vector.broadcast %42 : vector<1x128xf32> to vector<152x128xf32>
    %46 = arith.addf %44, %45 : vector<152x128xf32>
    %cst_35 = arith.constant 0.000000e+00 : f32
    %47 = vector.broadcast %cst_35 : f32 to vector<152x128xf32>
    %48 = arith.maximumf %46, %47 : vector<152x128xf32>
    %c0_36 = arith.constant 0 : index
    %c0_37 = arith.constant 0 : index
    %49 = vector.load %arg14[%c0_36, %c0_37] : memref<128x784xbf16, #tpu.memory_space<vmem>>, vector<128x784xbf16>
    %c0_38 = arith.constant 0 : index
    %c0_39 = arith.constant 0 : index
    %50 = vector.load %arg15[%c0_38, %c0_39] : memref<1x784xf32, #tpu.memory_space<vmem>>, vector<1x784xf32>
    %51 = arith.truncf %48 : vector<152x128xf32> to vector<152x128xbf16>
    %cst_40 = arith.constant dense<0.000000e+00> : vector<152x784xf32>
    %52 = tpu.matmul %51, %49, %cst_40 {dimension_numbers = #tpu.dot_dimension_numbers<[1], [0], [0], [1], [0, 0, 1, 1], [], []>} : vector<152x128xbf16>, vector<128x784xbf16>, vector<152x784xf32> -> vector<152x784xf32>
    %53 = vector.broadcast %50 : vector<1x784xf32> to vector<152x784xf32>
    %54 = arith.addf %52, %53 : vector<152x784xf32>
    %55 = math.tanh %54 : vector<152x784xf32>
    %c0_41 = arith.constant 0 : index
    %c0_42 = arith.constant 0 : index
    %56 = vector.load %arg16[%c0_41, %c0_42] : memref<152x784xf32, #tpu.memory_space<vmem>>, vector<152x784xf32>
    tpu.vector_store %arg16[%c0_41, %c0_42], %55 {strides = array<i32>} : memref<152x784xf32, #tpu.memory_space<vmem>>, vector<152x784xf32>,
    return
  }
  func.func @transform_0(%arg0: i32) -> (i32, i32) {
    %c0_i32 = arith.constant 0 : i32
    %c0_i32_0 = arith.constant 0 : i32
    return %arg0, %c0_i32 : i32, i32
  }
  func.func @transform_1(%arg0: i32) -> (i32, i32) {
    %c0_i32 = arith.constant 0 : i32
    %c0_i32_0 = arith.constant 0 : i32
    %c0_i32_1 = arith.constant 0 : i32
    return %c0_i32, %c0_i32_0 : i32, i32
  }
  func.func @transform_2(%arg0: i32) -> (i32, i32) {
    %c0_i32 = arith.constant 0 : i32
    %c0_i32_0 = arith.constant 0 : i32
    %c0_i32_1 = arith.constant 0 : i32
    return %c0_i32, %c0_i32_0 : i32, i32
  }
  func.func @transform_3(%arg0: i32) -> (i32, i32) {
    %c0_i32 = arith.constant 0 : i32
    %c0_i32_0 = arith.constant 0 : i32
    %c0_i32_1 = arith.constant 0 : i32
    return %c0_i32, %c0_i32_0 : i32, i32
  }
  func.func @transform_4(%arg0: i32) -> (i32, i32) {
    %c0_i32 = arith.constant 0 : i32
    %c0_i32_0 = arith.constant 0 : i32
    %c0_i32_1 = arith.constant 0 : i32
    return %c0_i32, %c0_i32_0 : i32, i32
  }
  func.func @transform_5(%arg0: i32) -> (i32, i32) {
    %c0_i32 = arith.constant 0 : i32
    %c0_i32_0 = arith.constant 0 : i32
    %c0_i32_1 = arith.constant 0 : i32
    return %c0_i32, %c0_i32_0 : i32, i32
  }
  func.func @transform_6(%arg0: i32) -> (i32, i32) {
    %c0_i32 = arith.constant 0 : i32
    %c0_i32_0 = arith.constant 0 : i32
    %c0_i32_1 = arith.constant 0 : i32
    return %c0_i32, %c0_i32_0 : i32, i32
  }
  func.func @transform_7(%arg0: i32) -> (i32, i32) {
    %c0_i32 = arith.constant 0 : i32
    %c0_i32_0 = arith.constant 0 : i32
    %c0_i32_1 = arith.constant 0 : i32
    return %c0_i32, %c0_i32_0 : i32, i32
  }
  func.func @transform_8(%arg0: i32) -> (i32, i32) {
    %c0_i32 = arith.constant 0 : i32
    %c0_i32_0 = arith.constant 0 : i32
    %c0_i32_1 = arith.constant 0 : i32
    return %c0_i32, %c0_i32_0 : i32, i32
  }
  func.func @transform_9(%arg0: i32) -> (i32, i32) {
    %c0_i32 = arith.constant 0 : i32
    %c0_i32_0 = arith.constant 0 : i32
    %c0_i32_1 = arith.constant 0 : i32
    return %c0_i32, %c0_i32_0 : i32, i32
  }
  func.func @transform_10(%arg0: i32) -> (i32, i32) {
    %c0_i32 = arith.constant 0 : i32
    %c0_i32_0 = arith.constant 0 : i32
    %c0_i32_1 = arith.constant 0 : i32
    return %c0_i32, %c0_i32_0 : i32, i32
  }
  func.func @transform_11(%arg0: i32) -> (i32, i32) {
    %c0_i32 = arith.constant 0 : i32
    %c0_i32_0 = arith.constant 0 : i32
    %c0_i32_1 = arith.constant 0 : i32
    return %c0_i32, %c0_i32_0 : i32, i32
  }
  func.func @transform_12(%arg0: i32) -> (i32, i32) {
    %c0_i32 = arith.constant 0 : i32
    %c0_i32_0 = arith.constant 0 : i32
    %c0_i32_1 = arith.constant 0 : i32
    return %c0_i32, %c0_i32_0 : i32, i32
  }
  func.func @transform_13(%arg0: i32) -> (i32, i32) {
    %c0_i32 = arith.constant 0 : i32
    %c0_i32_0 = arith.constant 0 : i32
    %c0_i32_1 = arith.constant 0 : i32
    return %c0_i32, %c0_i32_0 : i32, i32
  }
  func.func @transform_14(%arg0: i32) -> (i32, i32) {
    %c0_i32 = arith.constant 0 : i32
    %c0_i32_0 = arith.constant 0 : i32
    %c0_i32_1 = arith.constant 0 : i32
    return %c0_i32, %c0_i32_0 : i32, i32
  }
  func.func @transform_15(%arg0: i32) -> (i32, i32) {
    %c0_i32 = arith.constant 0 : i32
    %c0_i32_0 = arith.constant 0 : i32
    return %arg0, %c0_i32 : i32, i32
  }
}

</mosaic_0001>

<bundles_post_ra>
// kernel: tpu_custom_call.1
= control target key start
LH: loop header
LB: loop body
LE: loop exit
PB: predicated region body
PF: predicated region fallthrough
CT: control target
= control target key end

     0   :  { %s7431_s0 = inlined_call_operand.hbm [shape: f32[300,784], index: 0, kind: input, shape index: {}]   ;;  %s7432_s1 = inlined_call_operand.hbm [shape: bf16[784,128], index: 1, kind: input, shape index: {}]   ;;  %s7433_s2 = inlined_call_operand.hbm [shape: f32[1,128], index: 2, kind: input, shape index: {}]   ;;  %s7434_s3 = inlined_call_operand.vmem [shape: bf16[128,64], index: 3, kind: input, shape index: {}]   ;;  %s7435_s4 = inlined_call_operand.hbm [shape: f32[1,64], index: 4, kind: input, shape index: {}]   ;;  %s7436_s5 = inlined_call_operand.vmem [shape: bf16[64,12], index: 5, kind: input, shape index: {}]   ;;  %s7437_s6 = inlined_call_operand.hbm [shape: f32[1,12], index: 6, kind: input, shape index: {}]   ;;  %s7438_s7 = inlined_call_operand.hbm [shape: bf16[12,12], index: 7, kind: input, shape index: {}]   ;;  %s7439_s8 = inlined_call_operand.hbm [shape: f32[1,12], index: 8, kind: input, shape index: {}]   ;;  %s7440_s9 = inlined_call_operand.hbm [shape: bf16[12,64], index: 9, kind: input, shape index: {}]   ;;  %s7441_s10 = inlined_call_operand.hbm [shape: f32[1,64], index: 10, kind: input, shape index: {}]   ;;  %s7442_s11 = inlined_call_operand.hbm [shape: bf16[64,128], index: 11, kind: input, shape index: {}]   ;;  %s7443_s12 = inlined_call_operand.hbm [shape: f32[1,128], index: 12, kind: input, shape index: {}]   ;;  %s7444_s13 = inlined_call_operand.vmem [shape: bf16[128,784], index: 13, kind: input, shape index: {}]   ;;  %s7445_s14 = inlined_call_operand.hbm [shape: f32[1,784], index: 14, kind: input, shape index: {}]   ;;  %s7446_s15 = inlined_call_operand.hbm [shape: f32[300,784], index: 15, kind: output, shape index: {}]  }
   0x1   :  { %7460 = sst [smem:[#allocation33_spill]] %s7431_s0 }
   0x2   :  { %7461 = sst [smem:[#allocation34_spill]] %s7432_s1 }
   0x3   :  { %7462 = sst [smem:[#allocation35_spill]] %s7433_s2 }
   0x4   :  { %7463 = sst [smem:[#allocation36_spill]] %s7434_s3 }
   0x5   :  { %7464 = sst [smem:[#allocation37_spill]] %s7435_s4 }
   0x6   :  { %7465 = sst [smem:[#allocation38_spill]] %s7436_s5 }
   0x7   :  { %7466 = sst [smem:[#allocation39_spill]] %s7437_s6 }
   0x8   :  { %7467 = sst [smem:[#allocation40_spill]] %s7438_s7 }
   0x9   :  { %7468 = sst [smem:[#allocation41_spill]] %s7444_s13 }
   0xa   :  { %7469 = sst [smem:[#allocation42_spill]] %s7446_s15 }
   0xb   :  { %20 = vsyncpa [#allocation3], 0 }
   0xc   :  { %22 = vsyncpa [#allocation3 + $0x1], 0 }
   0xd   :  { %23 = vsyncpa [#allocation6], 0 }
   0xe   :  { %24 = vsyncpa [#allocation9], 0 }
   0xf   :  { %25 = vsyncpa [#allocation12], 0 }
  0x10   :  { %26 = vsyncpa [#allocation15], 0 }
  0x11   :  { %27 = vsyncpa [#allocation18], 0 }
  0x12   :  { %28 = vsyncpa [#allocation21], 0 }
  0x13   :  { %29 = vsyncpa [#allocation4], 0 }
  0x14   :  { %31 = vsyncpa [#allocation4 + $0x1], 0  ;;  %s5996_s18 = smov 0   ;;  %s5998_s19 = smov 0  }
  0x15   :  { %s6000_s20 = smov 0   ;;  %s6002_s21 = smov 0  }
  0x16 LB: > { %s5896_s22 = smov [#allocation5]   ;;  %s6017_s24 = sadd.s32 4294967295, %s5894_s21   ;;  %s5894_s21 = sphi %s6002_s21, %s7514_s21   ;;  %s5890_s20 = sphi %s6000_s20, %s7513_s20   ;;  %s5886_s19 = sphi %s5998_s19, %s7512_s19   ;;  %s5882_s18 = sphi %s5996_s18, %s7511_s18  }
  0x17   : > { %s400_s23 = sshll.u32 %s5896_s22, 4  ;;  %7470 = sst [smem:[#allocation31_spill]] %s6017_s24  ;;  %s6022_s23 = int_to_ptr.vmem [resolvable:$true] %s400_s23 }
  0x18   : > { %p4138_p0 = scmp.ge.s32.totalorder %s5894_s21, 1  ;;  %p7456_p1 = scmp.eq.s32.totalorder %s6017_s24, 0 }
  0x19   : > { %p388_p2 = scmp.lt.s32.totalorder %s5894_s21, 3  ;;  %s5897_s27 = smov [#allocation8]  }
  0x1a   : > { %s428_s28 = sshll.u32 %s5897_s27, 4  ;;  %s5898_s29 = smov [#allocation11]   ;;  %s6037_s28 = int_to_ptr.vmem [resolvable:$true] %s428_s28 }
  0x1b   : > { %p6024_p3 = pnand %p4138_p0, %p388_p2  ;;  %s452_s30 = sshll.u32 %s5898_s29, 4  ;;  %s6039_s30 = int_to_ptr.vmem [resolvable:$true] %s452_s30 }
  0x1c   : > { %s7474_s1 = sld [smem:[#allocation34_spill]] }
  0x1d   : > { %s7471_s25 = scalar_select %p6024_p3, 1, 0 }
  0x1e   : > { %p4935_p5 = pneg %p6024_p3 }
  0x1f   : > { %7472 = sst [smem:[#allocation32_spill]] %s7471_s25 }
  0x20   : > { %p6033_p6 = pnand %p4935_p5, %p7456_p1 }
  0x22   : > { %s5466_s22 = scalar_lea.hbm %s7474_s1, 6272  ;;  %p6049_p8 = pneg %p6033_p6 }
  0x23   : > { %p5467_p7 = scmp.ne.s32.totalorder %s7474_s1, %s5466_s22  ;;  %p5473_p11 = scmp.lt.u32.totalorder %s5466_s22, %s7474_s1 }
  0x25   : > { %p5469_p9 = pnand %p6049_p8, %p5467_p7 }
  0x27   : > { %p5470_p10 = pneg %p5469_p9 }
  0x29   : > { %p5475_p12 = pnand %p5473_p11, %p5470_p10 }
  0x2b   : > { %5478 = shalt.err (!%p5475_p12)
}
  0x2c   : > { %s5479_s13 = scalar_lea.vmem %s6022_s23, 6272  ;;  %p5487_p5 = scmp.lt.s32.totalorder %s6022_s23, %s6022_s23 }
  0x2d   : > { %p5480_p13 = scmp.ne.s32.totalorder %s6022_s23, %s5479_s13  ;;  %p5488_p4 = scmp.lt.s32.totalorder %s5479_s13, %s5479_s13 }
  0x2f   : > { %p5482_p0 = pnand %p5480_p13, %p6049_p8  ;;  %p5489_p7 = por %p5488_p4, %p5487_p5 }
  0x31   : > { %p5483_p2 = pneg %p5482_p0 }
  0x33   : > { %p5490_p9 = pnand %p5489_p7, %p5483_p2 }
  0x35   : > { %5493 = shalt.err (!%p5490_p9)
}
  0x36   : > { %s5899_s15 = smov 64   ;;  %s5900_s16 = smov 4  }
  0x37   : > { %4938 = dma.hbm_to_vmem [thread:$0]  (!%p6033_p6), %s7474_s1, 6272, %s6022_s23, [#allocation6], %s5899_s15, %s5899_s15, %s5900_s16  }
  0x38   : > { %s7476_s4 = sld [smem:[#allocation37_spill]] }
  0x3e   : > { %s5494_s13 = scalar_lea.hbm %s7476_s4, 16 }
  0x3f   : > { %p5495_p4 = scmp.ne.s32.totalorder %s7476_s4, %s5494_s13  ;;  %p5501_p12 = scmp.lt.u32.totalorder %s5494_s13, %s7476_s4 }
  0x41   : > { %p5497_p10 = pnand %p5495_p4, %p6049_p8 }
  0x43   : > { %p5498_p11 = pneg %p5497_p10 }
  0x45   : > { %p5503_p13 = pnand %p5501_p12, %p5498_p11 }
  0x47   : > { %5506 = shalt.err (!%p5503_p13)
}
  0x48   : > { %s5507_s23 = scalar_lea.vmem %s6037_s28, 16  ;;  %s5514_s3 = scalar_lea.vmem %s6037_s28, 32 }
  0x49   : > { %p5508_p0 = scmp.ne.s32.totalorder %s6037_s28, %s5507_s23  ;;  %p5515_p7 = scmp.lt.s32.totalorder %s6037_s28, %s6037_s28 }
  0x4a   : > { %p5516_p9 = scmp.lt.s32.totalorder %s5514_s3, %s5507_s23 }
  0x4b   : > { %p5510_p2 = pnand %p5508_p0, %p6049_p8 }
  0x4c   : > { %p5517_p4 = por %p5516_p9, %p5515_p7 }
  0x4d   : > { %p5511_p5 = pneg %p5510_p2 }
  0x4f   : > { %p5518_p10 = pnand %p5517_p4, %p5511_p5 }
  0x51   : > { %5521 = shalt.err (!%p5518_p10)
}
  0x52   : > { %4944 = dma.hbm_to_vmem [thread:$0]  (!%p6033_p6), %s7476_s4, 16, %s6037_s28, [#allocation9]  }
  0x53   : > { %s7477_s7 = sld [smem:[#allocation40_spill]] }
  0x59   : > { %s5522_s22 = scalar_lea.hbm %s7477_s7, 128 }
  0x5a   : > { %p5523_p11 = scmp.ne.s32.totalorder %s7477_s7, %s5522_s22  ;;  %p5529_p0 = scmp.lt.u32.totalorder %s5522_s22, %s7477_s7 }
  0x5c   : > { %p5525_p12 = pnand %p5523_p11, %p6049_p8 }
  0x5e   : > { %p5526_p13 = pneg %p5525_p12 }
  0x60   : > { %p5531_p2 = pnand %p5529_p0, %p5526_p13 }
  0x62   : > { %5534 = shalt.err (!%p5531_p2)
}
  0x63   : > { %s5535_s28 = scalar_lea.vmem %s6039_s30, 128  ;;  %p5543_p4 = scmp.lt.s32.totalorder %s6039_s30, %s6039_s30 }
  0x64   : > { %p5536_p5 = scmp.ne.s32.totalorder %s6039_s30, %s5535_s28  ;;  %p5544_p10 = scmp.lt.s32.totalorder %s5535_s28, %s5535_s28 }
  0x66   : > { %p5538_p7 = pnand %p5536_p5, %p6049_p8  ;;  %p5545_p11 = por %p5544_p10, %p5543_p4 }
  0x68   : > { %p5539_p9 = pneg %p5538_p7 }
  0x6a   : > { %p5546_p12 = pnand %p5545_p11, %p5539_p9 }
  0x6c   : > { %5549 = shalt.err (!%p5546_p12)
}
  0x6d   : > { %4950 = dma.hbm_to_vmem [thread:$0]  (!%p6033_p6), %s7477_s7, 128, %s6039_s30, [#allocation12], %s5899_s15, %s5899_s15, %s5900_s16  }
  0x6e   : > { %s5901_s24 = smov [#allocation14]   ;;  %s5902_s17 = smov [#allocation17]  }
  0x6f   : > { %s476_s25 = sshll.u32 %s5901_s24, 4  ;;  %s500_s22 = sshll.u32 %s5902_s17, 4  ;;  %s477_s25 = int_to_ptr.vmem [resolvable:$true] %s476_s25  ;;  %s6123_s22 = int_to_ptr.vmem [resolvable:$true] %s500_s22 }
  0x70   : > { %s5550_s13 = scalar_lea.hbm %s7440_s9, 128 }
  0x71   : > { %p5551_p13 = scmp.ne.s32.totalorder %s7440_s9, %s5550_s13  ;;  %p5557_p5 = scmp.lt.u32.totalorder %s5550_s13, %s7440_s9 }
  0x73   : > { %p5553_p0 = pnand %p5551_p13, %p6049_p8 }
  0x75   : > { %p5554_p2 = pneg %p5553_p0 }
  0x77   : > { %p5559_p7 = pnand %p5557_p5, %p5554_p2 }
  0x79   : > { %5562 = shalt.err (!%p5559_p7)
}
  0x7a   : > { %s5563_s0 = scalar_lea.vmem %s477_s25, 128  ;;  %p5571_p11 = scmp.lt.s32.totalorder %s477_s25, %s477_s25 }
  0x7b   : > { %p5564_p9 = scmp.ne.s32.totalorder %s477_s25, %s5563_s0  ;;  %p5572_p12 = scmp.lt.s32.totalorder %s5563_s0, %s5563_s0 }
  0x7d   : > { %p5566_p4 = pnand %p5564_p9, %p6049_p8  ;;  %p5573_p1 = por %p5572_p12, %p5571_p11 }
  0x7f   : > { %p5567_p10 = pneg %p5566_p4 }
  0x81   : > { %p5574_p3 = pnand %p5573_p1, %p5567_p10 }
  0x83   : > { %5577 = shalt.err (!%p5574_p3)
}
  0x84   : > { %4956 = dma.hbm_to_vmem [thread:$0]  (!%p6033_p6), %s7440_s9, 128, %s477_s25, [#allocation15], %s5899_s15, %s5899_s15, %s5900_s16  }
  0x85   : > { %s5578_s13 = scalar_lea.hbm %s7442_s11, 512 }
  0x86   : > { %p5579_p13 = scmp.ne.s32.totalorder %s7442_s11, %s5578_s13  ;;  %p5585_p0 = scmp.lt.u32.totalorder %s5578_s13, %s7442_s11 }
  0x88   : > { %p5581_p1 = pnand %p5579_p13, %p6049_p8 }
  0x8a   : > { %p5582_p3 = pneg %p5581_p1 }
  0x8c   : > { %p5587_p2 = pnand %p5585_p0, %p5582_p3 }
  0x8e   : > { %5590 = shalt.err (!%p5587_p2)
}
  0x8f   : > { %s5591_s25 = scalar_lea.vmem %s6123_s22, 512  ;;  %p5599_p4 = scmp.lt.s32.totalorder %s6123_s22, %s6123_s22 }
  0x90   : > { %p5592_p5 = scmp.ne.s32.totalorder %s6123_s22, %s5591_s25  ;;  %p5600_p10 = scmp.lt.s32.totalorder %s5591_s25, %s5591_s25 }
  0x92   : > { %p5594_p7 = pnand %p5592_p5, %p6049_p8  ;;  %p5601_p11 = por %p5600_p10, %p5599_p4 }
  0x94   : > { %p5595_p9 = pneg %p5594_p7 }
  0x96   : > { %p5602_p12 = pnand %p5601_p11, %p5595_p9 }
  0x98   : > { %5605 = shalt.err (!%p5602_p12)
}
  0x99   : > { %4962 = dma.hbm_to_vmem [thread:$0]  (!%p6033_p6), %s7442_s11, 512, %s6123_s22, [#allocation18], %s5899_s15, %s5899_s15, %s5900_s16  }
  0x9a   : > { %s5903_s17 = smov [#allocation7]   ;;  %s5904_s29 = smov [#allocation10]  }
  0x9b   : > { %s414_s27 = sshll.u32 %s5903_s17, 4  ;;  %s442_s13 = sshll.u32 %s5904_s29, 4  ;;  %s415_s27 = int_to_ptr.vmem [resolvable:$true] %s414_s27  ;;  %s6172_s13 = int_to_ptr.vmem [resolvable:$true] %s442_s13 }
  0x9c   : > { %s7478_s2 = sld [smem:[#allocation35_spill]] }
  0xa2   : > { %s5606_s3 = scalar_lea.hbm %s7478_s2, 16 }
  0xa3   : > { %p5607_p13 = scmp.ne.s32.totalorder %s7478_s2, %s5606_s3  ;;  %p5613_p0 = scmp.lt.u32.totalorder %s5606_s3, %s7478_s2 }
  0xa5   : > { %p5609_p1 = pnand %p5607_p13, %p6049_p8 }
  0xa7   : > { %p5610_p3 = pneg %p5609_p1 }
  0xa9   : > { %p5615_p2 = pnand %p5613_p0, %p5610_p3 }
  0xab   : > { %5618 = shalt.err (!%p5615_p2)
}
  0xac   : > { %s5619_s16 = scalar_lea.vmem %s415_s27, 16  ;;  %s5626_s22 = scalar_lea.vmem %s415_s27, 32 }
  0xad   : > { %p5620_p5 = scmp.ne.s32.totalorder %s415_s27, %s5619_s16  ;;  %p5627_p4 = scmp.lt.s32.totalorder %s415_s27, %s415_s27 }
  0xae   : > { %p5628_p10 = scmp.lt.s32.totalorder %s5626_s22, %s5619_s16 }
  0xaf   : > { %p5622_p7 = pnand %p5620_p5, %p6049_p8 }
  0xb0   : > { %p5629_p11 = por %p5628_p10, %p5627_p4 }
  0xb1   : > { %p5623_p9 = pneg %p5622_p7 }
  0xb3   : > { %p5630_p12 = pnand %p5629_p11, %p5623_p9 }
  0xb5   : > { %5633 = shalt.err (!%p5630_p12)
}
  0xb6   : > { %4941 = dma.hbm_to_vmem [thread:$0]  (!%p6033_p6), %s7478_s2, 16, %s415_s27, [#allocation6]  }
  0xb7   : > { %s7479_s6 = sld [smem:[#allocation39_spill]] }
  0xbd   : > { %s5634_s28 = scalar_lea.hbm %s7479_s6, 16 }
  0xbe   : > { %p5635_p13 = scmp.ne.s32.totalorder %s7479_s6, %s5634_s28  ;;  %p5641_p0 = scmp.lt.u32.totalorder %s5634_s28, %s7479_s6 }
  0xc0   : > { %p5637_p1 = pnand %p5635_p13, %p6049_p8 }
  0xc2   : > { %p5638_p3 = pneg %p5637_p1 }
  0xc4   : > { %p5643_p2 = pnand %p5641_p0, %p5638_p3 }
  0xc6   : > { %5646 = shalt.err (!%p5643_p2)
}
  0xc7   : > { %s5647_s27 = scalar_lea.vmem %s6172_s13, 16  ;;  %s5654_s15 = scalar_lea.vmem %s6172_s13, 32 }
  0xc8   : > { %p5648_p5 = scmp.ne.s32.totalorder %s6172_s13, %s5647_s27  ;;  %p5655_p4 = scmp.lt.s32.totalorder %s6172_s13, %s6172_s13 }
  0xc9   : > { %p5656_p10 = scmp.lt.s32.totalorder %s5654_s15, %s5647_s27 }
  0xca   : > { %p5650_p7 = pnand %p5648_p5, %p6049_p8 }
  0xcb   : > { %p5657_p11 = por %p5656_p10, %p5655_p4 }
  0xcc   : > { %p5651_p9 = pneg %p5650_p7 }
  0xce   : > { %p5658_p12 = pnand %p5657_p11, %p5651_p9 }
  0xd0   : > { %5661 = shalt.err (!%p5658_p12)
}
  0xd1   : > { %4947 = dma.hbm_to_vmem [thread:$0]  (!%p6033_p6), %s7479_s6, 16, %s6172_s13, [#allocation9]  }
  0xd2   : > { %s5905_s24 = smov [#allocation13]   ;;  %s5906_s29 = smov [#allocation16]  }
  0xd3   : > { %s466_s17 = sshll.u32 %s5905_s24, 4  ;;  %s490_s23 = sshll.u32 %s5906_s29, 4  ;;  %s467_s17 = int_to_ptr.vmem [resolvable:$true] %s466_s17  ;;  %s6216_s23 = int_to_ptr.vmem [resolvable:$true] %s490_s23 }
  0xd4   : > { %s5662_s30 = scalar_lea.hbm %s7439_s8, 16 }
  0xd5   : > { %p5663_p13 = scmp.ne.s32.totalorder %s7439_s8, %s5662_s30  ;;  %p5669_p0 = scmp.lt.u32.totalorder %s5662_s30, %s7439_s8 }
  0xd7   : > { %p5665_p1 = pnand %p5663_p13, %p6049_p8 }
  0xd9   : > { %p5666_p3 = pneg %p5665_p1 }
  0xdb   : > { %p5671_p2 = pnand %p5669_p0, %p5666_p3 }
  0xdd   : > { %5674 = shalt.err (!%p5671_p2)
}
  0xde   : > { %s5675_s15 = scalar_lea.vmem %s467_s17, 16  ;;  %s5682_s16 = scalar_lea.vmem %s467_s17, 32 }
  0xdf   : > { %p5676_p5 = scmp.ne.s32.totalorder %s467_s17, %s5675_s15  ;;  %p5683_p4 = scmp.lt.s32.totalorder %s467_s17, %s467_s17 }
  0xe0   : > { %p5684_p10 = scmp.lt.s32.totalorder %s5682_s16, %s5675_s15 }
  0xe1   : > { %p5678_p7 = pnand %p5676_p5, %p6049_p8 }
  0xe2   : > { %p5685_p11 = por %p5684_p10, %p5683_p4 }
  0xe3   : > { %p5679_p9 = pneg %p5678_p7 }
  0xe5   : > { %p5686_p12 = pnand %p5685_p11, %p5679_p9 }
  0xe7   : > { %5689 = shalt.err (!%p5686_p12)
}
  0xe8   : > { %4953 = dma.hbm_to_vmem [thread:$0]  (!%p6033_p6), %s7439_s8, 16, %s467_s17, [#allocation12]  }
  0xe9   : > { %s5690_s3 = scalar_lea.hbm %s7441_s10, 16 }
  0xea   : > { %p5691_p13 = scmp.ne.s32.totalorder %s7441_s10, %s5690_s3  ;;  %p5697_p0 = scmp.lt.u32.totalorder %s5690_s3, %s7441_s10 }
  0xec   : > { %p5693_p1 = pnand %p5691_p13, %p6049_p8 }
  0xee   : > { %p5694_p3 = pneg %p5693_p1 }
  0xf0   : > { %p5699_p2 = pnand %p5697_p0, %p5694_p3 }
  0xf2   : > { %5702 = shalt.err (!%p5699_p2)
}
  0xf3   : > { %s5703_s17 = scalar_lea.vmem %s6216_s23, 16  ;;  %s5710_s13 = scalar_lea.vmem %s6216_s23, 32 }
  0xf4   : > { %p5704_p5 = scmp.ne.s32.totalorder %s6216_s23, %s5703_s17  ;;  %p5711_p4 = scmp.lt.s32.totalorder %s6216_s23, %s6216_s23 }
  0xf5   : > { %p5712_p10 = scmp.lt.s32.totalorder %s5710_s13, %s5703_s17 }
  0xf6   : > { %p5706_p7 = pnand %p5704_p5, %p6049_p8 }
  0xf7   : > { %p5713_p11 = por %p5712_p10, %p5711_p4 }
  0xf8   : > { %p5707_p9 = pneg %p5706_p7 }
  0xfa   : > { %p5714_p12 = pnand %p5713_p11, %p5707_p9 }
  0xfc   : > { %5717 = shalt.err (!%p5714_p12)
}
  0xfd   : > { %4959 = dma.hbm_to_vmem [thread:$0]  (!%p6033_p6), %s7441_s10, 16, %s6216_s23, [#allocation15]  }
  0xfe   : > { %s5907_s22 = smov [#allocation19]   ;;  %s5908_s29 = smov [#allocation20]  }
  0xff   : > { %s514_s24 = sshll.u32 %s5907_s22, 4  ;;  %s528_s28 = sshll.u32 %s5908_s29, 4  ;;  %s515_s24 = int_to_ptr.vmem [resolvable:$true] %s514_s24  ;;  %s6260_s28 = int_to_ptr.vmem [resolvable:$true] %s528_s28 }
 0x100   : > { %s5718_s25 = scalar_lea.hbm %s7443_s12, 16 }
 0x101   : > { %p5719_p13 = scmp.ne.s32.totalorder %s7443_s12, %s5718_s25  ;;  %p5725_p0 = scmp.lt.u32.totalorder %s5718_s25, %s7443_s12 }
 0x103   : > { %p5721_p1 = pnand %p5719_p13, %p6049_p8 }
 0x105   : > { %p5722_p3 = pneg %p5721_p1 }
 0x107   : > { %p5727_p2 = pnand %p5725_p0, %p5722_p3 }
 0x109   : > { %5730 = shalt.err (!%p5727_p2)
}
 0x10a   : > { %s5731_s13 = scalar_lea.vmem %s515_s24, 16  ;;  %s5738_s15 = scalar_lea.vmem %s515_s24, 32 }
 0x10b   : > { %p5732_p5 = scmp.ne.s32.totalorder %s515_s24, %s5731_s13  ;;  %p5739_p4 = scmp.lt.s32.totalorder %s515_s24, %s515_s24 }
 0x10c   : > { %p5740_p10 = scmp.lt.s32.totalorder %s5738_s15, %s5731_s13 }
 0x10d   : > { %p5734_p7 = pnand %p5732_p5, %p6049_p8 }
 0x10e   : > { %p5741_p11 = por %p5740_p10, %p5739_p4 }
 0x10f   : > { %p5735_p9 = pneg %p5734_p7 }
 0x111   : > { %p5742_p12 = pnand %p5741_p11, %p5735_p9 }
 0x113   : > { %5745 = shalt.err (!%p5742_p12)
}
 0x114   : > { %4965 = dma.hbm_to_vmem [thread:$0]  (!%p6033_p6), %s7443_s12, 16, %s515_s24, [#allocation18]  }
 0x115   : > { %s5746_s30 = scalar_lea.hbm %s7445_s14, 112 }
 0x116   : > { %p5747_p13 = scmp.ne.s32.totalorder %s7445_s14, %s5746_s30  ;;  %p5753_p0 = scmp.lt.u32.totalorder %s5746_s30, %s7445_s14 }
 0x118   : > { %p5749_p1 = pnand %p5747_p13, %p6049_p8 }
 0x11a   : > { %p5750_p3 = pneg %p5749_p1 }
 0x11c   : > { %p5755_p2 = pnand %p5753_p0, %p5750_p3 }
 0x11e   : > { %5758 = shalt.err (!%p5755_p2)
}
 0x11f   : > { %s5759_s24 = scalar_lea.vmem %s6260_s28, 112  ;;  %s5766_s23 = scalar_lea.vmem %s6260_s28, 128 }
 0x120   : > { %p5760_p5 = scmp.ne.s32.totalorder %s6260_s28, %s5759_s24  ;;  %p5767_p4 = scmp.lt.s32.totalorder %s6260_s28, %s6260_s28 }
 0x121   : > { %p5768_p10 = scmp.lt.s32.totalorder %s5766_s23, %s5759_s24 }
 0x122   : > { %p5762_p7 = pnand %p5760_p5, %p6049_p8 }
 0x123   : > { %p5769_p11 = por %p5768_p10, %p5767_p4 }
 0x124   : > { %p5763_p9 = pneg %p5762_p7 }
 0x126   : > { %p5770_p12 = pnand %p5769_p11, %p5763_p9 }
 0x128   : > { %5773 = shalt.err (!%p5770_p12)
}
 0x129   : > { %s7480_s5 = sld [smem:[#allocation31_spill]]  ;;  %s4137_s26 = sadd.s32 4294967294, %s5894_s21  }
 0x12a   : > { %4968 = dma.hbm_to_vmem [thread:$0]  (!%p6033_p6), %s7445_s14, 112, %s6260_s28, [#allocation21]  }
 0x12b   : > { %s6306_s16 = sadd.s32 1, %s5894_s21   ;;  %s44_s29 = sadd.s32 1, %s5890_s20 }
 0x12c   : > { %s41_s22 = ssub.s32 %s5894_s21, %s6306_s16  ;;  %p51_p13 = scmp.ne.s32.totalorder %s5890_s20, %s5886_s19 }
 0x12d   : > { %p42_p8 = scmp.eq.s32.totalorder %s41_s22, 0  ;;  %p52_p1 = scmp.eq.s32.totalorder %s5894_s21, 0 }
 0x12e   : > { %p57_p3 = scmp.ne.s32.totalorder %s5886_s19, %s5882_s18  ;;  %p381_p7 = scmp.eq.s32.totalorder %s4137_s26, 1 }
 0x12f   : > { %s6317_s3 = scalar_select %p42_p8, %s5890_s20, %s44_s29  }
 0x130   : > { %p53_p0 = por %p52_p1, %p51_p13  ;;  %p7481_p2 = scmp.eq.s32.totalorder %s7480_s5, 0 }
 0x131   : > { %p375_p6 = scmp.eq.s32.totalorder %s7480_s5, 1  ;;  %p4988_p9 = scmp.lt.s32.totalorder %s5894_s21, 2 }
 0x132   : > { %p6321_p5 = por %p7481_p2, %p57_p3  ;;  %s539_s28 = sand.u32 1, %s5890_s20  }
 0x133   : > { %p6328_p4 = por %p375_p6, %p51_p13  ;;  %p6332_p10 = por %p381_p7, %p57_p3 }
 0x134   : > { %s4883_s27 = smul.u32 1064, %s539_s28  ;;  %p6337_p11 = pnand %p4988_p9, %p53_p0 }
 0x135   : > { %s7483_s25 = scalar_select %p6328_p4, 1, 0 }
 0x136   : > { %s7484_s0 = scalar_select %p6332_p10, 1, 0 }
 0x137   : > { %s4989_s17 = smul.u32 17024, %s5894_s21  ;;  %s7486_s15 = sld [smem:[#allocation33_spill]] }
 0x138   : > { %s543_s26 = scalar_lea.vmem [#allocation2], %s4883_s27  ;;  %s6348_s29 = scalar_lea.sflag [#allocation3], %s539_s28 }
 0x139   : > { %s551_s22 = sshll.u32 %s543_s26, 4  ;;  %p5776_p8 = pneg %p6337_p11  ;;  %s6346_s22 = int_to_ptr.vmem [resolvable:$true] %s551_s22 }
 0x13d   : > { %s6344_s5 = scalar_lea.hbm %s7486_s15, %s4989_s17  ;;  %s5779_s13 = scalar_lea.hbm %s7486_s15, 34048 }
 0x13e   : > { %s5774_s1 = scalar_lea.hbm %s6344_s5, 17024  ;;  %p5780_p3 = scmp.lt.u32.totalorder %s6344_s5, %s7486_s15 }
 0x13f   : > { %p5775_p12 = scmp.ne.s32.totalorder %s6344_s5, %s5774_s1  ;;  %p5781_p0 = scmp.lt.u32.totalorder %s5779_s13, %s5774_s1 }
 0x140   : > { %p5783_p6 = scmp.lt.u32.totalorder %s5774_s1, %s6344_s5 }
 0x141   : > { %p5777_p13 = pnand %p5776_p8, %p5775_p12  ;;  %p5782_p2 = por %p5781_p0, %p5780_p3 }
 0x143   : > { %p5778_p1 = pneg %p5777_p13  ;;  %p5784_p7 = por %p5783_p6, %p5782_p2 }
 0x145   : > { %p5785_p9 = pnand %p5784_p7, %p5778_p1 }
 0x147   : > { %5788 = shalt.err (!%p5785_p9)
}
 0x148   : > { %s5789_s28 = scalar_lea.vmem %s6346_s22, 17024  ;;  %s5909_s27 = smov [#allocation2]  }
 0x149   : > { %p5790_p12 = scmp.ne.s32.totalorder %s6346_s22, %s5789_s28  ;;  %s5794_s26 = sshll.u32 %s5909_s27, 4  ;;  %s5795_s26 = int_to_ptr.vmem [resolvable:$false] %s5794_s26 }
 0x14a   : > { %s5796_s2 = scalar_lea.vmem %s5795_s26, 34048  ;;  %p5797_p4 = scmp.lt.s32.totalorder %s6346_s22, %s5795_s26 }
 0x14b   : > { %p5792_p13 = pnand %p5790_p12, %p5776_p8  ;;  %p5798_p3 = scmp.lt.s32.totalorder %s5796_s2, %s5789_s28 }
 0x14d   : > { %p5793_p10 = pneg %p5792_p13  ;;  %p5799_p0 = por %p5798_p3, %p5797_p4 }
 0x14f   : > { %p5800_p2 = pnand %p5799_p0, %p5793_p10 }
 0x151   : > { %5803 = shalt.err (!%p5800_p2)
}
 0x152   : > { %s5910_s1 = smov 896   ;;  %s5911_s4 = smov 56  }
 0x153   : > { %4972 = dma.hbm_to_vmem [thread:$0]  (!%p6337_p11), %s6344_s5, 17024, %s6346_s22, %s6348_s29, %s5910_s1, %s5910_s1, %s5911_s4  }
 0x154   : > { %s7487_s17 = sld [smem:[#allocation32_spill]] }
 0x15a   : > { %p7488_p8 = scmp.ne.s32.totalorder %s7487_s17, 0 }
 0x15b   : > { %s6379_s23 = sand.u32 (!%p7488_p8), 1, %s5886_s19  }
 0x15c   : > { %563 = sbr.rel (%p7488_p8) target bundleno = 2237 (0x8bd), region = 80  ;;  %s566_s28 = scalar_lea.sflag (!%p7488_p8), [#allocation3], %s6379_s23 }
 0x15d   : > { %s7459_s13 = smul.u32 (!%p7488_p8), 1064, %s6379_s23 }
 0x15f   : > { %s6385_s27 = scalar_lea.vmem (!%p7488_p8), [#allocation2], %s7459_s13 }
 0x163   : > { %5849 = dma.done.wait (%p6321_p5), %s566_s28, 17024  }
 0x164   : > { %5851 = vsyncadd (%p6321_p5), %s566_s28, 4294950272  ;;  %s7489_s24 = sld [smem:[#allocation31_spill]] }
 0x16a   : > { %p7490_p4 = scmp.eq.s32.totalorder %s7489_s24, 0 }
 0x16c   : > { %5853 = dma.done.wait (%p7490_p4), [#allocation6], 6288   ;;  %p7491_p10 = pmov %p7490_p4 }
 0x16d   : > { %p7492_p11 = pmov %p7490_p4 }
 0x16e   : > { %5855 = vsyncadd (%p7491_p10), [#allocation6], 4294961008 }
 0x16f   : > { %5857 = dma.done.wait (%p7492_p11), [#allocation9], 32   ;;  %p7493_p1 = pmov %p7490_p4 }
 0x171   : > { %5859 = vsyncadd (%p7493_p1), [#allocation9], 4294967264  ;;  %p7494_p6 = pmov %p7493_p1 }
 0x172   : > { %p7495_p7 = pmov %p7493_p1 }
 0x173   : > { %5861 = dma.done.wait (%p7494_p6), [#allocation12], 144  }
 0x174   : > { %5863 = vsyncadd (%p7495_p7), [#allocation12], 4294967152  ;;  %p7496_p5 = pmov %p7493_p1 }
 0x175   : > { %p7497_p9 = pmov %p7493_p1 }
 0x176   : > { %5865 = dma.done.wait (%p7496_p5), [#allocation15], 144  }
 0x177   : > { %5867 = vsyncadd (%p7497_p9), [#allocation15], 4294967152  ;;  %p7498_p12 = pmov %p7493_p1 }
 0x178   : > { %p7499_p13 = pmov %p7493_p1 }
 0x179   : > { %5869 = dma.done.wait (%p7498_p12), [#allocation18], 528  }
 0x17a   : > { %5871 = vsyncadd (%p7499_p13), [#allocation18], 4294966768  ;;  %p7500_p3 = pmov %p7493_p1 }
 0x17b   : > { %p7501_p0 = pmov %p7493_p1 }
 0x17c   : > { %5873 = dma.done.wait (%p7500_p3), [#allocation21], 112  }
 0x17d   : > { %5875 = vsyncadd (%p7501_p0), [#allocation21], 4294967184  ;;  %v5053_v0 = vld [vmem:[#allocation5 + $0x40] sm:$0xff]   ;;  %v5057_v4 = vld [vmem:[#allocation5 + $0x48] sm:$0xff]   ;;  %vm1265_vm0 = vcmask 130048   ;;  %s7502_s22 = sld [smem:[#allocation36_spill]] }
 0x17e   : > { %v5054_v1 = vld [vmem:[#allocation5 + $0xc0] sm:$0xff]   ;;  %4346 = vmatprep.subr.bf16.mxu0 %v5053_v0  ;;  %v5058_v5 = vld [vmem:[#allocation5 + $0xc8] sm:$0xff]   ;;  %v5061_v8 = vld [vmem:[#allocation5 + $0x50] sm:$0xff]   ;;  %s7503_s28 = sld [smem:[#allocation38_spill]]  ;;  %vm2241_vm1 = vcmask 1045504   ;;  %vm2024_vm2 = vcmask 523264  }
 0x17f   : > { %v5055_v2 = vld [vmem:[#allocation5] sm:$0xff]   ;;  %4422 = vmatprep.subr.bf16.mxu1 %v5054_v1  ;;  %v5059_v6 = vld [vmem:[#allocation5 + $0x8] sm:$0xff]   ;;  %v5062_v9 = vld [vmem:[#allocation5 + $0xd0] sm:$0xff]   ;;  %vm2210_vm3 = vcmask 97280   ;;  %s7504_s17 = sld [smem:[#allocation41_spill]]  ;;  %s5001_s5 = smul.u32 17024, %s7489_s24 }
 0x180   : > { %v5056_v3 = vld [vmem:[#allocation5 + $0x80] sm:$0xff]   ;;  %4347 = vmatpush3.bf16.msra.mxu0 %v5055_v2  ;;  %v5060_v7 = vld [vmem:[#allocation5 + $0x88] sm:$0xff]   ;;  %v5063_v10 = vld [vmem:[#allocation5 + $0x10] sm:$0xff]   ;;  %s7506_s13 = sld [smem:[#allocation42_spill]]  ;;  %p7507_p8 = scmp.ne.s32.totalorder %s7483_s25, 0 }
 0x181   : > { %4423 = vmatpush3.bf16.msra.mxu1 %v5056_v3  ;;  %4348 = vmatprep.subr.bf16.mxu0 %v5057_v4  ;;  %v5064_v11 = vld [vmem:[#allocation5 + $0x90] sm:$0xff]   ;;  %v5065_v12 = vld [vmem:[#allocation5 + $0x58] sm:$0xff]   ;;  %v5069_v16 = vld [vmem:[#allocation5 + $0x60] sm:$0xff]   ;;  %s5913_s24 = smov [#allocation22]  }
 0x182   : > { %4424 = vmatprep.subr.bf16.mxu1 %v5058_v5  ;;  %v5066_v13 = vld [vmem:[#allocation5 + $0xd8] sm:$0xff]   ;;  %v5070_v17 = vld [vmem:[#allocation5 + $0xe0] sm:$0xff]   ;;  %v5073_v20 = vld [vmem:[#allocation5 + $0x68] sm:$0xff]  }
 0x183   : > { %v5067_v14 = vld [vmem:[#allocation5 + $0x18] sm:$0xff]   ;;  %v5071_v18 = vld [vmem:[#allocation5 + $0x20] sm:$0xff]   ;;  %v5074_v21 = vld [vmem:[#allocation5 + $0xe8] sm:$0xff]  }
 0x184   : > { %4349 = vmatpush3.bf16.msra.mxu0 %v5059_v6  ;;  %v5068_v15 = vld [vmem:[#allocation5 + $0x98] sm:$0xff]   ;;  %v5072_v19 = vld [vmem:[#allocation5 + $0xa0] sm:$0xff]   ;;  %v5075_v22 = vld [vmem:[#allocation5 + $0x28] sm:$0xff]  }
 0x185   : > { %4425 = vmatpush3.bf16.msra.mxu1 %v5060_v7  ;;  %4350 = vmatprep.subr.bf16.mxu0 %v5061_v8  ;;  %v5076_v23 = vld [vmem:[#allocation5 + $0xa8] sm:$0xff]   ;;  %v5077_v24 = vld [vmem:[#allocation5 + $0x70] sm:$0xff]   ;;  %v5081_v28 = vld [vmem:[#allocation5 + $0x78] sm:$0xff]  }
 0x186   : > { %4426 = vmatprep.subr.bf16.mxu1 %v5062_v9  ;;  %v5078_v25 = vld [vmem:[#allocation5 + $0xf0] sm:$0xff]   ;;  %v5082_v29 = vld [vmem:[#allocation5 + $0xf8] sm:$0xff]   ;;  %v673_v36 = vld [vmem:[%s6385_s27 + $0x50] sm:$0xff]  ;;  %s7383_s2 = scalar_lea.hbm %s7506_s13, %s5001_s5 }
 0x187   : > { %v5079_v26 = vld [vmem:[#allocation5 + $0x30] sm:$0xff]   ;;  %v5083_v30 = vld [vmem:[#allocation5 + $0x38] sm:$0xff]   ;;  %v665_v41 = vld [vmem:[%s6385_s27 + $0x10] sm:$0xff] }
 0x188   : > { %4351 = vmatpush3.bf16.msra.mxu0 %v5063_v10  ;;  %v5080_v27 = vld [vmem:[#allocation5 + $0xb0] sm:$0xff]   ;;  %v5084_v31 = vld [vmem:[#allocation5 + $0xb8] sm:$0xff]   ;;  %v5085_v44 = vld [vmem:[#allocation5 + $0x140] sm:$0xff]  }
 0x189   : > { %4427 = vmatpush3.bf16.msra.mxu1 %v5064_v11  ;;  %4352 = vmatprep.subr.bf16.mxu0 %v5065_v12  ;;  %v664_v32 = vld [vmem:[%s6385_s27 + $0x8] sm:$0xff]  ;;  %v671_v33 = vld [vmem:[%s6385_s27 + $0x40] sm:$0xff]  ;;  %v666_v34 = vld [vmem:[%s6385_s27 + $0x18] sm:$0xff] }
 0x18a   : > { %4428 = vmatprep.subr.bf16.mxu1 %v5066_v13  ;;  %v896_v35 = vpack.c.bf16 %v671_v33, %v664_v32  ;;  %v663_v37 = vld [vmem:[%s6385_s27] sm:$0xff]  ;;  %v670_v38 = vld [vmem:[%s6385_s27 + $0x38] sm:$0xff]  ;;  %v898_v39 = vpack.c.bf16 %v673_v36, %v666_v34  ;;  %v672_v42 = vld [vmem:[%s6385_s27 + $0x48] sm:$0xff] }
 0x18b   : > { %v895_v40 = vpack.c.bf16 %v670_v38, %v663_v37  ;;  %v897_v43 = vpack.c.bf16 %v672_v42, %v665_v41  ;;  %v5086_v45 = vld [vmem:[#allocation5 + $0x100] sm:$0xff]   ;;  %v678_v46 = vld [vmem:[%s6385_s27 + $0x78] sm:$0xff]  ;;  %v687_v49 = vld [vmem:[%s6385_s27 + $0xc0] sm:$0xff] }
 0x18c   : > { %4353 = vmatpush3.bf16.msra.mxu0 %v5067_v14  ;;  %1328 = vmatprep.mubr.bf16.mxu0 %v896_v35  ;;  %v685_v47 = vld [vmem:[%s6385_s27 + $0xb0] sm:$0xff]  ;;  %v680_v48 = vld [vmem:[%s6385_s27 + $0x88] sm:$0xff]  ;;  %v679_v54 = vld [vmem:[%s6385_s27 + $0x80] sm:$0xff] }
 0x18d   : > { %4429 = vmatpush3.bf16.msra.mxu1 %v5068_v15  ;;  %4354 = vmatprep.subr.bf16.mxu0 %v5069_v16  ;;  %v903_v50 = vpack.c.bf16 %v685_v47, %v678_v46  ;;  %v905_v51 = vpack.c.bf16 %v687_v49, %v680_v48  ;;  %v677_v52 = vld [vmem:[%s6385_s27 + $0x70] sm:$0xff]  ;;  %v684_v53 = vld [vmem:[%s6385_s27 + $0xa8] sm:$0xff]  ;;  %v686_v55 = vld [vmem:[%s6385_s27 + $0xb8] sm:$0xff] }
 0x18e   : > { %4430 = vmatprep.subr.bf16.mxu1 %v5070_v17  ;;  %1440 = vmatprep.mubr.bf16.mxu1 %v898_v39  ;;  %v902_v56 = vpack.c.bf16 %v684_v53, %v677_v52  ;;  %v5087_v57 = vld [vmem:[#allocation5 + $0x148] sm:$0xff]   ;;  %v904_v58 = vpack.c.bf16 %v686_v55, %v679_v54  ;;  %v692_v60 = vld [vmem:[%s6385_s27 + $0xe8] sm:$0xff]  ;;  %v699_v61 = vld [vmem:[%s6385_s27 + $0x120] sm:$0xff] }
 0x18f   : > { %v5088_v59 = vld [vmem:[#allocation5 + $0x108] sm:$0xff]   ;;  %v910_v62 = vpack.c.bf16 %v699_v61, %v692_v60  ;;  %v691_v2 = vld [vmem:[%s6385_s27 + $0xe0] sm:$0xff]  ;;  %v700_v7 = vld [vmem:[%s6385_s27 + $0x128] sm:$0xff] }
 0x190   : > { %4355 = vmatpush3.bf16.msra.mxu0 %v5071_v18  ;;  %v694_v63 = vld [vmem:[%s6385_s27 + $0xf8] sm:$0xff]  ;;  %v701_v0 = vld [vmem:[%s6385_s27 + $0x130] sm:$0xff]  ;;  %v708_v10 = vld [vmem:[%s6385_s27 + $0x168] sm:$0xff] }
 0x191   : > { %4431 = vmatpush3.bf16.msra.mxu1 %v5072_v19  ;;  %4356 = vmatprep.subr.bf16.mxu0 %v5073_v20  ;;  %v912_v1 = vpack.c.bf16 %v701_v0, %v694_v63  ;;  %v698_v3 = vld [vmem:[%s6385_s27 + $0x118] sm:$0xff]  ;;  %v693_v4 = vld [vmem:[%s6385_s27 + $0xf0] sm:$0xff]  ;;  %v715_v11 = vld [vmem:[%s6385_s27 + $0x1a0] sm:$0xff] }
 0x192   : > { %4432 = vmatprep.subr.bf16.mxu1 %v5074_v21  ;;  %v5089_v5 = vld [vmem:[#allocation5 + $0x150] sm:$0xff]   ;;  %v713_v9 = vld [vmem:[%s6385_s27 + $0x190] sm:$0xff]  ;;  %v909_v12 = vpack.c.bf16 %v698_v3, %v691_v2  ;;  %v911_v13 = vpack.c.bf16 %v700_v7, %v693_v4  ;;  %v5091_v15 = vld [vmem:[#allocation5 + $0x158] sm:$0xff]   ;;  %v919_v16 = vpack.c.bf16 %v715_v11, %v708_v10 }
 0x193   : > { %v5090_v6 = vld [vmem:[#allocation5 + $0x110] sm:$0xff]   ;;  %v5092_v17 = vld [vmem:[#allocation5 + $0x118] sm:$0xff]   ;;  %v705_v18 = vld [vmem:[%s6385_s27 + $0x150] sm:$0xff] }
 0x194   : > { %4357 = vmatpush3.bf16.msra.mxu0 %v5075_v22  ;;  %v706_v8 = vld [vmem:[%s6385_s27 + $0x158] sm:$0xff]  ;;  %v712_v19 = vld [vmem:[%s6385_s27 + $0x188] sm:$0xff]  ;;  %v707_v20 = vld [vmem:[%s6385_s27 + $0x160] sm:$0xff] }
 0x195   : > { %4433 = vmatpush3.bf16.msra.mxu1 %v5076_v23  ;;  %4358 = vmatprep.subr.bf16.mxu0 %v5077_v24  ;;  %v917_v14 = vpack.c.bf16 %v713_v9, %v706_v8  ;;  %v714_v21 = vld [vmem:[%s6385_s27 + $0x198] sm:$0xff]  ;;  %v720_v22 = vld [vmem:[%s6385_s27 + $0x1c8] sm:$0xff]  ;;  %v727_v23 = vld [vmem:[%s6385_s27 + $0x200] sm:$0xff] }
 0x196   : > { %4434 = vmatprep.subr.bf16.mxu1 %v5078_v25  ;;  %v722_v24 = vld [vmem:[%s6385_s27 + $0x1d8] sm:$0xff]  ;;  %v729_v25 = vld [vmem:[%s6385_s27 + $0x210] sm:$0xff]  ;;  %v719_v32 = vld [vmem:[%s6385_s27 + $0x1c0] sm:$0xff] }
 0x197   : > { %v726_v33 = vld [vmem:[%s6385_s27 + $0x1f8] sm:$0xff]  ;;  %v721_v34 = vld [vmem:[%s6385_s27 + $0x1d0] sm:$0xff]  ;;  %v728_v35 = vld [vmem:[%s6385_s27 + $0x208] sm:$0xff] }
 0x198   : > { %4359 = vmatpush3.bf16.msra.mxu0 %v5079_v26  ;;  %v916_v26 = vpack.c.bf16 %v712_v19, %v705_v18  ;;  %v734_v36 = vld [vmem:[%s6385_s27 + $0x238] sm:$0xff]  ;;  %v741_v38 = vld [vmem:[%s6385_s27 + $0x270] sm:$0xff]  ;;  %v743_v41 = vld [vmem:[%s6385_s27 + $0x280] sm:$0xff]  ;;  %v923_v42 = vpack.c.bf16 %v726_v33, %v719_v32 }
 0x199   : > { %4435 = vmatpush3.bf16.msra.mxu1 %v5080_v27  ;;  %4360 = vmatprep.subr.bf16.mxu0 %v5081_v28  ;;  %v5093_v27 = vld [vmem:[#allocation5 + $0x160] sm:$0xff]   ;;  %v918_v28 = vpack.c.bf16 %v714_v21, %v707_v20  ;;  %v5095_v37 = vld [vmem:[#allocation5 + $0x168] sm:$0xff]   ;;  %v5097_v46 = vld [vmem:[#allocation5 + $0x170] sm:$0xff]  }
 0x19a   : > { %4436 = vmatprep.subr.bf16.mxu1 %v5082_v29  ;;  %v924_v29 = vpack.c.bf16 %v727_v23, %v720_v22  ;;  %v5096_v39 = vld [vmem:[#allocation5 + $0x128] sm:$0xff]   ;;  %v5098_v47 = vld [vmem:[#allocation5 + $0x130] sm:$0xff]   ;;  %v740_v49 = vld [vmem:[%s6385_s27 + $0x268] sm:$0xff] }
 0x19b   : > { %v733_v48 = vld [vmem:[%s6385_s27 + $0x230] sm:$0xff]  ;;  %v748_v52 = vld [vmem:[%s6385_s27 + $0x2a8] sm:$0xff]  ;;  %v755_v53 = vld [vmem:[%s6385_s27 + $0x2e0] sm:$0xff] }
 0x19c   : > { %4361 = vmatpush3.bf16.msra.mxu0 %v5083_v30  ;;  %v5094_v30 = vld [vmem:[#allocation5 + $0x120] sm:$0xff]   ;;  %v5099_v54 = vld [vmem:[#allocation5 + $0x178] sm:$0xff]   ;;  %v750_v55 = vld [vmem:[%s6385_s27 + $0x2b8] sm:$0xff]  ;;  %v938_v60 = vpack.c.bf16 %v755_v53, %v748_v52 }
 0x19d   : > { %4437 = vmatpush3.bf16.msra.mxu1 %v5084_v31  ;;  %4498 = vmatprep.subr.bf16.mxu0 %v5085_v44  ;;  %v926_v31 = vpack.c.bf16 %v729_v25, %v722_v24  ;;  %v747_v63 = vld [vmem:[%s6385_s27 + $0x2a0] sm:$0xff]  ;;  %v754_v0 = vld [vmem:[%s6385_s27 + $0x2d8] sm:$0xff]  ;;  %v756_v2 = vld [vmem:[%s6385_s27 + $0x2e8] sm:$0xff] }
 0x19e   : > { %4865 = vmatprep.subr.bf16.mxu1 %v5085_v44  ;;  %v931_v44 = vpack.c.bf16 %v741_v38, %v734_v36  ;;  %v762_v3 = vld [vmem:[%s6385_s27 + $0x318] sm:$0xff]  ;;  %v769_v4 = vld [vmem:[%s6385_s27 + $0x350] sm:$0xff]  ;;  %v937_v7 = vpack.c.bf16 %v754_v0, %v747_v63  ;;  %v775_v23 = vld [vmem:[%s6385_s27 + $0x380] sm:$0xff] }
 0x19f   : > { %1329 = vmatmul.mubr.bf16.vlgmr.msra.gmra.mrb[0].mxu0 %v895_v40  ;;  %v736_v40 = vld [vmem:[%s6385_s27 + $0x248] sm:$0xff]  ;;  %v945_v9 = vpack.c.bf16 %v769_v4, %v762_v3  ;;  %v761_v11 = vld [vmem:[%s6385_s27 + $0x310] sm:$0xff]  ;;  %v782_v24 = vld [vmem:[%s6385_s27 + $0x3b8] sm:$0xff] }
 0x1a0   : > { %1441 = vmatmul.mubr.bf16.vlgmr.msra.gmra.mrb[0].mxu1 %v897_v43  ;;  %4499 = vmatpush3.bf16.msra.mxu0 %v5086_v45  ;;  %v925_v43 = vpack.c.bf16 %v728_v35, %v721_v34  ;;  %v785_v18 = vld [vmem:[%s6385_s27 + $0x3d0] sm:$0xff]  ;;  %v791_v34 = vld [vmem:[%s6385_s27 + $0x400] sm:$0xff]  ;;  %v668_v35 = vld [vmem:[%s6385_s27 + $0x28] sm:$0xff] }
 0x1a1   : > { %4873 = vmatpush3.bf16.msra.mxu1 %v5086_v45  ;;  %1336 = vmatprep.mubr.bf16.mxu0 %v903_v50  ;;  %v933_v45 = vpack.c.bf16 %v743_v41, %v736_v40  ;;  %v735_v50 = vld [vmem:[%s6385_s27 + $0x240] sm:$0xff]  ;;  %v777_v25 = vld [vmem:[%s6385_s27 + $0x390] sm:$0xff]  ;;  %v960_v40 = vpack.c.bf16 %v791_v34, %v791_v34  ;;  %v702_v3 = vld [vmem:[%s6385_s27 + $0x138] sm:$0xff] }
 0x1a2   : > { %1448 = vmatprep.mubr.bf16.mxu1 %v905_v51  ;;  %4866 = vmatprep.subr.bf16.mxu1 %v5087_v57  ;;  %v742_v51 = vld [vmem:[%s6385_s27 + $0x278] sm:$0xff]  ;;  %v789_v33 = vld [vmem:[%s6385_s27 + $0x3f0] sm:$0xff]  ;;  %v675_v36 = vld [vmem:[%s6385_s27 + $0x60] sm:$0xff] }
 0x1a3   : > { %4500 = vmatprep.subr.bf16.mxu0 %v5087_v57  ;;  %v930_v57 = vpack.c.bf16 %v740_v49, %v733_v48  ;;  %v787_v38 = vld [vmem:[%s6385_s27 + $0x3e0] sm:$0xff]  ;;  %v900_v41 = vpack.c.bf16 %v675_v36, %v668_v35  ;;  %v689_v48 = vld [vmem:[%s6385_s27 + $0xd0] sm:$0xff]  ;;  %v794_v49 = vld [vmem:[%s6385_s27 + $0x418] sm:$0xff] }
 0x1a4   : > { %4501 = vmatpush3.bf16.msra.mxu0 %v5088_v59  ;;  %v963_v53 = vpack.c.bf16 %v794_v49, %v794_v49  ;;  %v683_v4 = vld [vmem:[%s6385_s27 + $0xa0] sm:$0xff] }
 0x1a5   : > { %4874 = vmatpush3.bf16.msra.mxu1 %v5088_v59  ;;  %4502 = vmatprep.subr.bf16.mxu0 %v5089_v5  ;;  %v932_v59 = vpack.c.bf16 %v742_v51, %v735_v50  ;;  %v751_v49 = vld [vmem:[%s6385_s27 + $0x2c0] sm:$0xff] }
 0x1a6   : > { %4867 = vmatprep.subr.bf16.mxu1 %v5089_v5  ;;  %v764_v5 = vld [vmem:[%s6385_s27 + $0x328] sm:$0xff] }
 0x1a7   : > { %1337 = vmatmul.mubr.bf16.gmra.mrb[4].mxu0 %v902_v56  ;;  %v757_v56 = vld [vmem:[%s6385_s27 + $0x2f0] sm:$0xff] }
 0x1a8   : > { %1449 = vmatmul.mubr.bf16.gmra.mrb[4].mxu1 %v904_v58  ;;  %1344 = vmatprep.mubr.bf16.mxu0 %v910_v62  ;;  %v5100_v58 = vld [vmem:[#allocation5 + $0x138] sm:$0xff]   ;;  %v940_v61 = vpack.c.bf16 %v757_v56, %v750_v55  ;;  %v6467_v62 = vld [vmem:[#allocation5 + $0x180] sm:$0xff]  }
 0x1a9   : > { %1456 = vmatprep.mubr.bf16.mxu1 %v912_v1  ;;  %4875 = vmatpush3.bf16.msra.mxu1 %v5090_v6  ;;  %v749_v1 = vld [vmem:[%s6385_s27 + $0x2b0] sm:$0xff]  ;;  %v688_v55 = vld [vmem:[%s6385_s27 + $0xc8] sm:$0xff] }
 0x1aa   : > { %4503 = vmatpush3.bf16.msra.mxu0 %v5090_v6  ;;  %4868 = vmatprep.subr.bf16.mxu1 %v5091_v15  ;;  %v771_v6 = vld [vmem:[%s6385_s27 + $0x360] sm:$0xff]  ;;  %v939_v8 = vpack.c.bf16 %v756_v2, %v749_v1  ;;  %v793_v56 = vld [vmem:[%s6385_s27 + $0x410] sm:$0xff] }
 0x1ab   : > { %4504 = vmatprep.subr.bf16.mxu0 %v5091_v15  ;;  %v947_v10 = vpack.c.bf16 %v771_v6, %v764_v5  ;;  %v776_v15 = vld [vmem:[%s6385_s27 + $0x388] sm:$0xff]  ;;  %v962_v63 = vpack.c.bf16 %v793_v56, %v793_v56  ;;  %v695_v2 = vld [vmem:[%s6385_s27 + $0x100] sm:$0xff]  ;;  %v690_v5 = vld [vmem:[%s6385_s27 + $0xd8] sm:$0xff] }
 0x1ac   : > { %v710_v6 = vld [vmem:[%s6385_s27 + $0x178] sm:$0xff] }
 0x1ad   : > { %4876 = vmatpush3.bf16.msra.mxu1 %v5092_v17 }
 0x1ae   : > { %4505 = vmatpush3.bf16.msra.mxu0 %v5092_v17  ;;  %4869 = vmatprep.subr.bf16.mxu1 %v5093_v27  ;;  %v778_v17 = vld [vmem:[%s6385_s27 + $0x398] sm:$0xff] }
 0x1af   : > { %1345 = vmatmul.mubr.bf16.gmra.mrb[8].mxu0 %v909_v12  ;;  %4506 = vmatprep.subr.bf16.mxu0 %v5093_v27  ;;  %v768_v12 = vld [vmem:[%s6385_s27 + $0x348] sm:$0xff]  ;;  %v954_v22 = vpack.c.bf16 %v785_v18, %v778_v17  ;;  %v790_v27 = vld [vmem:[%s6385_s27 + $0x3f8] sm:$0xff]  ;;  %v731_v18 = vld [vmem:[%s6385_s27 + $0x220] sm:$0xff] }
 0x1b0   : > { %1457 = vmatmul.mubr.bf16.gmra.mrb[8].mxu1 %v911_v13  ;;  %1352 = vmatprep.mubr.bf16.mxu0 %v917_v14  ;;  %v763_v13 = vld [vmem:[%s6385_s27 + $0x320] sm:$0xff]  ;;  %v770_v14 = vld [vmem:[%s6385_s27 + $0x358] sm:$0xff]  ;;  %v944_v19 = vpack.c.bf16 %v768_v12, %v761_v11  ;;  %v724_v17 = vld [vmem:[%s6385_s27 + $0x1e8] sm:$0xff] }
 0x1b1   : > { %1464 = vmatprep.mubr.bf16.mxu1 %v919_v16  ;;  %4877 = vmatpush3.bf16.msra.mxu1 %v5094_v30  ;;  %v783_v16 = vld [vmem:[%s6385_s27 + $0x3c0] sm:$0xff]  ;;  %v946_v20 = vpack.c.bf16 %v770_v14, %v763_v13  ;;  %v709_v13 = vld [vmem:[%s6385_s27 + $0x170] sm:$0xff]  ;;  %v716_v14 = vld [vmem:[%s6385_s27 + $0x1a8] sm:$0xff] }
 0x1b2   : > { %4507 = vmatpush3.bf16.msra.mxu0 %v5094_v30  ;;  %4870 = vmatprep.subr.bf16.mxu1 %v5095_v37  ;;  %v952_v21 = vpack.c.bf16 %v783_v16, %v776_v15  ;;  %v711_v15 = vld [vmem:[%s6385_s27 + $0x180] sm:$0xff]  ;;  %v718_v16 = vld [vmem:[%s6385_s27 + $0x1b8] sm:$0xff] }
 0x1b3   : > { %4508 = vmatprep.subr.bf16.mxu0 %v5095_v37  ;;  %v780_v37 = vld [vmem:[%s6385_s27 + $0x3a8] sm:$0xff] }
 0x1b5   : > { %4878 = vmatpush3.bf16.msra.mxu1 %v5096_v39 }
 0x1b6   : > { %4509 = vmatpush3.bf16.msra.mxu0 %v5096_v39  ;;  %4871 = vmatprep.subr.bf16.mxu1 %v5097_v46  ;;  %v958_v39 = vpack.c.bf16 %v789_v33, %v789_v33 }
 0x1b7   : > { %1353 = vmatmul.mubr.bf16.gmra.mrb[12].mxu0 %v916_v26  ;;  %4510 = vmatprep.subr.bf16.mxu0 %v5097_v46  ;;  %v784_v26 = vld [vmem:[%s6385_s27 + $0x3c8] sm:$0xff]  ;;  %v786_v46 = vld [vmem:[%s6385_s27 + $0x3d8] sm:$0xff] }
 0x1b8   : > { %1465 = vmatmul.mubr.bf16.gmra.mrb[12].mxu1 %v918_v28  ;;  %1360 = vmatprep.mubr.bf16.mxu0 %v924_v29  ;;  %v792_v28 = vld [vmem:[%s6385_s27 + $0x408] sm:$0xff]  ;;  %v951_v29 = vpack.c.bf16 %v782_v24, %v775_v23  ;;  %v953_v30 = vpack.c.bf16 %v784_v26, %v777_v25  ;;  %v928_v23 = vpack.c.bf16 %v731_v18, %v724_v17  ;;  %v723_v25 = vld [vmem:[%s6385_s27 + $0x1e0] sm:$0xff]  ;;  %v730_v26 = vld [vmem:[%s6385_s27 + $0x218] sm:$0xff] }
 0x1b9   : > { %1472 = vmatprep.mubr.bf16.mxu1 %v926_v31  ;;  %4879 = vmatpush3.bf16.msra.mxu1 %v5098_v47  ;;  %v959_v31 = vpack.c.bf16 %v790_v27, %v790_v27  ;;  %v961_v32 = vpack.c.bf16 %v792_v28, %v792_v28  ;;  %v739_v27 = vld [vmem:[%s6385_s27 + $0x260] sm:$0xff]  ;;  %v746_v28 = vld [vmem:[%s6385_s27 + $0x298] sm:$0xff]  ;;  %v927_v33 = vpack.c.bf16 %v730_v26, %v723_v25 }
 0x1ba   : > { %4511 = vmatpush3.bf16.msra.mxu0 %v5098_v47  ;;  %4872 = vmatprep.subr.bf16.mxu1 %v5099_v54  ;;  %v682_v47 = vld [vmem:[%s6385_s27 + $0x98] sm:$0xff]  ;;  %v936_v34 = vpack.c.bf16 %v746_v28, %v739_v27 }
 0x1bb   : > { %4512 = vmatprep.subr.bf16.mxu0 %v5099_v54  ;;  %v907_v52 = vpack.c.bf16 %v689_v48, %v682_v47  ;;  %v681_v54 = vld [vmem:[%s6385_s27 + $0x90] sm:$0xff] }
 0x1bd   : > { %4880 = vmatpush3.bf16.msra.mxu1 %v5100_v58 }
 0x1be   : > { %4513 = vmatpush3.bf16.msra.mxu0 %v5100_v58  ;;  %4671 = vmatprep.subr.bf16.mxu1 %v6467_v62  ;;  %v703_v58 = vld [vmem:[%s6385_s27 + $0x140] sm:$0xff] }
 0x1bf   : > { %1361 = vmatmul.mubr.bf16.gmra.mrb[16].mxu0 %v923_v42  ;;  %v956_v42 = vpack.c.bf16 %v787_v38, %v780_v37  ;;  %v737_v37 = vld [vmem:[%s6385_s27 + $0x250] sm:$0xff]  ;;  %v744_v38 = vld [vmem:[%s6385_s27 + $0x288] sm:$0xff] }
 0x1c0   : > { %1473 = vmatmul.mubr.bf16.gmra.mrb[16].mxu1 %v925_v43  ;;  %1368 = vmatprep.mubr.bf16.mxu0 %v931_v44  ;;  %v667_v43 = vld [vmem:[%s6385_s27 + $0x20] sm:$0xff]  ;;  %v674_v44 = vld [vmem:[%s6385_s27 + $0x58] sm:$0xff] }
 0x1c1   : > { %1480 = vmatprep.mubr.bf16.mxu1 %v933_v45  ;;  %v779_v45 = vld [vmem:[%s6385_s27 + $0x3a0] sm:$0xff]  ;;  %v899_v50 = vpack.c.bf16 %v674_v44, %v667_v43  ;;  %v781_v43 = vld [vmem:[%s6385_s27 + $0x3b0] sm:$0xff]  ;;  %v788_v44 = vld [vmem:[%s6385_s27 + $0x3e8] sm:$0xff] }
 0x1c2   : > { %v955_v51 = vpack.c.bf16 %v786_v46, %v779_v45  ;;  %v934_v45 = vpack.c.bf16 %v744_v38, %v737_v37  ;;  %v957_v48 = vpack.c.bf16 %v788_v44, %v781_v43 }
 0x1c7   : > { %1369 = vmatmul.mubr.bf16.gmra.mrb[20].mxu0 %v930_v57  ;;  %v696_v57 = vld [vmem:[%s6385_s27 + $0x108] sm:$0xff] }
 0x1c8   : > { %1481 = vmatmul.mubr.bf16.gmra.mrb[20].mxu1 %v932_v59  ;;  %1376 = vmatprep.mubr.bf16.mxu0 %v938_v60  ;;  %v669_v59 = vld [vmem:[%s6385_s27 + $0x30] sm:$0xff]  ;;  %v676_v60 = vld [vmem:[%s6385_s27 + $0x68] sm:$0xff]  ;;  %v914_v0 = vpack.c.bf16 %v703_v58, %v696_v57 }
 0x1c9   : > { %1488 = vmatprep.mubr.bf16.mxu1 %v940_v61  ;;  %v906_v61 = vpack.c.bf16 %v688_v55, %v681_v54  ;;  %v901_v1 = vpack.c.bf16 %v676_v60, %v669_v59  ;;  %v765_v57 = vld [vmem:[%s6385_s27 + $0x330] sm:$0xff]  ;;  %v772_v58 = vld [vmem:[%s6385_s27 + $0x368] sm:$0xff]  ;;  %v5102_v60 = vld [vmem:[%s7502_s22] sm:$0xff]  }
 0x1ca   : > { %v948_v59 = vpack.c.bf16 %v772_v58, %v765_v57 }
 0x1cf   : > { %1377 = vmatmul.mubr.bf16.gmra.mrb[24].mxu0 %v937_v7  ;;  %v717_v7 = vld [vmem:[%s6385_s27 + $0x1b0] sm:$0xff] }
 0x1d0   : > { %1489 = vmatmul.mubr.bf16.gmra.mrb[24].mxu1 %v939_v8  ;;  %1384 = vmatprep.mubr.bf16.mxu0 %v945_v9  ;;  %v704_v8 = vld [vmem:[%s6385_s27 + $0x148] sm:$0xff]  ;;  %v913_v9 = vpack.c.bf16 %v702_v3, %v695_v2  ;;  %v921_v11 = vpack.c.bf16 %v717_v7, %v710_v6  ;;  %v6586_v7 = vld [vmem:[#allocation7] ss:$0 sm:$0xff] }
 0x1d1   : > { %1496 = vmatprep.mubr.bf16.mxu1 %v947_v10  ;;  %v908_v10 = vpack.c.bf16 %v690_v5, %v683_v4  ;;  %v5107_v2 = vld [vmem:[%s7502_s22 + $0x28] sm:$0xff]   ;;  %v5108_v3 = vld [vmem:[%s7502_s22 + $0x30] sm:$0xff]   ;;  %v5109_v4 = vld [vmem:[%s7502_s22 + $0x38] sm:$0xff]  }
 0x1d7   : > { %1385 = vmatmul.mubr.bf16.gmra.mrb[28].mxu0 %v944_v19  ;;  %v725_v19 = vld [vmem:[%s6385_s27 + $0x1f0] sm:$0xff] }
 0x1d8   : > { %1497 = vmatmul.mubr.bf16.gmra.mrb[28].mxu1 %v946_v20  ;;  %1392 = vmatprep.mubr.bf16.mxu0 %v952_v21  ;;  %v732_v20 = vld [vmem:[%s6385_s27 + $0x228] sm:$0xff]  ;;  %v920_v21 = vpack.c.bf16 %v716_v14, %v709_v13 }
 0x1d9   : > { %1504 = vmatprep.mubr.bf16.mxu1 %v954_v22  ;;  %v922_v22 = vpack.c.bf16 %v718_v16, %v711_v15  ;;  %v929_v24 = vpack.c.bf16 %v732_v20, %v725_v19 }
 0x1df   : > { %1393 = vmatmul.mubr.bf16.gmra.mrb[32].mxu0 %v951_v29  ;;  %v738_v29 = vld [vmem:[%s6385_s27 + $0x258] sm:$0xff] }
 0x1e0   : > { %1505 = vmatmul.mubr.bf16.gmra.mrb[32].mxu1 %v953_v30  ;;  %1400 = vmatprep.mubr.bf16.mxu0 %v959_v31  ;;  %v745_v30 = vld [vmem:[%s6385_s27 + $0x290] sm:$0xff] }
 0x1e1   : > { %1512 = vmatprep.mubr.bf16.mxu1 %v961_v32  ;;  %v753_v31 = vld [vmem:[%s6385_s27 + $0x2d0] sm:$0xff]  ;;  %v760_v32 = vld [vmem:[%s6385_s27 + $0x308] sm:$0xff]  ;;  %v935_v35 = vpack.c.bf16 %v745_v30, %v738_v29 }
 0x1e2   : > { %v943_v36 = vpack.c.bf16 %v760_v32, %v753_v31 }
 0x1e7   : > { %1401 = vmatmul.mubr.bf16.gmra.mrb[36].mxu0 %v958_v39  ;;  %v767_v39 = vld [vmem:[%s6385_s27 + $0x340] sm:$0xff] }
 0x1e8   : > { %1513 = vmatmul.mubr.bf16.gmra.mrb[36].mxu1 %v960_v40  ;;  %1552 = vmatprep.mubr.bf16.mxu0 %v900_v41  ;;  %v774_v40 = vld [vmem:[%s6385_s27 + $0x378] sm:$0xff]  ;;  %v752_v41 = vld [vmem:[%s6385_s27 + $0x2c8] sm:$0xff] }
 0x1e9   : > { %1616 = vmatprep.mubr.bf16.mxu1 %v956_v42  ;;  %v759_v42 = vld [vmem:[%s6385_s27 + $0x300] sm:$0xff]  ;;  %v950_v46 = vpack.c.bf16 %v774_v40, %v767_v39 }
 0x1ea   : > { %v942_v47 = vpack.c.bf16 %v759_v42, %v752_v41 }
 0x1ef   : > { %1553 = vmatmul.mubr.bf16.vlgmr.msra.gmra.mrb[40].mxu0 %v899_v50  ;;  %v758_v50 = vld [vmem:[%s6385_s27 + $0x2f8] sm:$0xff] }
 0x1f0   : > { %1617 = vmatmul.mubr.bf16.vlgmr.msra.gmra.mrb[40].mxu1 %v955_v51  ;;  %1560 = vmatprep.mubr.bf16.mxu0 %v907_v52  ;;  %v795_v51 = vld [vmem:[%s6385_s27 + $0x420] sm:$0xff]  ;;  %v766_v52 = vld [vmem:[%s6385_s27 + $0x338] sm:$0xff]  ;;  %v941_v54 = vpack.c.bf16 %v758_v50, %v751_v49 }
 0x1f1   : > { %4672 = vmatpush3.bf16.msra.mxu1 %v6467_v62  ;;  %1624 = vmatprep.mubr.bf16.mxu1 %v963_v53  ;;  %v697_v62 = vld [vmem:[%s6385_s27 + $0x110] sm:$0xff]  ;;  %v964_v55 = vpack.c.bf16 %v795_v51, %v795_v51 }
 0x1f2   : > { %v915_v12 = vpack.c.bf16 %v704_v8, %v697_v62  ;;  %v773_v53 = vld [vmem:[%s6385_s27 + $0x370] sm:$0xff]  ;;  %4693 = vmatprep.subr.bf16.mxu1 %v5102_v60  ;;  %s7505_s27 = smul.u32 1064, %s6379_s23 }
 0x1f3   : > { %v949_v56 = vpack.c.bf16 %v773_v53, %v766_v52 }
 0x1f4   : > { %s7096_s30 = scalar_lea.vmem [#allocation22], %s7505_s27  ;;  %s5808_s27 = sshll.u32 %s5913_s24, 4  ;;  %s5809_s27 = int_to_ptr.vmem [resolvable:$false] %s5808_s27 }
 0x1f5   : > { %s3959_s29 = sshll.u32 %s7096_s30, 4  ;;  %s5810_s5 = scalar_lea.vmem %s5809_s27, 34048  ;;  %s7385_s29 = int_to_ptr.vmem [resolvable:$true] %s3959_s29 }
 0x1f6   : > { %s5804_s4 = scalar_lea.vmem %s7385_s29, 17024  ;;  %p5811_p11 = scmp.lt.s32.totalorder %s7385_s29, %s5809_s27 }
 0x1f7   : > { %1561 = vmatmul.mubr.bf16.gmra.mrb[44].mxu0 %v906_v61  ;;  %v5103_v61 = vld [vmem:[%s7502_s22 + $0x8] sm:$0xff]   ;;  %p5805_p2 = scmp.ne.s32.totalorder %s7385_s29, %s5804_s4  ;;  %p5812_p1 = scmp.lt.s32.totalorder %s5810_s5, %s5804_s4 }
 0x1f8   : > { %1625 = vmatmul.mubr.bf16.gmra.mrb[44].mxu1 %v962_v63  ;;  %1568 = vmatprep.mubr.bf16.mxu0 %v914_v0  ;;  %v5104_v63 = vld [vmem:[%s7502_s22 + $0x10] sm:$0xff]   ;;  %v5105_v0 = vld [vmem:[%s7502_s22 + $0x18] sm:$0xff]  }
 0x1f9   : > { %4673 = vmatprep.mubr.msk.bf16.mxu1 %vm1265_vm0, %v901_v1  ;;  %v5106_v1 = vld [vmem:[%s7502_s22 + $0x20] sm:$0xff]   ;;  %p5806_p4 = pnand %p5805_p2, %p7507_p8  ;;  %p5813_p6 = por %p5812_p1, %p5811_p11 }
 0x1fb   : > { %p5807_p10 = pneg %p5806_p4 }
 0x1fd   : > { %p5814_p7 = pnand %p5813_p6, %p5807_p10 }
 0x1ff   : > { %1569 = vmatmul.mubr.bf16.gmra.mrb[48].mxu0 %v913_v9 }
 0x200   : > { %4674 = vmatmul.mubr.msk.bf16.vlgmr.msra.gmra.mrb[48].mxu1 %vm1265_vm0, %v908_v10  ;;  %1576 = vmatprep.mubr.bf16.mxu0 %v921_v11 }
 0x201   : > { %4677 = vmatprep.mubr.msk.bf16.mxu1 %vm1265_vm0, %v915_v12  ;;  %4694 = vmatpush3.bf16.msra.mxu1 %v5102_v60 }
 0x202   : > { %4695 = vmatprep.subr.bf16.mxu1 %v5103_v61 }
 0x205   : > { %4696 = vmatpush3.bf16.msra.mxu1 %v5103_v61 }
 0x206   : > { %4697 = vmatprep.subr.bf16.mxu1 %v5104_v63 }
 0x207   : > { %1577 = vmatmul.mubr.bf16.gmra.mrb[52].mxu0 %v920_v21 }
 0x208   : > { %4678 = vmatmul.mubr.msk.bf16.gmra.mrb[52].mxu1 %vm1265_vm0, %v922_v22  ;;  %1584 = vmatprep.mubr.bf16.mxu0 %v928_v23 }
 0x209   : > { %4681 = vmatprep.mubr.msk.bf16.mxu1 %vm1265_vm0, %v929_v24  ;;  %4698 = vmatpush3.bf16.msra.mxu1 %v5104_v63 }
 0x20a   : > { %4699 = vmatprep.subr.bf16.mxu1 %v5105_v0 }
 0x20d   : > { %4700 = vmatpush3.bf16.msra.mxu1 %v5105_v0 }
 0x20e   : > { %4701 = vmatprep.subr.bf16.mxu1 %v5106_v1 }
 0x20f   : > { %1585 = vmatmul.mubr.bf16.gmra.mrb[56].mxu0 %v927_v33 }
 0x210   : > { %4682 = vmatmul.mubr.msk.bf16.gmra.mrb[56].mxu1 %vm1265_vm0, %v936_v34  ;;  %1592 = vmatprep.mubr.bf16.mxu0 %v935_v35 }
 0x211   : > { %4685 = vmatprep.mubr.msk.bf16.mxu1 %vm1265_vm0, %v943_v36  ;;  %4702 = vmatpush3.bf16.msra.mxu1 %v5106_v1 }
 0x212   : > { %4703 = vmatprep.subr.bf16.mxu1 %v5107_v2 }
 0x215   : > { %4704 = vmatpush3.bf16.msra.mxu1 %v5107_v2 }
 0x216   : > { %4705 = vmatprep.subr.bf16.mxu1 %v5108_v3 }
 0x217   : > { %1593 = vmatmul.mubr.bf16.gmra.mrb[60].mxu0 %v934_v45 }
 0x218   : > { %4686 = vmatmul.mubr.msk.bf16.gmra.mrb[60].mxu1 %vm1265_vm0, %v950_v46  ;;  %1600 = vmatprep.mubr.bf16.mxu0 %v942_v47 }
 0x219   : > { %4689 = vmatprep.mubr.msk.bf16.mxu1 %vm1265_vm0, %v957_v48  ;;  %4706 = vmatpush3.bf16.msra.mxu1 %v5108_v3 }
 0x21a   : > { %4707 = vmatprep.subr.bf16.mxu1 %v5109_v4 }
 0x21d   : > { %4708 = vmatpush3.bf16.msra.mxu1 %v5109_v4 }
 0x21f   : > { %1601 = vmatmul.mubr.bf16.gmra.mrb[64].mxu0 %v941_v54 }
 0x220   : > { %4690 = vmatmul.mubr.msk.bf16.gmra.mrb[64].mxu1 %vm1265_vm0, %v964_v55  ;;  %1608 = vmatprep.mubr.bf16.mxu0 %v949_v56 }
 0x227   : > { %1609 = vmatmul.mubr.bf16.gmra.mrb[68].mxu0 %v948_v59 }
 0x272   : > { %v4362_v5 = vpop.f32.mrb[0].mxu0 }
 0x273   : > { %v4438_v6 = vpop.f32.mrb[0].mxu1  ;;  %v4363_v62 = vpop.f32.mrb[1].mxu0 }
 0x274   : > { %v4364_v8 = vadd.f32 %v4363_v62, %v4362_v5  ;;  %v4439_v9 = vpop.f32.mrb[1].mxu1  ;;  %v4365_v10 = vpop.f32.mrb[2].mxu0  ;;  %v5110_v5 = vld [vmem:[%s7503_s28] sm:$0xff]  }
 0x275   : > { %v4440_v11 = vadd.f32 %v4439_v9, %v4438_v6  ;;  %v4441_v12 = vpop.f32.mrb[2].mxu1  ;;  %v4366_v13 = vpop.f32.mrb[3].mxu0  ;;  %v5111_v6 = vld [vmem:[%s7503_s28 + $0x8] sm:$0xff]   ;;  %4729 = vmatprep.subr.bf16.mxu0 %v5110_v5 }
 0x276   : > { %v1331_v14 = vadd.f32 %v4364_v8, %v6586_v7  ;;  %v4367_v15 = vadd.f32 %v4366_v13, %v4365_v10  ;;  %v4442_v16 = vpop.f32.mrb[3].mxu1  ;;  %4730 = vmatpush3.bf16.msra.mxu0 %v5110_v5 }
 0x277   : > { %v4443_v17 = vadd.f32 %v4442_v16, %v4441_v12  ;;  %4731 = vmatprep.subr.bf16.mxu0 %v5111_v6 }
 0x278   : > { %v6589_v18 = vadd.f32 %v4440_v11, %v1331_v14  ;;  %v1334_v19 = vadd.f32 %v4367_v15, %v6586_v7  ;;  %v5112_v14 = vld [vmem:[%s7503_s28 + $0x10] sm:$0xff]  }
 0x27a   : > { %v6592_v20 = vadd.f32 %v4443_v17, %v1334_v19  ;;  %v4368_v21 = vpop.f32.mrb[4].mxu0  ;;  %4732 = vmatpush3.bf16.msra.mxu0 %v5111_v6 }
 0x27b   : > { %v4444_v22 = vpop.f32.mrb[4].mxu1  ;;  %v4369_v23 = vpop.f32.mrb[5].mxu0  ;;  %4733 = vmatprep.subr.bf16.mxu0 %v5112_v14 }
 0x27c   : > { %v4370_v24 = vadd.f32 %v4369_v23, %v4368_v21  ;;  %v4445_v25 = vpop.f32.mrb[5].mxu1  ;;  %v4371_v26 = vpop.f32.mrb[6].mxu0 }
 0x27d   : > { %v4446_v27 = vadd.f32 %v4445_v25, %v4444_v22  ;;  %v4447_v28 = vpop.f32.mrb[6].mxu1  ;;  %v4372_v29 = vpop.f32.mrb[7].mxu0 }
 0x27e   : > { %v1339_v30 = vadd.f32 %v4370_v24, %v6586_v7  ;;  %v4373_v31 = vadd.f32 %v4372_v29, %v4371_v26  ;;  %v4448_v32 = vpop.f32.mrb[7].mxu1  ;;  %v5113_v26 = vld [vmem:[%s7503_s28 + $0x18] sm:$0xff]   ;;  %4734 = vmatpush3.bf16.msra.mxu0 %v5112_v14 }
 0x27f   : > { %v4449_v33 = vadd.f32 %v4448_v32, %v4447_v28  ;;  %4735 = vmatprep.subr.bf16.mxu0 %v5113_v26 }
 0x280   : > { %v6595_v34 = vadd.f32 %v4446_v27, %v1339_v30  ;;  %v1342_v35 = vadd.f32 %v4373_v31, %v6586_v7 }
 0x282   : > { %v6598_v36 = vadd.f32 %v4449_v33, %v1342_v35  ;;  %v4374_v37 = vpop.f32.mrb[8].mxu0  ;;  %4736 = vmatpush3.bf16.msra.mxu0 %v5113_v26 }
 0x283   : > { %v4450_v38 = vpop.f32.mrb[8].mxu1  ;;  %v4375_v39 = vpop.f32.mrb[9].mxu0 }
 0x284   : > { %v4376_v40 = vadd.f32 %v4375_v39, %v4374_v37  ;;  %v4451_v41 = vpop.f32.mrb[9].mxu1  ;;  %v4377_v42 = vpop.f32.mrb[10].mxu0 }
 0x285   : > { %v4452_v43 = vadd.f32 %v4451_v41, %v4450_v38  ;;  %v4453_v44 = vpop.f32.mrb[10].mxu1  ;;  %v4378_v45 = vpop.f32.mrb[11].mxu0 }
 0x286   : > { %v1347_v46 = vadd.f32 %v4376_v40, %v6586_v7  ;;  %v4379_v47 = vadd.f32 %v4378_v45, %v4377_v42  ;;  %v4454_v48 = vpop.f32.mrb[11].mxu1 }
 0x287   : > { %v4455_v49 = vadd.f32 %v4454_v48, %v4453_v44 }
 0x288   : > { %v6601_v50 = vadd.f32 %v4452_v43, %v1347_v46  ;;  %v1350_v51 = vadd.f32 %v4379_v47, %v6586_v7 }
 0x28a   : > { %v6604_v52 = vadd.f32 %v4455_v49, %v1350_v51  ;;  %v4380_v53 = vpop.f32.mrb[12].mxu0 }
 0x28b   : > { %v4456_v54 = vpop.f32.mrb[12].mxu1  ;;  %v4381_v55 = vpop.f32.mrb[13].mxu0 }
 0x28c   : > { %v4382_v56 = vadd.f32 %v4381_v55, %v4380_v53  ;;  %v4457_v57 = vpop.f32.mrb[13].mxu1  ;;  %v4383_v58 = vpop.f32.mrb[14].mxu0 }
 0x28d   : > { %v4458_v59 = vadd.f32 %v4457_v57, %v4456_v54  ;;  %v4459_v60 = vpop.f32.mrb[14].mxu1  ;;  %v4384_v61 = vpop.f32.mrb[15].mxu0 }
 0x28e   : > { %v1355_v63 = vadd.f32 %v4382_v56, %v6586_v7  ;;  %v4385_v0 = vadd.f32 %v4384_v61, %v4383_v58  ;;  %v4460_v1 = vpop.f32.mrb[15].mxu1 }
 0x28f   : > { %v4461_v2 = vadd.f32 %v4460_v1, %v4459_v60 }
 0x290   : > { %v6607_v3 = vadd.f32 %v4458_v59, %v1355_v63  ;;  %v1358_v4 = vadd.f32 %v4385_v0, %v6586_v7 }
 0x292   : > { %v6616_v62 = vadd.f32 %v4461_v2, %v1358_v4  ;;  %v4386_v8 = vpop.f32.mrb[16].mxu0 }
 0x293   : > { %v4462_v9 = vpop.f32.mrb[16].mxu1  ;;  %v4387_v10 = vpop.f32.mrb[17].mxu0 }
 0x294   : > { %v4388_v11 = vadd.f32 %v4387_v10, %v4386_v8  ;;  %v4463_v12 = vpop.f32.mrb[17].mxu1  ;;  %v4389_v13 = vpop.f32.mrb[18].mxu0 }
 0x295   : > { %v4464_v15 = vadd.f32 %v4463_v12, %v4462_v9  ;;  %v4465_v16 = vpop.f32.mrb[18].mxu1  ;;  %v4390_v17 = vpop.f32.mrb[19].mxu0 }
 0x296   : > { %v1363_v19 = vadd.f32 %v4388_v11, %v6586_v7  ;;  %v4391_v21 = vadd.f32 %v4390_v17, %v4389_v13  ;;  %v4466_v22 = vpop.f32.mrb[19].mxu1 }
 0x297   : > { %v4467_v23 = vadd.f32 %v4466_v22, %v4465_v16 }
 0x298   : > { %v6622_v24 = vadd.f32 %v4464_v15, %v1363_v19  ;;  %v1366_v25 = vadd.f32 %v4391_v21, %v6586_v7 }
 0x29a   : > { %v6628_v27 = vadd.f32 %v4467_v23, %v1366_v25  ;;  %v4392_v28 = vpop.f32.mrb[20].mxu0 }
 0x29b   : > { %v4468_v29 = vpop.f32.mrb[20].mxu1  ;;  %v4393_v30 = vpop.f32.mrb[21].mxu0 }
 0x29c   : > { %v4394_v31 = vadd.f32 %v4393_v30, %v4392_v28  ;;  %v4469_v32 = vpop.f32.mrb[21].mxu1  ;;  %v4395_v33 = vpop.f32.mrb[22].mxu0 }
 0x29d   : > { %v4470_v35 = vadd.f32 %v4469_v32, %v4468_v29  ;;  %v4471_v37 = vpop.f32.mrb[22].mxu1  ;;  %v4396_v38 = vpop.f32.mrb[23].mxu0 }
 0x29e   : > { %v1371_v39 = vadd.f32 %v4394_v31, %v6586_v7  ;;  %v4397_v40 = vadd.f32 %v4396_v38, %v4395_v33  ;;  %v4472_v41 = vpop.f32.mrb[23].mxu1 }
 0x29f   : > { %v4473_v42 = vadd.f32 %v4472_v41, %v4471_v37 }
 0x2a0   : > { %v6631_v43 = vadd.f32 %v4470_v35, %v1371_v39  ;;  %v1374_v44 = vadd.f32 %v4397_v40, %v6586_v7 }
 0x2a2   : > { %v6634_v45 = vadd.f32 %v4473_v42, %v1374_v44  ;;  %v4398_v46 = vpop.f32.mrb[24].mxu0 }
 0x2a3   : > { %v4474_v47 = vpop.f32.mrb[24].mxu1  ;;  %v4399_v48 = vpop.f32.mrb[25].mxu0 }
 0x2a4   : > { %v4400_v49 = vadd.f32 %v4399_v48, %v4398_v46  ;;  %v4475_v51 = vpop.f32.mrb[25].mxu1  ;;  %v4401_v53 = vpop.f32.mrb[26].mxu0 }
 0x2a5   : > { %v4476_v54 = vadd.f32 %v4475_v51, %v4474_v47  ;;  %v4477_v55 = vpop.f32.mrb[26].mxu1  ;;  %v4402_v56 = vpop.f32.mrb[27].mxu0 }
 0x2a6   : > { %v1379_v57 = vadd.f32 %v4400_v49, %v6586_v7  ;;  %v4403_v58 = vadd.f32 %v4402_v56, %v4401_v53  ;;  %v4478_v59 = vpop.f32.mrb[27].mxu1 }
 0x2a7   : > { %v4479_v60 = vadd.f32 %v4478_v59, %v4477_v55 }
 0x2a8   : > { %v6637_v61 = vadd.f32 %v4476_v54, %v1379_v57  ;;  %v1382_v63 = vadd.f32 %v4403_v58, %v6586_v7 }
 0x2aa   : > { %v6640_v0 = vadd.f32 %v4479_v60, %v1382_v63  ;;  %v4404_v1 = vpop.f32.mrb[28].mxu0 }
 0x2ab   : > { %v4480_v2 = vpop.f32.mrb[28].mxu1  ;;  %v4405_v4 = vpop.f32.mrb[29].mxu0 }
 0x2ac   : > { %v4406_v5 = vadd.f32 %v4405_v4, %v4404_v1  ;;  %v4481_v6 = vpop.f32.mrb[29].mxu1  ;;  %v4407_v8 = vpop.f32.mrb[30].mxu0 }
 0x2ad   : > { %v4482_v9 = vadd.f32 %v4481_v6, %v4480_v2  ;;  %v4483_v10 = vpop.f32.mrb[30].mxu1  ;;  %v4408_v11 = vpop.f32.mrb[31].mxu0 }
 0x2ae   : > { %v1387_v12 = vadd.f32 %v4406_v5, %v6586_v7  ;;  %v4409_v13 = vadd.f32 %v4408_v11, %v4407_v8  ;;  %v4484_v14 = vpop.f32.mrb[31].mxu1 }
 0x2af   : > { %v4485_v15 = vadd.f32 %v4484_v14, %v4483_v10 }
 0x2b0   : > { %v6643_v16 = vadd.f32 %v4482_v9, %v1387_v12  ;;  %v1390_v17 = vadd.f32 %v4409_v13, %v6586_v7 }
 0x2b2   : > { %v6646_v19 = vadd.f32 %v4485_v15, %v1390_v17  ;;  %v4410_v21 = vpop.f32.mrb[32].mxu0 }
 0x2b3   : > { %v4486_v22 = vpop.f32.mrb[32].mxu1  ;;  %v4411_v23 = vpop.f32.mrb[33].mxu0 }
 0x2b4   : > { %v4412_v25 = vadd.f32 %v4411_v23, %v4410_v21  ;;  %v4487_v26 = vpop.f32.mrb[33].mxu1  ;;  %v4413_v28 = vpop.f32.mrb[34].mxu0 }
 0x2b5   : > { %v4488_v29 = vadd.f32 %v4487_v26, %v4486_v22  ;;  %v4489_v30 = vpop.f32.mrb[34].mxu1  ;;  %v4414_v31 = vpop.f32.mrb[35].mxu0 }
 0x2b6   : > { %v1395_v32 = vadd.f32 %v4412_v25, %v6586_v7  ;;  %v4415_v33 = vadd.f32 %v4414_v31, %v4413_v28  ;;  %v4490_v35 = vpop.f32.mrb[35].mxu1 }
 0x2b7   : > { %v4491_v37 = vadd.f32 %v4490_v35, %v4489_v30 }
 0x2b8   : > { %v1507_v38 = vadd.f32 %v4488_v29, %v1395_v32  ;;  %v1398_v39 = vadd.f32 %v4415_v33, %v6586_v7 }
 0x2ba   : > { %v1510_v40 = vadd.f32 %v4491_v37, %v1398_v39  ;;  %v4416_v41 = vpop.f32.mrb[36].mxu0 }
 0x2bb   : > { %v4492_v42 = vpop.f32.mrb[36].mxu1  ;;  %v4417_v44 = vpop.f32.mrb[37].mxu0 }
 0x2bc   : > { %v4418_v46 = vadd.f32 %v4417_v44, %v4416_v41  ;;  %v4493_v47 = vpop.f32.mrb[37].mxu1  ;;  %v4419_v48 = vpop.f32.mrb[38].mxu0 }
 0x2bd   : > { %v4494_v49 = vadd.f32 %v4493_v47, %v4492_v42  ;;  %v4495_v51 = vpop.f32.mrb[38].mxu1  ;;  %v4420_v53 = vpop.f32.mrb[39].mxu0 }
 0x2be   : > { %v1403_v54 = vadd.f32 %v4418_v46, %v6586_v7  ;;  %v4496_v55 = vpop.f32.mrb[39].mxu1 }
 0x2c0   : > { %v1515_v56 = vadd.f32 %v4494_v49, %v1403_v54 }
 0x2c2   : > { %v4514_v57 = vpop.f32.mrb[40].mxu0 }
 0x2c3   : > { %v4562_v58 = vpop.f32.mrb[40].mxu1  ;;  %v4515_v59 = vpop.f32.mrb[41].mxu0 }
 0x2c4   : > { %v4516_v60 = vadd.f32 %v4515_v59, %v4514_v57  ;;  %v4563_v63 = vpop.f32.mrb[41].mxu1  ;;  %v4517_v1 = vpop.f32.mrb[42].mxu0 }
 0x2c5   : > { %v4564_v2 = vadd.f32 %v4563_v63, %v4562_v58  ;;  %v4565_v4 = vpop.f32.mrb[42].mxu1  ;;  %v4518_v5 = vpop.f32.mrb[43].mxu0 }
 0x2c6   : > { %v4519_v6 = vadd.f32 %v4518_v5, %v4517_v1  ;;  %v4566_v8 = vpop.f32.mrb[43].mxu1  ;;  %v1555_v9 = vadd.f32 %v4516_v60, %v6589_v18 }
 0x2c7   : > { %v4567_v10 = vadd.f32 %v4566_v8, %v4565_v4  ;;  %v6652_v11 = vadd.f32 %v4564_v2, %v1507_v38 }
 0x2c8   : > { %v1558_v7 = vadd.f32 %v4519_v6, %v6592_v20 }
 0x2c9   : > { %v6655_v12 = vadd.f32 %v4567_v10, %v1510_v40 }
 0x2ca   : > { %v4520_v13 = vpop.f32.mrb[44].mxu0 }
 0x2cb   : > { %v4568_v14 = vpop.f32.mrb[44].mxu1  ;;  %v4521_v15 = vpop.f32.mrb[45].mxu0 }
 0x2cc   : > { %v4522_v17 = vadd.f32 %v4521_v15, %v4520_v13  ;;  %v4569_v21 = vpop.f32.mrb[45].mxu1  ;;  %v4523_v22 = vpop.f32.mrb[46].mxu0 }
 0x2cd   : > { %v4570_v23 = vadd.f32 %v4569_v21, %v4568_v14  ;;  %v4571_v25 = vpop.f32.mrb[46].mxu1  ;;  %v4524_v26 = vpop.f32.mrb[47].mxu0 }
 0x2ce   : > { %v4525_v28 = vadd.f32 %v4524_v26, %v4523_v22  ;;  %v4572_v29 = vpop.f32.mrb[47].mxu1  ;;  %v1563_v18 = vadd.f32 %v4522_v17, %v6595_v34 }
 0x2cf   : > { %v6658_v30 = vadd.f32 %v4570_v23, %v1515_v56 }
 0x2d0   : > { %v1566_v31 = vadd.f32 %v4525_v28, %v6598_v36 }
 0x2d2   : > { %v4526_v20 = vpop.f32.mrb[48].mxu0 }
 0x2d3   : > { %v4675_v32 = vpop.f32.mrb[48].mxu1  ;;  %v4527_v33 = vpop.f32.mrb[49].mxu0 }
 0x2d4   : > { %v1675_v35 = vadd.f32 %v4675_v32, %v1563_v18  ;;  %v4528_v37 = vadd.f32 %v4527_v33, %v4526_v20  ;;  %v1666_v38 = vpop.f32.mrb[49].mxu1  ;;  %v4529_v39 = vpop.f32.mrb[50].mxu0 }
 0x2d5   : > { %v1667_v40 = vadd.f32 %v1666_v38, %v1555_v9  ;;  %v4676_v41 = vpop.f32.mrb[50].mxu1  ;;  %v4530_v42 = vpop.f32.mrb[51].mxu0 }
 0x2d6   : > { %v1678_v44 = vadd.f32 %v4676_v41, %v1566_v31  ;;  %v4531_v46 = vadd.f32 %v4530_v42, %v4529_v39  ;;  %v1669_v47 = vpop.f32.mrb[51].mxu1  ;;  %v1571_v48 = vadd.f32 %v4528_v37, %v6601_v50  ;;  %v1746_v49 = vmax.f32 %v1675_v35, 0.0 }
 0x2d7   : > { %v1670_v34 = vadd.f32 %v1669_v47, %v1558_v7  ;;  %v1744_v53 = vmax.f32 %v1667_v40, 0.0 }
 0x2d8   : > { %v1747_v51 = vmax.f32 %v1678_v44, 0.0  ;;  %v1574_v36 = vadd.f32 %v4531_v46, %v6604_v52 }
 0x2d9   : > { %v1745_v54 = vmax.f32 %v1670_v34, 0.0 }
 0x2da   : > { %v1781_v55 = vpack.c.bf16 %v1747_v51, %v1746_v49  ;;  %v4532_v56 = vpop.f32.mrb[52].mxu0 }
 0x2db   : > { %v1780_v57 = vpack.c.bf16 %v1745_v54, %v1744_v53  ;;  %v4679_v58 = vpop.f32.mrb[52].mxu1  ;;  %v4533_v59 = vpop.f32.mrb[53].mxu0 }
 0x2dc   : > { %v4534_v60 = vadd.f32 %v4533_v59, %v4532_v56  ;;  %v1682_v63 = vpop.f32.mrb[53].mxu1  ;;  %v4535_v1 = vpop.f32.mrb[54].mxu0 }
 0x2dd   : > { %v1683_v2 = vadd.f32 %v1682_v63, %v1571_v48  ;;  %v4680_v4 = vpop.f32.mrb[54].mxu1  ;;  %4709 = vmatprep.mubr.bf16.mxu1 %v1780_v57  ;;  %v4536_v5 = vpop.f32.mrb[55].mxu0 }
 0x2de   : > { %v1579_v50 = vadd.f32 %v4534_v60, %v6607_v3  ;;  %v4537_v6 = vadd.f32 %v4536_v5, %v4535_v1  ;;  %v1685_v8 = vpop.f32.mrb[55].mxu1  ;;  %4710 = vmatmul.mubr.bf16.vlgmr.msra.gmra.mrb[68].mxu1 %v1781_v55 }
 0x2df   : > { %v1686_v52 = vadd.f32 %v1685_v8, %v1574_v36  ;;  %v1748_v7 = vmax.f32 %v1683_v2, 0.0 }
 0x2e0   : > { %v1691_v9 = vadd.f32 %v4679_v58, %v1579_v50  ;;  %v1582_v10 = vadd.f32 %v4537_v6, %v6616_v62 }
 0x2e1   : > { %v1749_v13 = vmax.f32 %v1686_v52, 0.0 }
 0x2e2   : > { %v1694_v14 = vadd.f32 %v4680_v4, %v1582_v10  ;;  %v4538_v15 = vpop.f32.mrb[56].mxu0  ;;  %v1750_v23 = vmax.f32 %v1691_v9, 0.0 }
 0x2e3   : > { %v1782_v17 = vpack.c.bf16 %v1749_v13, %v1748_v7  ;;  %v4539_v21 = vpop.f32.mrb[57].mxu0  ;;  %v4683_v22 = vpop.f32.mrb[56].mxu1 }
 0x2e4   : > { %v1751_v25 = vmax.f32 %v1694_v14, 0.0  ;;  %v4540_v26 = vadd.f32 %v4539_v21, %v4538_v15  ;;  %v4541_v28 = vpop.f32.mrb[58].mxu0  ;;  %v1698_v29 = vpop.f32.mrb[57].mxu1 }
 0x2e5   : > { %4713 = vmatprep.mubr.bf16.mxu1 %v1782_v17  ;;  %v4542_v3 = vpop.f32.mrb[59].mxu0  ;;  %v4684_v18 = vpop.f32.mrb[58].mxu1 }
 0x2e6   : > { %v4543_v31 = vadd.f32 %v4542_v3, %v4541_v28  ;;  %v1587_v20 = vadd.f32 %v4540_v26, %v6622_v24  ;;  %v1783_v32 = vpack.c.bf16 %v1751_v25, %v1750_v23  ;;  %v1701_v62 = vpop.f32.mrb[59].mxu1 }
 0x2e8   : > { %v1699_v33 = vadd.f32 %v1698_v29, %v1587_v20  ;;  %4714 = vmatmul.mubr.bf16.gmra.mrb[72].mxu1 %v1783_v32  ;;  %v1590_v35 = vadd.f32 %v4543_v31, %v6628_v27 }
 0x2ea   : > { %v1702_v37 = vadd.f32 %v1701_v62, %v1590_v35  ;;  %v4544_v38 = vpop.f32.mrb[60].mxu0  ;;  %v1752_v41 = vmax.f32 %v1699_v33, 0.0  ;;  %v5114_v62 = vld [vmem:[#allocation11] sm:$0x3f]   ;;  %v6678_v33 = vld [vmem:[#allocation8] ss:$0 sm:$0xff] }
 0x2eb   : > { %v4545_v39 = vpop.f32.mrb[61].mxu0  ;;  %v4687_v40 = vpop.f32.mrb[60].mxu1  ;;  %4881 = vmatprep.subr.msk.bf16.mxu1 %vm2241_vm1, %v5114_v62 }
 0x2ec   : > { %v1753_v42 = vmax.f32 %v1702_v37, 0.0  ;;  %v4546_v44 = vadd.f32 %v4545_v39, %v4544_v38  ;;  %v4547_v46 = vpop.f32.mrb[62].mxu0  ;;  %v1714_v47 = vpop.f32.mrb[61].mxu1 }
 0x2ed   : > { %v4548_v48 = vpop.f32.mrb[63].mxu0  ;;  %v4688_v34 = vpop.f32.mrb[62].mxu1 }
 0x2ee   : > { %v1784_v49 = vpack.c.bf16 %v1753_v42, %v1752_v41  ;;  %v1595_v24 = vadd.f32 %v4546_v44, %v6631_v43  ;;  %v4549_v51 = vadd.f32 %v4548_v48, %v4547_v46  ;;  %v1717_v36 = vpop.f32.mrb[63].mxu1 }
 0x2f0   : > { %v1707_v53 = vadd.f32 %v4683_v22, %v1595_v24  ;;  %v1598_v54 = vadd.f32 %v4549_v51, %v6634_v45  ;;  %4717 = vmatprep.mubr.bf16.mxu1 %v1784_v49 }
 0x2f2   : > { %v1710_v27 = vadd.f32 %v4684_v18, %v1598_v54  ;;  %v4550_v55 = vpop.f32.mrb[64].mxu0  ;;  %v1754_v58 = vmax.f32 %v1707_v53, 0.0 }
 0x2f3   : > { %v4691_v56 = vpop.f32.mrb[64].mxu1  ;;  %v4551_v57 = vpop.f32.mrb[65].mxu0 }
 0x2f4   : > { %v1755_v59 = vmax.f32 %v1710_v27, 0.0  ;;  %v1739_v60 = vadd.f32 %v4691_v56, %v6658_v30  ;;  %v4552_v63 = vadd.f32 %v4551_v57, %v4550_v55  ;;  %v1730_v1 = vpop.f32.mrb[65].mxu1  ;;  %v4553_v2 = vpop.f32.mrb[66].mxu0 }
 0x2f5   : > { %v1731_v4 = vadd.f32 %v1730_v1, %v6652_v11  ;;  %v4692_v43 = vpop.f32.mrb[66].mxu1  ;;  %v4554_v5 = vpop.f32.mrb[67].mxu0 }
 0x2f6   : > { %v1603_v50 = vadd.f32 %v4552_v63, %v6637_v61  ;;  %v4555_v6 = vadd.f32 %v4554_v5, %v4553_v2  ;;  %v1733_v45 = vpop.f32.mrb[67].mxu1  ;;  %v1785_v8 = vpack.c.bf16 %v1755_v59, %v1754_v58  ;;  %v1762_v20 = vmax.f32 %v1739_v60, 0.0 }
 0x2f7   : > { %v1734_v52 = vadd.f32 %v1733_v45, %v6655_v12  ;;  %v1760_v7 = vmax.f32 %v1731_v4, 0.0 }
 0x2f8   : > { %v1715_v9 = vadd.f32 %v1714_v47, %v1603_v50  ;;  %v1606_v10 = vadd.f32 %v4555_v6, %v6640_v0  ;;  %4718 = vmatmul.mubr.bf16.gmra.mrb[76].mxu1 %v1785_v8  ;;  %v1789_v32 = vpack.c.bf16 %v1762_v20, %v1762_v20 }
 0x2f9   : > { %v1761_v30 = vmax.f32 %v1734_v52, 0.0 }
 0x2fa   : > { %v1718_v13 = vadd.f32 %v1717_v36, %v1606_v10  ;;  %v4556_v14 = vpop.f32.mrb[68].mxu0  ;;  %v1756_v11 = vmax.f32 %v1715_v9, 0.0 }
 0x2fb   : > { %v1788_v15 = vpack.c.bf16 %v1761_v30, %v1760_v7  ;;  %v4557_v17 = vpop.f32.mrb[69].mxu0 }
 0x2fc   : > { %v1757_v21 = vmax.f32 %v1718_v13, 0.0  ;;  %v4558_v22 = vadd.f32 %v4557_v17, %v4556_v14  ;;  %v4559_v23 = vpop.f32.mrb[70].mxu0 }
 0x2fd   : > { %v4560_v61 = vpop.f32.mrb[71].mxu0 }
 0x2fe   : > { %v1611_v25 = vadd.f32 %v4558_v22, %v6643_v16  ;;  %v4561_v26 = vadd.f32 %v4560_v61, %v4559_v23  ;;  %v1786_v28 = vpack.c.bf16 %v1757_v21, %v1756_v11  ;;  %v2243_v16 = vsel %vm2241_vm1, %v5114_v62, 0 }
 0x2ff   : > { %4758 = vmatpush3.bf16.msra.mxu1 %v2243_v16 }
 0x300   : > { %v1723_v12 = vadd.f32 %v4687_v40, %v1611_v25  ;;  %v1614_v29 = vadd.f32 %v4561_v26, %v6646_v19  ;;  %4721 = vmatprep.mubr.bf16.mxu1 %v1786_v28 }
 0x302   : > { %v1726_v0 = vadd.f32 %v4688_v34, %v1614_v29  ;;  %v1758_v3 = vmax.f32 %v1723_v12, 0.0 }
 0x304   : > { %v1759_v18 = vmax.f32 %v1726_v0, 0.0 }
 0x306   : > { %v1787_v31 = vpack.c.bf16 %v1759_v18, %v1758_v3 }
 0x308   : > { %4722 = vmatmul.mubr.bf16.gmra.mrb[80].mxu1 %v1787_v31 }
 0x309   : > { %4725 = vmatprep.mubr.bf16.mxu1 %v1788_v15 }
 0x310   : > { %4726 = vmatmul.mubr.bf16.gmra.mrb[84].mxu1 %v1789_v32 }
 0x3b1   : > { %v4711_v19 = vpop.f32.mrb[68].mxu1 }
 0x3b2   : > { %v1887_v35 = vadd.f32 %v4711_v19, %v6678_v33  ;;  %v1878_v37 = vpop.f32.mrb[69].mxu1 }
 0x3b3   : > { %v1879_v38 = vadd.f32 %v6678_v33, %v1878_v37  ;;  %v4712_v39 = vpop.f32.mrb[70].mxu1 }
 0x3b4   : > { %v1890_v40 = vadd.f32 %v4712_v39, %v6678_v33  ;;  %v1881_v41 = vpop.f32.mrb[71].mxu1  ;;  %v1958_v44 = vmax.f32 %v1887_v35, 0.0 }
 0x3b5   : > { %v1882_v42 = vadd.f32 %v6678_v33, %v1881_v41  ;;  %v1956_v47 = vmax.f32 %v1879_v38, 0.0 }
 0x3b6   : > { %v1959_v46 = vmax.f32 %v1890_v40, 0.0  ;;  %v5115_v40 = vld [vmem:[#allocation14] sm:$0x3f]  }
 0x3b7   : > { %v1957_v48 = vmax.f32 %v1882_v42, 0.0  ;;  %4882 = vmatprep.subr.msk.bf16.mxu0 %vm2241_vm1, %v5115_v40  ;;  %v2431_v41 = vsel %vm2241_vm1, %v5115_v40, 0  ;;  %v6711_v42 = vld [vmem:[#allocation10] ss:$0 sm:$0xff] }
 0x3b8   : > { %v1985_v34 = vpack.c.bf16 %v1959_v46, %v1958_v44 }
 0x3b9   : > { %v1984_v49 = vpack.c.bf16 %v1957_v48, %v1956_v47 }
 0x3bb   : > { %4737 = vmatprep.mubr.msk.bf16.mxu0 %vm2024_vm2, %v1984_v49  ;;  %v4715_v24 = vpop.f32.mrb[72].mxu1 }
 0x3bc   : > { %v1903_v51 = vadd.f32 %v4715_v24, %v6678_v33  ;;  %4738 = vmatmul.mubr.msk.bf16.vlgmr.msra.gmra.mrb[72].mxu0 %vm2024_vm2, %v1985_v34  ;;  %v1894_v36 = vpop.f32.mrb[73].mxu1 }
 0x3bd   : > { %v1895_v53 = vadd.f32 %v6678_v33, %v1894_v36  ;;  %v4716_v54 = vpop.f32.mrb[74].mxu1  ;;  %4780 = vmatpush3.bf16.msra.mxu0 %v2431_v41 }
 0x3be   : > { %v1906_v27 = vadd.f32 %v4716_v54, %v6678_v33  ;;  %v1897_v55 = vpop.f32.mrb[75].mxu1  ;;  %v1962_v57 = vmax.f32 %v1903_v51, 0.0 }
 0x3bf   : > { %v1898_v56 = vadd.f32 %v6678_v33, %v1897_v55  ;;  %v1960_v59 = vmax.f32 %v1895_v53, 0.0 }
 0x3c0   : > { %v1963_v58 = vmax.f32 %v1906_v27, 0.0 }
 0x3c1   : > { %v1961_v60 = vmax.f32 %v1898_v56, 0.0 }
 0x3c2   : > { %v1987_v63 = vpack.c.bf16 %v1963_v58, %v1962_v57 }
 0x3c3   : > { %v1986_v1 = vpack.c.bf16 %v1961_v60, %v1960_v59 }
 0x3c5   : > { %4741 = vmatprep.mubr.msk.bf16.mxu0 %vm2024_vm2, %v1986_v1 }
 0x3c6   : > { %4742 = vmatmul.mubr.msk.bf16.gmra.mrb[76].mxu0 %vm2024_vm2, %v1987_v63 }
 0x3cb   : > { %v4719_v2 = vpop.f32.mrb[76].mxu1 }
 0x3cc   : > { %v1919_v4 = vadd.f32 %v4719_v2, %v6678_v33  ;;  %v1910_v43 = vpop.f32.mrb[77].mxu1 }
 0x3cd   : > { %v1911_v5 = vadd.f32 %v6678_v33, %v1910_v43  ;;  %v4720_v50 = vpop.f32.mrb[78].mxu1 }
 0x3ce   : > { %v1922_v6 = vadd.f32 %v4720_v50, %v6678_v33  ;;  %v1913_v45 = vpop.f32.mrb[79].mxu1  ;;  %v1966_v52 = vmax.f32 %v1919_v4, 0.0 }
 0x3cf   : > { %v1914_v8 = vadd.f32 %v6678_v33, %v1913_v45  ;;  %v1964_v10 = vmax.f32 %v1911_v5, 0.0 }
 0x3d0   : > { %v1967_v9 = vmax.f32 %v1922_v6, 0.0 }
 0x3d1   : > { %v1965_v7 = vmax.f32 %v1914_v8, 0.0 }
 0x3d2   : > { %v1989_v30 = vpack.c.bf16 %v1967_v9, %v1966_v52 }
 0x3d3   : > { %v1988_v13 = vpack.c.bf16 %v1965_v7, %v1964_v10 }
 0x3d5   : > { %4745 = vmatprep.mubr.msk.bf16.mxu0 %vm2024_vm2, %v1988_v13 }
 0x3d6   : > { %4746 = vmatmul.mubr.msk.bf16.gmra.mrb[80].mxu0 %vm2024_vm2, %v1989_v30 }
 0x3db   : > { %v4723_v14 = vpop.f32.mrb[80].mxu1 }
 0x3dc   : > { %v1935_v15 = vadd.f32 %v4723_v14, %v6678_v33  ;;  %v1926_v17 = vpop.f32.mrb[81].mxu1 }
 0x3dd   : > { %v1927_v11 = vadd.f32 %v6678_v33, %v1926_v17  ;;  %v4724_v21 = vpop.f32.mrb[82].mxu1 }
 0x3de   : > { %v1938_v22 = vadd.f32 %v4724_v21, %v6678_v33  ;;  %v1929_v23 = vpop.f32.mrb[83].mxu1  ;;  %v1970_v25 = vmax.f32 %v1935_v15, 0.0 }
 0x3df   : > { %v1930_v61 = vadd.f32 %v6678_v33, %v1929_v23  ;;  %v1968_v28 = vmax.f32 %v1927_v11, 0.0 }
 0x3e0   : > { %v1971_v26 = vmax.f32 %v1938_v22, 0.0 }
 0x3e1   : > { %v1969_v12 = vmax.f32 %v1930_v61, 0.0 }
 0x3e2   : > { %v1991_v29 = vpack.c.bf16 %v1971_v26, %v1970_v25 }
 0x3e3   : > { %v1990_v0 = vpack.c.bf16 %v1969_v12, %v1968_v28  ;;  %v4727_v3 = vpop.f32.mrb[84].mxu1 }
 0x3e4   : > { %v1951_v18 = vadd.f32 %v4727_v3, %v6678_v33  ;;  %v1942_v31 = vpop.f32.mrb[85].mxu1 }
 0x3e5   : > { %v1943_v20 = vadd.f32 %v6678_v33, %v1942_v31  ;;  %v4728_v32 = vpop.f32.mrb[86].mxu1  ;;  %4749 = vmatprep.mubr.msk.bf16.mxu0 %vm2024_vm2, %v1990_v0 }
 0x3e6   : > { %v1945_v62 = vpop.f32.mrb[87].mxu1  ;;  %4750 = vmatmul.mubr.msk.bf16.gmra.mrb[84].mxu0 %vm2024_vm2, %v1991_v29  ;;  %v1974_v19 = vmax.f32 %v1951_v18, 0.0 }
 0x3e7   : > { %v1946_v16 = vadd.f32 %v6678_v33, %v1945_v62  ;;  %v1972_v35 = vmax.f32 %v1943_v20, 0.0 }
 0x3e8   : > { %v1993_v39 = vpack.c.bf16 %v1974_v19, %v1974_v19 }
 0x3e9   : > { %v1973_v37 = vmax.f32 %v1946_v16, 0.0 }
 0x3eb   : > { %v1992_v38 = vpack.c.bf16 %v1973_v37, %v1972_v35 }
 0x3ed   : > { %4753 = vmatprep.mubr.msk.bf16.mxu0 %vm2024_vm2, %v1992_v38 }
 0x3ee   : > { %4754 = vmatmul.mubr.msk.bf16.gmra.mrb[88].mxu0 %vm2024_vm2, %v1993_v39 }
 0x48f   : > { %v4739_v44 = vpop.f32.mrb[72].mxu0 }
 0x490   : > { %v2098_v33 = vadd.f32 %v4739_v44, %v6711_v42  ;;  %v2089_v46 = vpop.f32.mrb[73].mxu0 }
 0x491   : > { %v2090_v47 = vadd.f32 %v6711_v42, %v2089_v46  ;;  %v4740_v48 = vpop.f32.mrb[74].mxu0 }
 0x492   : > { %v2101_v34 = vadd.f32 %v4740_v48, %v6711_v42  ;;  %v2092_v49 = vpop.f32.mrb[75].mxu0  ;;  %v2169_v51 = vmax.f32 %v2098_v33, 0.0 }
 0x493   : > { %v2093_v24 = vadd.f32 %v6711_v42, %v2092_v49  ;;  %v2167_v53 = vmax.f32 %v2090_v47, 0.0  ;;  %v5117_v49 = vld [vmem:[#allocation17 + $0x8] sm:$0xff]  }
 0x494   : > { %v2170_v36 = vmax.f32 %v2101_v34, 0.0  ;;  %v5116_v34 = vld [vmem:[#allocation17] sm:$0xff]  }
 0x495   : > { %v2168_v54 = vmax.f32 %v2093_v24, 0.0  ;;  %4801 = vmatprep.subr.bf16.mxu1 %v5116_v34  ;;  %v5118_v24 = vld [vmem:[#allocation17 + $0x10] sm:$0xff]  }
 0x496   : > { %v2190_v27 = vpack.c.bf16 %v2170_v36, %v2169_v51  ;;  %v6742_v51 = vld [vmem:[#allocation13] ss:$0 sm:$0xff] }
 0x497   : > { %v2189_v55 = vpack.c.bf16 %v2168_v54, %v2167_v53 }
 0x499   : > { %4759 = vmatprep.mubr.msk.bf16.mxu1 %vm2210_vm3, %v2189_v55  ;;  %v4743_v56 = vpop.f32.mrb[76].mxu0 }
 0x49a   : > { %v2114_v57 = vadd.f32 %v4743_v56, %v6711_v42  ;;  %4760 = vmatmul.mubr.msk.bf16.vlgmr.msra.gmra.mrb[88].mxu1 %vm2210_vm3, %v2190_v27  ;;  %v2105_v58 = vpop.f32.mrb[77].mxu0 }
 0x49b   : > { %v2106_v59 = vadd.f32 %v6711_v42, %v2105_v58  ;;  %v4744_v60 = vpop.f32.mrb[78].mxu0  ;;  %4802 = vmatpush3.bf16.msra.mxu1 %v5116_v34 }
 0x49c   : > { %v2117_v63 = vadd.f32 %v4744_v60, %v6711_v42  ;;  %v2108_v1 = vpop.f32.mrb[79].mxu0  ;;  %v2173_v4 = vmax.f32 %v2114_v57, 0.0  ;;  %4803 = vmatprep.subr.bf16.mxu1 %v5117_v49 }
 0x49d   : > { %v2109_v2 = vadd.f32 %v6711_v42, %v2108_v1  ;;  %v2171_v5 = vmax.f32 %v2106_v59, 0.0 }
 0x49e   : > { %v2174_v43 = vmax.f32 %v2117_v63, 0.0 }
 0x49f   : > { %v2172_v50 = vmax.f32 %v2109_v2, 0.0  ;;  %4804 = vmatpush3.bf16.msra.mxu1 %v5117_v49 }
 0x4a0   : > { %v2192_v6 = vpack.c.bf16 %v2174_v43, %v2173_v4  ;;  %4805 = vmatprep.subr.bf16.mxu1 %v5118_v24 }
 0x4a1   : > { %v2191_v45 = vpack.c.bf16 %v2172_v50, %v2171_v5 }
 0x4a3   : > { %4763 = vmatprep.mubr.msk.bf16.mxu1 %vm2210_vm3, %v2191_v45  ;;  %4806 = vmatpush3.bf16.msra.mxu1 %v5118_v24 }
 0x4a4   : > { %4764 = vmatmul.mubr.msk.bf16.gmra.mrb[92].mxu1 %vm2210_vm3, %v2192_v6 }
 0x4a9   : > { %v4747_v8 = vpop.f32.mrb[80].mxu0 }
 0x4aa   : > { %v2130_v52 = vadd.f32 %v4747_v8, %v6711_v42  ;;  %v2121_v9 = vpop.f32.mrb[81].mxu0 }
 0x4ab   : > { %v2122_v10 = vadd.f32 %v6711_v42, %v2121_v9  ;;  %v4748_v7 = vpop.f32.mrb[82].mxu0 }
 0x4ac   : > { %v2133_v30 = vadd.f32 %v4748_v7, %v6711_v42  ;;  %v2124_v13 = vpop.f32.mrb[83].mxu0  ;;  %v2177_v15 = vmax.f32 %v2130_v52, 0.0 }
 0x4ad   : > { %v2125_v14 = vadd.f32 %v6711_v42, %v2124_v13  ;;  %v2175_v11 = vmax.f32 %v2122_v10, 0.0 }
 0x4ae   : > { %v2178_v17 = vmax.f32 %v2133_v30, 0.0 }
 0x4af   : > { %v2176_v21 = vmax.f32 %v2125_v14, 0.0 }
 0x4b0   : > { %v2194_v22 = vpack.c.bf16 %v2178_v17, %v2177_v15 }
 0x4b1   : > { %v2193_v23 = vpack.c.bf16 %v2176_v21, %v2175_v11 }
 0x4b3   : > { %4767 = vmatprep.mubr.msk.bf16.mxu1 %vm2210_vm3, %v2193_v23 }
 0x4b4   : > { %4768 = vmatmul.mubr.msk.bf16.gmra.mrb[96].mxu1 %vm2210_vm3, %v2194_v22 }
 0x4b9   : > { %v4751_v61 = vpop.f32.mrb[84].mxu0 }
 0x4ba   : > { %v2146_v25 = vadd.f32 %v4751_v61, %v6711_v42  ;;  %v2137_v26 = vpop.f32.mrb[85].mxu0 }
 0x4bb   : > { %v2138_v28 = vadd.f32 %v6711_v42, %v2137_v26  ;;  %v4752_v12 = vpop.f32.mrb[86].mxu0 }
 0x4bc   : > { %v2149_v29 = vadd.f32 %v4752_v12, %v6711_v42  ;;  %v2140_v0 = vpop.f32.mrb[87].mxu0  ;;  %v2181_v18 = vmax.f32 %v2146_v25, 0.0 }
 0x4bd   : > { %v2141_v3 = vadd.f32 %v6711_v42, %v2140_v0  ;;  %v2179_v20 = vmax.f32 %v2138_v28, 0.0 }
 0x4be   : > { %v2182_v31 = vmax.f32 %v2149_v29, 0.0 }
 0x4bf   : > { %v2180_v32 = vmax.f32 %v2141_v3, 0.0 }
 0x4c0   : > { %v2196_v62 = vpack.c.bf16 %v2182_v31, %v2181_v18 }
 0x4c1   : > { %v2195_v16 = vpack.c.bf16 %v2180_v32, %v2179_v20  ;;  %v4755_v19 = vpop.f32.mrb[88].mxu0 }
 0x4c2   : > { %v2162_v35 = vadd.f32 %v4755_v19, %v6711_v42  ;;  %v2153_v37 = vpop.f32.mrb[89].mxu0 }
 0x4c3   : > { %v2154_v38 = vadd.f32 %v6711_v42, %v2153_v37  ;;  %v4756_v39 = vpop.f32.mrb[90].mxu0  ;;  %4771 = vmatprep.mubr.msk.bf16.mxu1 %vm2210_vm3, %v2195_v16 }
 0x4c4   : > { %v2156_v40 = vpop.f32.mrb[91].mxu0  ;;  %4772 = vmatmul.mubr.msk.bf16.gmra.mrb[100].mxu1 %vm2210_vm3, %v2196_v62  ;;  %v2185_v44 = vmax.f32 %v2162_v35, 0.0 }
 0x4c5   : > { %v2157_v41 = vadd.f32 %v6711_v42, %v2156_v40  ;;  %v2183_v33 = vmax.f32 %v2154_v38, 0.0 }
 0x4c6   : > { %v2198_v48 = vpack.c.bf16 %v2185_v44, %v2185_v44 }
 0x4c7   : > { %v2184_v46 = vmax.f32 %v2157_v41, 0.0 }
 0x4c9   : > { %v2197_v47 = vpack.c.bf16 %v2184_v46, %v2183_v33 }
 0x4cb   : > { %4775 = vmatprep.mubr.msk.bf16.mxu1 %vm2210_vm3, %v2197_v47 }
 0x4cc   : > { %4776 = vmatmul.mubr.msk.bf16.gmra.mrb[104].mxu1 %vm2210_vm3, %v2198_v48 }
 0x56d   : > { %v4761_v42 = vpop.f32.mrb[88].mxu1 }
 0x56e   : > { %v2288_v36 = vadd.f32 %v4761_v42, %v6742_v51  ;;  %v2279_v53 = vpop.f32.mrb[89].mxu1 }
 0x56f   : > { %v2280_v54 = vadd.f32 %v6742_v51, %v2279_v53  ;;  %v4762_v27 = vpop.f32.mrb[90].mxu1 }
 0x570   : > { %v2291_v55 = vadd.f32 %v4762_v27, %v6742_v51  ;;  %v2282_v56 = vpop.f32.mrb[91].mxu1  ;;  %v2359_v58 = vmax.f32 %v2288_v36, 0.0 }
 0x571   : > { %v2283_v57 = vadd.f32 %v6742_v51, %v2282_v56  ;;  %v2357_v60 = vmax.f32 %v2280_v54, 0.0  ;;  %v5120_v56 = vld [vmem:[%s7504_s17] ss:$28 sps:$4 sm:$0xff]  }
 0x572   : > { %v2360_v59 = vmax.f32 %v2291_v55, 0.0  ;;  %v5119_v55 = vld [vmem:[#allocation17 + $0x18] sm:$0xff]  }
 0x573   : > { %v2358_v63 = vmax.f32 %v2283_v57, 0.0  ;;  %4807 = vmatprep.subr.bf16.mxu1 %v5119_v55  ;;  %v5125_v57 = vld [vmem:[%s7504_s17 + $0x3c] ss:$28 sps:$4 sm:$0xff]  }
 0x574   : > { %v2380_v1 = vpack.c.bf16 %v2360_v59, %v2359_v58  ;;  %4808 = vmatpush3.bf16.msra.mxu1 %v5119_v55  ;;  %v5128_v58 = vld [vmem:[%s7504_s17 + $0xc] ss:$28 sps:$4 sm:$0xff]   ;;  %v5123_v59 = vld [vmem:[%s7504_s17 + $0x38] ss:$28 sps:$4 sm:$0xff]  }
 0x575   : > { %v2379_v2 = vpack.c.bf16 %v2358_v63, %v2357_v60  ;;  %3304 = vmatprep.subr.bf16.mxu1 %v5128_v58  ;;  %v5131_v60 = vld [vmem:[%s7504_s17 + $0x74] ss:$28 sps:$4 sm:$0xff]  }
 0x576   : > { %v5129_v63 = vld [vmem:[%s7504_s17 + $0x70] ss:$28 sps:$4 sm:$0xff]  }
 0x577   : > { %4781 = vmatprep.mubr.msk.bf16.mxu0 %vm2210_vm3, %v2379_v2  ;;  %v4765_v4 = vpop.f32.mrb[92].mxu1  ;;  %v5135_v2 = vld [vmem:[%s7504_s17 + $0xa8] ss:$28 sps:$4 sm:$0xff]  }
 0x578   : > { %v2304_v43 = vadd.f32 %v4765_v4, %v6742_v51  ;;  %4782 = vmatmul.mubr.msk.bf16.vlgmr.msra.gmra.mrb[92].mxu0 %vm2210_vm3, %v2380_v1  ;;  %v2295_v5 = vpop.f32.mrb[93].mxu1  ;;  %v5137_v1 = vld [vmem:[%s7504_s17 + $0xac] ss:$28 sps:$4 sm:$0xff]   ;;  %v5143_v4 = vld [vmem:[%s7504_s17 + $0xe4] ss:$28 sps:$4 sm:$0xff]  }
 0x579   : > { %v2296_v50 = vadd.f32 %v6742_v51, %v2295_v5  ;;  %v4766_v6 = vpop.f32.mrb[94].mxu1  ;;  %v5152_v5 = vld [vmem:[%s7504_s17 + $0x11c] ss:$28 sps:$4 sm:$0xff]  }
 0x57a   : > { %v2307_v45 = vadd.f32 %v4766_v6, %v6742_v51  ;;  %v2298_v8 = vpop.f32.mrb[95].mxu1  ;;  %v2363_v9 = vmax.f32 %v2304_v43, 0.0  ;;  %v5141_v43 = vld [vmem:[%s7504_s17 + $0xe0] ss:$28 sps:$4 sm:$0xff]   ;;  %v6812_v6 = vld [vmem:[#allocation16] ss:$0 sm:$0xff] }
 0x57b   : > { %v2299_v52 = vadd.f32 %v6742_v51, %v2298_v8  ;;  %v2361_v7 = vmax.f32 %v2296_v50, 0.0  ;;  %v5150_v50 = vld [vmem:[%s7504_s17 + $0x118] ss:$28 sps:$4 sm:$0xff]  }
 0x57c   : > { %v2364_v10 = vmax.f32 %v2307_v45, 0.0 }
 0x57d   : > { %v2362_v30 = vmax.f32 %v2299_v52, 0.0 }
 0x57e   : > { %v2382_v13 = vpack.c.bf16 %v2364_v10, %v2363_v9 }
 0x57f   : > { %v2381_v14 = vpack.c.bf16 %v2362_v30, %v2361_v7 }
 0x581   : > { %4785 = vmatprep.mubr.msk.bf16.mxu0 %vm2210_vm3, %v2381_v14 }
 0x582   : > { %4786 = vmatmul.mubr.msk.bf16.gmra.mrb[96].mxu0 %vm2210_vm3, %v2382_v13 }
 0x587   : > { %v4769_v15 = vpop.f32.mrb[96].mxu1 }
 0x588   : > { %v2320_v17 = vadd.f32 %v4769_v15, %v6742_v51  ;;  %v2311_v11 = vpop.f32.mrb[97].mxu1 }
 0x589   : > { %v2312_v21 = vadd.f32 %v6742_v51, %v2311_v11  ;;  %v4770_v22 = vpop.f32.mrb[98].mxu1 }
 0x58a   : > { %v2323_v23 = vadd.f32 %v4770_v22, %v6742_v51  ;;  %v2314_v61 = vpop.f32.mrb[99].mxu1  ;;  %v2367_v26 = vmax.f32 %v2320_v17, 0.0 }
 0x58b   : > { %v2315_v25 = vadd.f32 %v6742_v51, %v2314_v61  ;;  %v2365_v12 = vmax.f32 %v2312_v21, 0.0  ;;  %v5134_v61 = vld [vmem:[%s7504_s17 + $0x44] ss:$28 sps:$4 sm:$0xff]  }
 0x58c   : > { %v2368_v28 = vmax.f32 %v2323_v23, 0.0  ;;  %v5126_v23 = vld [vmem:[%s7504_s17 + $0x8] ss:$28 sps:$4 sm:$0xff]  }
 0x58d   : > { %v2366_v29 = vmax.f32 %v2315_v25, 0.0 }
 0x58e   : > { %v2384_v0 = vpack.c.bf16 %v2368_v28, %v2367_v26 }
 0x58f   : > { %v2383_v3 = vpack.c.bf16 %v2366_v29, %v2365_v12 }
 0x591   : > { %4789 = vmatprep.mubr.msk.bf16.mxu0 %vm2210_vm3, %v2383_v3 }
 0x592   : > { %4790 = vmatmul.mubr.msk.bf16.gmra.mrb[100].mxu0 %vm2210_vm3, %v2384_v0  ;;  %v5132_v0 = vld [vmem:[%s7504_s17 + $0x40] ss:$28 sps:$4 sm:$0xff]  }
 0x597   : > { %v4773_v18 = vpop.f32.mrb[100].mxu1 }
 0x598   : > { %v2336_v31 = vadd.f32 %v4773_v18, %v6742_v51  ;;  %v2327_v20 = vpop.f32.mrb[101].mxu1 }
 0x599   : > { %v2328_v32 = vadd.f32 %v6742_v51, %v2327_v20  ;;  %v4774_v62 = vpop.f32.mrb[102].mxu1 }
 0x59a   : > { %v2339_v16 = vadd.f32 %v4774_v62, %v6742_v51  ;;  %v2330_v19 = vpop.f32.mrb[103].mxu1  ;;  %v2371_v37 = vmax.f32 %v2336_v31, 0.0  ;;  %v5140_v31 = vld [vmem:[%s7504_s17 + $0x7c] ss:$28 sps:$4 sm:$0xff]  }
 0x59b   : > { %v2331_v35 = vadd.f32 %v6742_v51, %v2330_v19  ;;  %v2369_v39 = vmax.f32 %v2328_v32, 0.0 }
 0x59c   : > { %v2372_v38 = vmax.f32 %v2339_v16, 0.0 }
 0x59d   : > { %v2370_v40 = vmax.f32 %v2331_v35, 0.0  ;;  %v5138_v35 = vld [vmem:[%s7504_s17 + $0x78] ss:$28 sps:$4 sm:$0xff]  }
 0x59e   : > { %v2386_v41 = vpack.c.bf16 %v2372_v38, %v2371_v37  ;;  %v5146_v38 = vld [vmem:[%s7504_s17 + $0xb4] ss:$28 sps:$4 sm:$0xff]  }
 0x59f   : > { %v2385_v44 = vpack.c.bf16 %v2370_v40, %v2369_v39  ;;  %v4777_v33 = vpop.f32.mrb[104].mxu1  ;;  %v5144_v40 = vld [vmem:[%s7504_s17 + $0xb0] ss:$28 sps:$4 sm:$0xff]  }
 0x5a0   : > { %v2352_v46 = vadd.f32 %v4777_v33, %v6742_v51  ;;  %v2343_v47 = vpop.f32.mrb[105].mxu1  ;;  %v5155_v33 = vld [vmem:[%s7504_s17 + $0x124] ss:$28 sps:$4 sm:$0xff]  }
 0x5a1   : > { %v2344_v48 = vadd.f32 %v6742_v51, %v2343_v47  ;;  %v4778_v34 = vpop.f32.mrb[106].mxu1  ;;  %4793 = vmatprep.mubr.msk.bf16.mxu0 %vm2210_vm3, %v2385_v44  ;;  %v5147_v44 = vld [vmem:[%s7504_s17 + $0xe8] ss:$28 sps:$4 sm:$0xff]  }
 0x5a2   : > { %v2346_v49 = vpop.f32.mrb[107].mxu1  ;;  %4794 = vmatmul.mubr.msk.bf16.gmra.mrb[104].mxu0 %vm2210_vm3, %v2386_v41  ;;  %v2375_v42 = vmax.f32 %v2352_v46, 0.0  ;;  %v5149_v41 = vld [vmem:[%s7504_s17 + $0xec] ss:$28 sps:$4 sm:$0xff]  }
 0x5a3   : > { %v2347_v24 = vadd.f32 %v6742_v51, %v2346_v49  ;;  %v2373_v36 = vmax.f32 %v2344_v48, 0.0  ;;  %v5122_v51 = vld [vmem:[%s7504_s17 + $0x4] ss:$28 sps:$4 sm:$0xff]  }
 0x5a4   : > { %v2388_v27 = vpack.c.bf16 %v2375_v42, %v2375_v42  ;;  %3173 = vmatprep.subr.bf16.mxu0 %v5122_v51 }
 0x5a5   : > { %v2374_v53 = vmax.f32 %v2347_v24, 0.0  ;;  %3174 = vmatpush1.bf16.msra.mxu0 %v5120_v56  ;;  %v5153_v24 = vld [vmem:[%s7504_s17 + $0x120] ss:$28 sps:$4 sm:$0xff]  }
 0x5a6   : > { %3175 = vmatprep.subr.bf16.mxu0 %v5125_v57 }
 0x5a7   : > { %v2387_v54 = vpack.c.bf16 %v2374_v53, %v2373_v36 }
 0x5a9   : > { %4797 = vmatprep.mubr.msk.bf16.mxu0 %vm2210_vm3, %v2387_v54  ;;  %3176 = vmatpush1.bf16.msra.mxu0 %v5123_v59 }
 0x5aa   : > { %4798 = vmatmul.mubr.msk.bf16.gmra.mrb[108].mxu0 %vm2210_vm3, %v2388_v27  ;;  %3177 = vmatprep.subr.bf16.mxu0 %v5131_v60 }
 0x5ad   : > { %3178 = vmatpush1.bf16.msra.mxu0 %v5129_v63 }
 0x5ae   : > { %3179 = vmatprep.subr.bf16.mxu0 %v5137_v1 }
 0x5b1   : > { %3180 = vmatpush1.bf16.msra.mxu0 %v5135_v2 }
 0x5b2   : > { %3181 = vmatprep.subr.bf16.mxu0 %v5143_v4 }
 0x5b5   : > { %3182 = vmatpush1.bf16.msra.mxu0 %v5141_v43 }
 0x5b6   : > { %3183 = vmatprep.subr.bf16.mxu0 %v5152_v5 }
 0x5b9   : > { %3184 = vmatpush1.bf16.msra.mxu0 %v5150_v50 }
 0x64b   : > { %v4783_v45 = vpop.f32.mrb[92].mxu0 }
 0x64c   : > { %v2476_v8 = vadd.f32 %v4783_v45, %v6812_v6  ;;  %v2467_v52 = vpop.f32.mrb[93].mxu0 }
 0x64d   : > { %v2468_v9 = vadd.f32 %v6812_v6, %v2467_v52  ;;  %v4784_v10 = vpop.f32.mrb[94].mxu0 }
 0x64e   : > { %v2479_v7 = vadd.f32 %v4784_v10, %v6812_v6  ;;  %v2470_v30 = vpop.f32.mrb[95].mxu0  ;;  %v2547_v14 = vmax.f32 %v2476_v8, 0.0 }
 0x64f   : > { %v2471_v13 = vadd.f32 %v6812_v6, %v2470_v30  ;;  %v2545_v17 = vmax.f32 %v2468_v9, 0.0 }
 0x650   : > { %v2548_v15 = vmax.f32 %v2479_v7, 0.0 }
 0x651   : > { %v2546_v11 = vmax.f32 %v2471_v13, 0.0 }
 0x652   : > { %v2574_v21 = vpack.c.bf16 %v2548_v15, %v2547_v14 }
 0x653   : > { %v2573_v22 = vpack.c.bf16 %v2546_v11, %v2545_v17 }
 0x655   : > { %4809 = vmatprep.mubr.msk.bf16.mxu1 %vm2024_vm2, %v2573_v22  ;;  %v4787_v25 = vpop.f32.mrb[96].mxu0 }
 0x656   : > { %v2492_v26 = vadd.f32 %v4787_v25, %v6812_v6  ;;  %4810 = vmatmul.mubr.msk.bf16.vlgmr.msra.gmra.mrb[108].mxu1 %vm2024_vm2, %v2574_v21  ;;  %v2483_v28 = vpop.f32.mrb[97].mxu0  ;;  %v5158_v25 = vld [vmem:[%s7504_s17 + $0x154] ss:$28 sps:$4 sm:$0xff]  }
 0x657   : > { %v2484_v12 = vadd.f32 %v6812_v6, %v2483_v28  ;;  %v4788_v29 = vpop.f32.mrb[98].mxu0  ;;  %3305 = vmatpush1.bf16.msra.mxu1 %v5126_v23  ;;  %v5159_v28 = vld [vmem:[%s7504_s17 + $0x158] ss:$28 sps:$4 sm:$0xff]   ;;  %3185 = vmatprep.subr.bf16.mxu0 %v5158_v25 }
 0x658   : > { %v2495_v3 = vadd.f32 %v4788_v29, %v6812_v6  ;;  %v2486_v18 = vpop.f32.mrb[99].mxu0  ;;  %3306 = vmatprep.subr.bf16.mxu1 %v5134_v61  ;;  %v2551_v32 = vmax.f32 %v2492_v26, 0.0  ;;  %v5161_v26 = vld [vmem:[%s7504_s17 + $0x15c] ss:$28 sps:$4 sm:$0xff]   ;;  %v5167_v29 = vld [vmem:[%s7504_s17 + $0x194] ss:$28 sps:$4 sm:$0xff]  }
 0x659   : > { %v2487_v20 = vadd.f32 %v6812_v6, %v2486_v18  ;;  %v2549_v16 = vmax.f32 %v2484_v12, 0.0  ;;  %v5164_v12 = vld [vmem:[%s7504_s17 + $0x18c] ss:$28 sps:$4 sm:$0xff]   ;;  %v5912_v18 = vmov 0  }
 0x65a   : > { %v2552_v62 = vmax.f32 %v2495_v3, 0.0  ;;  %v5165_v3 = vld [vmem:[%s7504_s17 + $0x190] ss:$28 sps:$4 sm:$0xff]   ;;  %3205 = vmatprep.mubr.bf16.mxu0 %v5912_v18 }
 0x65b   : > { %v2550_v19 = vmax.f32 %v2487_v20, 0.0  ;;  %3307 = vmatpush1.bf16.msra.mxu1 %v5132_v0  ;;  %v5162_v0 = vld [vmem:[%s7504_s17 + $0x188] ss:$28 sps:$4 sm:$0xff]   ;;  %v5180_v20 = vld [vmem:[%s7504_s17 + $0x18] ss:$28 sps:$4 sm:$0xff]  }
 0x65c   : > { %v2576_v37 = vpack.c.bf16 %v2552_v62, %v2551_v32  ;;  %3308 = vmatprep.subr.bf16.mxu1 %v5140_v31  ;;  %v5170_v31 = vld [vmem:[%s7504_s17 + $0x14] ss:$28 sps:$4 sm:$0xff]  }
 0x65d   : > { %v2575_v39 = vpack.c.bf16 %v2550_v19, %v2549_v16  ;;  %v6908_v32 = vld [vmem:[#allocation19] ss:$0 sm:$0xff] }
 0x65f   : > { %4813 = vmatprep.mubr.msk.bf16.mxu1 %vm2024_vm2, %v2575_v39  ;;  %3309 = vmatpush1.bf16.msra.mxu1 %v5138_v35 }
 0x660   : > { %4814 = vmatmul.mubr.msk.bf16.gmra.mrb[112].mxu1 %vm2024_vm2, %v2576_v37  ;;  %3310 = vmatprep.subr.bf16.mxu1 %v5146_v38 }
 0x663   : > { %3311 = vmatpush1.bf16.msra.mxu1 %v5144_v40 }
 0x664   : > { %3312 = vmatprep.subr.bf16.mxu1 %v5149_v41 }
 0x665   : > { %v4791_v46 = vpop.f32.mrb[100].mxu0 }
 0x666   : > { %v2508_v47 = vadd.f32 %v4791_v46, %v6812_v6  ;;  %v2499_v48 = vpop.f32.mrb[101].mxu0 }
 0x667   : > { %v2500_v34 = vadd.f32 %v6812_v6, %v2499_v48  ;;  %v4792_v49 = vpop.f32.mrb[102].mxu0  ;;  %3313 = vmatpush1.bf16.msra.mxu1 %v5147_v44  ;;  %v5168_v48 = vld [vmem:[%s7504_s17 + $0x10] ss:$28 sps:$4 sm:$0xff]  }
 0x668   : > { %v2511_v42 = vadd.f32 %v4792_v49, %v6812_v6  ;;  %v2502_v36 = vpop.f32.mrb[103].mxu0  ;;  %3314 = vmatprep.subr.bf16.mxu1 %v5155_v33  ;;  %v2555_v54 = vmax.f32 %v2508_v47, 0.0  ;;  %v5173_v49 = vld [vmem:[%s7504_s17 + $0x4c] ss:$28 sps:$4 sm:$0xff]  }
 0x669   : > { %v2503_v53 = vadd.f32 %v6812_v6, %v2502_v36  ;;  %v2553_v55 = vmax.f32 %v2500_v34, 0.0 }
 0x66a   : > { %v2556_v27 = vmax.f32 %v2511_v42, 0.0  ;;  %v5184_v42 = vld [vmem:[%s7504_s17 + $0x50] ss:$28 sps:$4 sm:$0xff]  }
 0x66b   : > { %v2554_v56 = vmax.f32 %v2503_v53, 0.0  ;;  %3315 = vmatpush1.bf16.msra.mxu1 %v5153_v24 }
 0x66c   : > { %v2578_v51 = vpack.c.bf16 %v2556_v27, %v2555_v54  ;;  %3316 = vmatprep.subr.bf16.mxu1 %v5161_v26  ;;  %v5171_v54 = vld [vmem:[%s7504_s17 + $0x48] ss:$28 sps:$4 sm:$0xff]  }
 0x66d   : > { %v2577_v57 = vpack.c.bf16 %v2554_v56, %v2553_v55  ;;  %v5176_v56 = vld [vmem:[%s7504_s17 + $0x84] ss:$28 sps:$4 sm:$0xff]  }
 0x66f   : > { %4817 = vmatprep.mubr.msk.bf16.mxu1 %vm2024_vm2, %v2577_v57  ;;  %3317 = vmatpush1.bf16.msra.mxu1 %v5159_v28 }
 0x670   : > { %4818 = vmatmul.mubr.msk.bf16.gmra.mrb[116].mxu1 %vm2024_vm2, %v2578_v51  ;;  %3318 = vmatprep.subr.bf16.mxu1 %v5167_v29  ;;  %v5189_v29 = vld [vmem:[%s7504_s17 + $0x160] ss:$28 sps:$4 sm:$0xff]  }
 0x673   : > { %3319 = vmatpush1.bf16.msra.mxu1 %v5165_v3 }
 0x674   : > { %4829 = vmatprep.subr.bf16.mxu1 %v5180_v20 }
 0x675   : > { %v4795_v58 = vpop.f32.mrb[104].mxu0 }
 0x676   : > { %v2524_v59 = vadd.f32 %v4795_v58, %v6812_v6  ;;  %v2515_v60 = vpop.f32.mrb[105].mxu0 }
 0x677   : > { %v2516_v63 = vadd.f32 %v6812_v6, %v2515_v60  ;;  %v4796_v1 = vpop.f32.mrb[106].mxu0 }
 0x678   : > { %v2527_v2 = vadd.f32 %v4796_v1, %v6812_v6  ;;  %v2518_v4 = vpop.f32.mrb[107].mxu0  ;;  %v2559_v5 = vmax.f32 %v2524_v59, 0.0 }
 0x679   : > { %v2519_v43 = vadd.f32 %v6812_v6, %v2518_v4  ;;  %v2557_v45 = vmax.f32 %v2516_v63, 0.0  ;;  %v5188_v4 = vld [vmem:[%s7504_s17 + $0x88] ss:$28 sps:$4 sm:$0xff]  }
 0x67a   : > { %v2560_v50 = vmax.f32 %v2527_v2, 0.0  ;;  %v5174_v2 = vld [vmem:[%s7504_s17 + $0x80] ss:$28 sps:$4 sm:$0xff]  }
 0x67b   : > { %v2558_v8 = vmax.f32 %v2519_v43, 0.0 }
 0x67c   : > { %v2580_v52 = vpack.c.bf16 %v2560_v50, %v2559_v5  ;;  %v5179_v5 = vld [vmem:[%s7504_s17 + $0xbc] ss:$28 sps:$4 sm:$0xff]  }
 0x67d   : > { %v2579_v9 = vpack.c.bf16 %v2558_v8, %v2557_v45  ;;  %v4799_v10 = vpop.f32.mrb[108].mxu0  ;;  %v5192_v45 = vld [vmem:[%s7504_s17 + $0xc0] ss:$28 sps:$4 sm:$0xff]   ;;  %v5177_v8 = vld [vmem:[%s7504_s17 + $0xb8] ss:$28 sps:$4 sm:$0xff]  }
 0x67e   : > { %v2540_v7 = vadd.f32 %v4799_v10, %v6812_v6  ;;  %v2531_v30 = vpop.f32.mrb[109].mxu0  ;;  %v5193_v10 = vld [vmem:[%s7504_s17 + $0xf8] ss:$28 sps:$4 sm:$0xff]  }
 0x67f   : > { %v2532_v13 = vadd.f32 %v6812_v6, %v2531_v30  ;;  %v4800_v14 = vpop.f32.mrb[110].mxu0  ;;  %4821 = vmatprep.mubr.msk.bf16.mxu1 %vm2024_vm2, %v2579_v9  ;;  %v5181_v9 = vld [vmem:[%s7504_s17 + $0xf0] ss:$28 sps:$4 sm:$0xff]  }
 0x680   : > { %v2534_v15 = vpop.f32.mrb[111].mxu0  ;;  %4822 = vmatmul.mubr.msk.bf16.gmra.mrb[120].mxu1 %vm2024_vm2, %v2580_v52  ;;  %v2563_v11 = vmax.f32 %v2540_v7, 0.0  ;;  %v5183_v52 = vld [vmem:[%s7504_s17 + $0xf4] ss:$28 sps:$4 sm:$0xff]   ;;  %v5187_v7 = vld [vmem:[%s7504_s17 + $0x12c] ss:$28 sps:$4 sm:$0xff]  }
 0x681   : > { %v2535_v17 = vadd.f32 %v6812_v6, %v2534_v15  ;;  %v2561_v21 = vmax.f32 %v2532_v13, 0.0  ;;  %v5156_v6 = vld [vmem:[%s7504_s17 + $0x150] ss:$28 sps:$4 sm:$0xff]  }
 0x682   : > { %v2582_v61 = vpack.c.bf16 %v2563_v11, %v2563_v11  ;;  %3186 = vmatpush1.bf16.msra.mxu0 %v5156_v6  ;;  %v5194_v13 = vld [vmem:[%s7504_s17 + $0x130] ss:$28 sps:$4 sm:$0xff]  }
 0x683   : > { %v2562_v22 = vmax.f32 %v2535_v17, 0.0  ;;  %3187 = vmatprep.subr.bf16.mxu0 %v5164_v12 }
 0x685   : > { %v2581_v23 = vpack.c.bf16 %v2562_v22, %v2561_v21  ;;  %v5185_v21 = vld [vmem:[%s7504_s17 + $0x128] ss:$28 sps:$4 sm:$0xff]  }
 0x686   : > { %3188 = vmatpush1.bf16.msra.mxu0 %v5162_v0  ;;  %v5198_v0 = vld [vmem:[%s7504_s17 + $0x168] ss:$28 sps:$4 sm:$0xff]  }
 0x687   : > { %4825 = vmatprep.mubr.msk.bf16.mxu1 %vm2024_vm2, %v2581_v23  ;;  %3435 = vmatprep.subr.bf16.mxu0 %v5170_v31  ;;  %v5197_v31 = vld [vmem:[%s7504_s17 + $0x19c] ss:$28 sps:$4 sm:$0xff]  }
 0x688   : > { %4826 = vmatmul.mubr.msk.bf16.gmra.mrb[124].mxu1 %vm2024_vm2, %v2582_v61  ;;  %v5191_v61 = vld [vmem:[%s7504_s17 + $0x164] ss:$28 sps:$4 sm:$0xff]  }
 0x689   : > { %3336 = vmatprep.mubr.bf16.mxu1 %v5912_v18 }
 0x729   : > { %v4811_v62 = vpop.f32.mrb[108].mxu1 }
 0x72a   : > { %v2686_v16 = vadd.f32 %v4811_v62, %v6908_v32  ;;  %v2677_v19 = vpop.f32.mrb[109].mxu1  ;;  %v5199_v62 = vld [vmem:[%s7504_s17 + $0x1a0] ss:$28 sps:$4 sm:$0xff]  }
 0x72b   : > { %v2678_v35 = vadd.f32 %v6908_v32, %v2677_v19  ;;  %v4812_v37 = vpop.f32.mrb[110].mxu1 }
 0x72c   : > { %v2689_v38 = vadd.f32 %v4812_v37, %v6908_v32  ;;  %v2680_v39 = vpop.f32.mrb[111].mxu1  ;;  %v2757_v41 = vmax.f32 %v2686_v16, 0.0  ;;  %v5195_v16 = vld [vmem:[%s7504_s17 + $0x198] ss:$28 sps:$4 sm:$0xff]  }
 0x72d   : > { %v2681_v40 = vadd.f32 %v6908_v32, %v2680_v39  ;;  %v2755_v33 = vmax.f32 %v2678_v35, 0.0 }
 0x72e   : > { %v2758_v44 = vmax.f32 %v2689_v38, 0.0 }
 0x72f   : > { %v2756_v46 = vmax.f32 %v2681_v40, 0.0 }
 0x730   : > { %v6914_v47 = vpack.c.bf16 %v2758_v44, %v2757_v41 }
 0x731   : > { %v6919_v34 = vpack.c.bf16 %v2756_v46, %v2755_v33 }
 0x733   : > { %3206 = vmatmul.mubr.bf16.vlgmr.msra.gmra.mrb[112].mxu0 %v6919_v34  ;;  %3337 = vmatmul.mubr.bf16.vlgmr.msra.gmra.mrb[128].mxu1 %v6919_v34  ;;  %v4815_v24 = vpop.f32.mrb[112].mxu1 }
 0x734   : > { %v2702_v36 = vadd.f32 %v4815_v24, %v6908_v32  ;;  %3436 = vmatpush1.bf16.msra.mxu0 %v5168_v48  ;;  %v2693_v53 = vpop.f32.mrb[113].mxu1  ;;  %3215 = vmatprep.mubr.bf16.mxu0 %v5912_v18 }
 0x735   : > { %v2694_v27 = vadd.f32 %v6908_v32, %v2693_v53  ;;  %v4816_v55 = vpop.f32.mrb[114].mxu1  ;;  %3346 = vmatprep.mubr.bf16.mxu1 %v5912_v18  ;;  %3437 = vmatprep.subr.bf16.mxu0 %v5173_v49 }
 0x736   : > { %v2705_v51 = vadd.f32 %v4816_v55, %v6908_v32  ;;  %v2696_v57 = vpop.f32.mrb[115].mxu1  ;;  %4830 = vmatpush3.bf16.msra.mxu1 %v5180_v20  ;;  %v2761_v59 = vmax.f32 %v2702_v36, 0.0 }
 0x737   : > { %v2697_v58 = vadd.f32 %v6908_v32, %v2696_v57  ;;  %4831 = vmatprep.subr.bf16.mxu1 %v5184_v42  ;;  %v2759_v63 = vmax.f32 %v2694_v27, 0.0 }
 0x738   : > { %v2762_v60 = vmax.f32 %v2705_v51, 0.0  ;;  %3438 = vmatpush1.bf16.msra.mxu0 %v5171_v54 }
 0x739   : > { %v2760_v1 = vmax.f32 %v2697_v58, 0.0  ;;  %3439 = vmatprep.subr.bf16.mxu0 %v5176_v56 }
 0x73a   : > { %v6947_v43 = vpack.c.bf16 %v2762_v60, %v2761_v59  ;;  %4832 = vmatpush3.bf16.msra.mxu1 %v5184_v42 }
 0x73b   : > { %v6952_v50 = vpack.c.bf16 %v2760_v1, %v2759_v63  ;;  %3216 = vmatmul.mubr.bf16.gmra.mrb[116].mxu0 %v6914_v47  ;;  %3347 = vmatmul.mubr.bf16.gmra.mrb[132].mxu1 %v6914_v47 }
 0x73c   : > { %3225 = vmatprep.mubr.bf16.mxu0 %v5912_v18  ;;  %3356 = vmatprep.mubr.bf16.mxu1 %v5912_v18 }
 0x73d   : > { %3440 = vmatpush1.bf16.msra.mxu0 %v5174_v2  ;;  %4833 = vmatprep.subr.bf16.mxu1 %v5188_v4  ;;  %v7063_v2 = vld [vmem:[#allocation20] sm:$0x7f] }
 0x73e   : > { %3441 = vmatprep.subr.bf16.mxu0 %v5179_v5  ;;  %4834 = vmatpush3.bf16.msra.mxu1 %v5188_v4 }
 0x73f   : > { %4835 = vmatprep.subr.bf16.mxu1 %v5192_v45 }
 0x741   : > { %3442 = vmatpush1.bf16.msra.mxu0 %v5177_v8 }
 0x742   : > { %3443 = vmatprep.subr.bf16.mxu0 %v5183_v52  ;;  %4836 = vmatpush3.bf16.msra.mxu1 %v5192_v45 }
 0x743   : > { %3226 = vmatmul.mubr.bf16.gmra.mrb[120].mxu0 %v6952_v50  ;;  %3357 = vmatmul.mubr.bf16.gmra.mrb[136].mxu1 %v6952_v50  ;;  %v4819_v30 = vpop.f32.mrb[116].mxu1 }
 0x744   : > { %v2718_v14 = vadd.f32 %v4819_v30, %v6908_v32  ;;  %v2709_v15 = vpop.f32.mrb[117].mxu1  ;;  %3235 = vmatprep.mubr.bf16.mxu0 %v5912_v18  ;;  %3366 = vmatprep.mubr.bf16.mxu1 %v5912_v18 }
 0x745   : > { %v2710_v17 = vadd.f32 %v6908_v32, %v2709_v15  ;;  %v4820_v11 = vpop.f32.mrb[118].mxu1  ;;  %3444 = vmatpush1.bf16.msra.mxu0 %v5181_v9  ;;  %4837 = vmatprep.subr.bf16.mxu1 %v5193_v10 }
 0x746   : > { %v2721_v22 = vadd.f32 %v4820_v11, %v6908_v32  ;;  %v2712_v23 = vpop.f32.mrb[119].mxu1  ;;  %3445 = vmatprep.subr.bf16.mxu0 %v5187_v7  ;;  %4838 = vmatpush3.bf16.msra.mxu1 %v5193_v10  ;;  %v2765_v26 = vmax.f32 %v2718_v14, 0.0 }
 0x747   : > { %v2713_v25 = vadd.f32 %v6908_v32, %v2712_v23  ;;  %4839 = vmatprep.subr.bf16.mxu1 %v5194_v13  ;;  %v2763_v28 = vmax.f32 %v2710_v17, 0.0 }
 0x748   : > { %v2766_v6 = vmax.f32 %v2721_v22, 0.0 }
 0x749   : > { %v2764_v12 = vmax.f32 %v2713_v25, 0.0  ;;  %3446 = vmatpush1.bf16.msra.mxu0 %v5185_v21 }
 0x74a   : > { %v6999_v3 = vpack.c.bf16 %v2766_v6, %v2765_v26  ;;  %3447 = vmatprep.subr.bf16.mxu0 %v5191_v61  ;;  %4840 = vmatpush3.bf16.msra.mxu1 %v5194_v13 }
 0x74b   : > { %v7004_v20 = vpack.c.bf16 %v2764_v12, %v2763_v28  ;;  %3236 = vmatmul.mubr.bf16.gmra.mrb[124].mxu0 %v6947_v43  ;;  %3367 = vmatmul.mubr.bf16.gmra.mrb[140].mxu1 %v6947_v43 }
 0x74c   : > { %3245 = vmatprep.mubr.bf16.mxu0 %v5912_v18  ;;  %3376 = vmatprep.mubr.bf16.mxu1 %v5912_v18 }
 0x74d   : > { %3448 = vmatpush1.bf16.msra.mxu0 %v5189_v29  ;;  %4841 = vmatprep.subr.bf16.mxu1 %v5198_v0 }
 0x74e   : > { %3449 = vmatprep.subr.bf16.mxu0 %v5197_v31  ;;  %4842 = vmatpush3.bf16.msra.mxu1 %v5198_v0 }
 0x74f   : > { %4843 = vmatprep.subr.bf16.mxu1 %v5199_v62 }
 0x751   : > { %3450 = vmatpush1.bf16.msra.mxu0 %v5195_v16 }
 0x752   : > { %4844 = vmatpush3.bf16.msra.mxu1 %v5199_v62 }
 0x753   : > { %3246 = vmatmul.mubr.bf16.gmra.mrb[128].mxu0 %v7004_v20  ;;  %3377 = vmatmul.mubr.bf16.gmra.mrb[144].mxu1 %v7004_v20  ;;  %v4823_v19 = vpop.f32.mrb[120].mxu1 }
 0x754   : > { %v2734_v35 = vadd.f32 %v4823_v19, %v6908_v32  ;;  %v2725_v37 = vpop.f32.mrb[121].mxu1  ;;  %3255 = vmatprep.mubr.bf16.mxu0 %v5912_v18  ;;  %3386 = vmatprep.mubr.bf16.mxu1 %v5912_v18 }
 0x755   : > { %v2726_v38 = vadd.f32 %v6908_v32, %v2725_v37  ;;  %v4824_v39 = vpop.f32.mrb[122].mxu1 }
 0x756   : > { %v2737_v40 = vadd.f32 %v4824_v39, %v6908_v32  ;;  %v2728_v41 = vpop.f32.mrb[123].mxu1  ;;  %v2769_v33 = vmax.f32 %v2734_v35, 0.0 }
 0x757   : > { %v2729_v44 = vadd.f32 %v6908_v32, %v2728_v41  ;;  %v2767_v48 = vmax.f32 %v2726_v38, 0.0 }
 0x758   : > { %v2770_v46 = vmax.f32 %v2737_v40, 0.0 }
 0x759   : > { %v2768_v49 = vmax.f32 %v2729_v44, 0.0 }
 0x75a   : > { %v2846_v24 = vpack.c.bf16 %v2770_v46, %v2769_v33 }
 0x75b   : > { %v2845_v42 = vpack.c.bf16 %v2768_v49, %v2767_v48  ;;  %3256 = vmatmul.mubr.bf16.gmra.mrb[132].mxu0 %v6999_v3  ;;  %3387 = vmatmul.mubr.bf16.gmra.mrb[148].mxu1 %v6999_v3  ;;  %v4827_v36 = vpop.f32.mrb[124].mxu1 }
 0x75c   : > { %v2750_v53 = vadd.f32 %v4827_v36, %v6908_v32  ;;  %v2741_v54 = vpop.f32.mrb[125].mxu1  ;;  %3265 = vmatprep.mubr.bf16.mxu0 %v5912_v18  ;;  %3396 = vmatprep.mubr.bf16.mxu1 %v5912_v18 }
 0x75d   : > { %v2742_v27 = vadd.f32 %v6908_v32, %v2741_v54  ;;  %v4828_v55 = vpop.f32.mrb[126].mxu1 }
 0x75e   : > { %v2744_v56 = vpop.f32.mrb[127].mxu1 }
 0x75f   : > { %v2745_v51 = vadd.f32 %v6908_v32, %v2744_v56  ;;  %v2771_v57 = vmax.f32 %v2742_v27, 0.0  ;;  %v2773_v32 = vmax.f32 %v2750_v53, 0.0 }
 0x761   : > { %v2772_v58 = vmax.f32 %v2745_v51, 0.0  ;;  %v2848_v60 = vpack.c.bf16 %v2773_v32, %v2773_v32 }
 0x763   : > { %v2847_v59 = vpack.c.bf16 %v2772_v58, %v2771_v57  ;;  %3266 = vmatmul.mubr.bf16.gmra.mrb[136].mxu0 %v2845_v42  ;;  %3397 = vmatmul.mubr.bf16.gmra.mrb[152].mxu1 %v2845_v42 }
 0x764   : > { %3275 = vmatprep.mubr.bf16.mxu0 %v5912_v18  ;;  %3406 = vmatprep.mubr.bf16.mxu1 %v5912_v18 }
 0x76b   : > { %3276 = vmatmul.mubr.bf16.gmra.mrb[140].mxu0 %v2846_v24  ;;  %3407 = vmatmul.mubr.bf16.gmra.mrb[156].mxu1 %v2846_v24 }
 0x76c   : > { %3285 = vmatprep.mubr.bf16.mxu0 %v5912_v18  ;;  %3416 = vmatprep.mubr.bf16.mxu1 %v5912_v18 }
 0x773   : > { %3286 = vmatmul.mubr.bf16.gmra.mrb[144].mxu0 %v2847_v59  ;;  %3417 = vmatmul.mubr.bf16.gmra.mrb[160].mxu1 %v2847_v59 }
 0x774   : > { %3295 = vmatprep.mubr.bf16.mxu0 %v5912_v18  ;;  %3426 = vmatprep.mubr.bf16.mxu1 %v5912_v18 }
 0x77b   : > { %3296 = vmatmul.mubr.bf16.gmra.mrb[148].mxu0 %v2848_v60  ;;  %3427 = vmatmul.mubr.bf16.gmra.mrb[164].mxu1 %v2848_v60 }
 0x77c   : > { %4845 = vmatprep.mubr.bf16.mxu1 %v6919_v34  ;;  %3467 = vmatprep.mubr.bf16.mxu0 %v5912_v18 }
 0x783   : > { %3468 = vmatmul.mubr.bf16.vlgmr.msra.gmra.mrb[152].mxu0 %v6919_v34  ;;  %4846 = vmatmul.mubr.bf16.vlgmr.msra.gmra.mrb[168].mxu1 %v6914_v47 }
 0x784   : > { %4849 = vmatprep.mubr.bf16.mxu1 %v6952_v50  ;;  %3477 = vmatprep.mubr.bf16.mxu0 %v5912_v18 }
 0x78b   : > { %3478 = vmatmul.mubr.bf16.gmra.mrb[156].mxu0 %v6914_v47  ;;  %4850 = vmatmul.mubr.bf16.gmra.mrb[172].mxu1 %v6947_v43  ;;  %v2850_v47 = vlaneseq }
 0x78c   : > { %4853 = vmatprep.mubr.bf16.mxu1 %v7004_v20  ;;  %3487 = vmatprep.mubr.bf16.mxu0 %v5912_v18 }
 0x78d   : > { %v7059_v34 = vshrl.u32 %v2850_v47, 7 }
 0x78f   : > { %v2852_v63 = vsub.s32 0, %v7059_v34  ;;  %v2860_v1 = vsub.s32 2, %v7059_v34  ;;  %v2856_v4 = vsub.s32 1, %v7059_v34 }
 0x791   : > { %v7068_v5 = vrot.slane %v7063_v2, %v2852_v63 }
 0x793   : > { %3488 = vmatmul.mubr.bf16.gmra.mrb[160].mxu0 %v6952_v50  ;;  %4854 = vmatmul.mubr.bf16.gmra.mrb[176].mxu1 %v6999_v3  ;;  %v7071_v50 = vrot.slane %v7063_v2, %v2860_v1 }
 0x794   : > { %4857 = vmatprep.mubr.bf16.mxu1 %v2845_v42  ;;  %3497 = vmatprep.mubr.bf16.mxu0 %v5912_v18 }
 0x79b   : > { %3498 = vmatmul.mubr.bf16.gmra.mrb[164].mxu0 %v6947_v43  ;;  %4858 = vmatmul.mubr.bf16.gmra.mrb[180].mxu1 %v2846_v24  ;;  %v2864_v43 = vsub.s32 3, %v7059_v34 }
 0x79c   : > { %4861 = vmatprep.mubr.bf16.mxu1 %v2847_v59  ;;  %3507 = vmatprep.mubr.bf16.mxu0 %v5912_v18 }
 0x79d   : > { %v7077_v45 = vrot.slane %v7063_v2, %v2864_v43 }
 0x7a3   : > { %3508 = vmatmul.mubr.bf16.gmra.mrb[168].mxu0 %v7004_v20  ;;  %4862 = vmatmul.mubr.bf16.gmra.mrb[184].mxu1 %v2848_v60 }
 0x7a4   : > { %3517 = vmatprep.mubr.bf16.mxu0 %v5912_v18 }
 0x7ab   : > { %3518 = vmatmul.mubr.bf16.gmra.mrb[172].mxu0 %v6999_v3 }
 0x7ac   : > { %3527 = vmatprep.mubr.bf16.mxu0 %v5912_v18 }
 0x7b3   : > { %3528 = vmatmul.mubr.bf16.gmra.mrb[176].mxu0 %v2845_v42 }
 0x7b4   : > { %3537 = vmatprep.mubr.bf16.mxu0 %v5912_v18 }
 0x7bb   : > { %3538 = vmatmul.mubr.bf16.gmra.mrb[180].mxu0 %v2846_v24 }
 0x7bc   : > { %3547 = vmatprep.mubr.bf16.mxu0 %v5912_v18 }
 0x7c3   : > { %3548 = vmatmul.mubr.bf16.gmra.mrb[184].mxu0 %v2847_v59 }
 0x7c4   : > { %3557 = vmatprep.mubr.bf16.mxu0 %v5912_v18  ;;  %v7074_v18 = vrot.slane %v7063_v2, %v2856_v4 }
 0x7cb   : > { %3558 = vmatmul.mubr.bf16.gmra.mrb[188].mxu0 %v2848_v60 }
 0x806   : > { %v3207_v8 = vpop.f32.mrb[112].mxu0  ;;  %v3338_v52 = vpop.f32.mrb[128].mxu1 }
 0x807   : > { %v3208_v9 = vadd.f32 %v3207_v8, %v7068_v5  ;;  %v3339_v10 = vadd.f32 %v3338_v52, %v7071_v50  ;;  %v3209_v7 = vpop.f32.mrb[113].mxu0  ;;  %v3340_v30 = vpop.f32.mrb[129].mxu1 }
 0x808   : > { %v3210_v13 = vadd.f32 %v3209_v7, %v7074_v18  ;;  %v3341_v14 = vadd.f32 %v3340_v30, %v7077_v45  ;;  %v3211_v15 = vpop.f32.mrb[114].mxu0  ;;  %v3342_v17 = vpop.f32.mrb[130].mxu1 }
 0x809   : > { %5200 = vtanh.f32 %v3208_v9  ;;  %v3212_v11 = vadd.f32 %v3211_v15, %v7068_v5  ;;  %v3213_v21 = vpop.f32.mrb[115].mxu0  ;;  %v3344_v22 = vpop.f32.mrb[131].mxu1  ;;  %v3343_v23 = vadd.f32 %v3342_v17, %v7071_v50 }
 0x80a   : > { %5202 = vtanh.f32 %v3339_v10  ;;  %v3214_v61 = vadd.f32 %v3213_v21, %v7074_v18  ;;  %v3345_v25 = vadd.f32 %v3344_v22, %v7077_v45 }
 0x80b   : > { %5204 = vtanh.f32 %v3210_v13 }
 0x80c   : > { %5206 = vtanh.f32 %v3341_v14 }
 0x80d   : > { %5208 = vtanh.f32 %v3212_v11 }
 0x80e   : > { %5210 = vtanh.f32 %v3343_v23  ;;  %v3217_v26 = vpop.f32.mrb[116].mxu0  ;;  %v3348_v6 = vpop.f32.mrb[132].mxu1 }
 0x80f   : > { %5212 = vtanh.f32 %v3214_v61  ;;  %v3218_v28 = vadd.f32 %v3217_v26, %v7068_v5  ;;  %v3349_v12 = vadd.f32 %v3348_v6, %v7071_v50  ;;  %v3219_v29 = vpop.f32.mrb[117].mxu0  ;;  %v3350_v0 = vpop.f32.mrb[133].mxu1 }
 0x810   : > { %5214 = vtanh.f32 %v3345_v25  ;;  %v3220_v3 = vadd.f32 %v3219_v29, %v7074_v18  ;;  %v3351_v31 = vadd.f32 %v3350_v0, %v7077_v45  ;;  %v3221_v20 = vpop.f32.mrb[118].mxu0  ;;  %v3352_v62 = vpop.f32.mrb[134].mxu1 }
 0x811   : > { %5216 = vtanh.f32 %v3218_v28  ;;  %v3222_v16 = vadd.f32 %v3221_v20, %v7068_v5  ;;  %v3223_v19 = vpop.f32.mrb[119].mxu0  ;;  %v3354_v35 = vpop.f32.mrb[135].mxu1  ;;  %v3353_v37 = vadd.f32 %v3352_v62, %v7071_v50 }
 0x812   : > { %5218 = vtanh.f32 %v3349_v12  ;;  %v3224_v39 = vadd.f32 %v3223_v19, %v7074_v18  ;;  %v3355_v41 = vadd.f32 %v3354_v35, %v7077_v45 }
 0x813   : > { %v5201_v38 = vpop.eup %5200  ;;  %5220 = vtanh.f32 %v3220_v3 }
 0x814   : > { %v5203_v40 = vpop.eup %5202  ;;  %3811 = vst [vmem:[%s7096_s30] sm:$0xff] %v5201_v38  ;;  %5222 = vtanh.f32 %v3351_v31 }
 0x815   : > { %v5205_v44 = vpop.eup %5204  ;;  %3813 = vst [vmem:[%s7096_s30 + $0x10] sm:$0xff] %v5203_v40  ;;  %5224 = vtanh.f32 %v3222_v16 }
 0x816   : > { %v5207_v33 = vpop.eup %5206  ;;  %3812 = vst [vmem:[%s7096_s30 + $0x8] sm:$0xff] %v5205_v44  ;;  %5226 = vtanh.f32 %v3353_v37  ;;  %v3227_v46 = vpop.f32.mrb[120].mxu0 }
 0x817   : > { %v3358_v48 = vpop.f32.mrb[136].mxu1  ;;  %v5209_v49 = vpop.eup %5208  ;;  %3814 = vst [vmem:[%s7096_s30 + $0x18] sm:$0xff] %v5207_v33  ;;  %5228 = vtanh.f32 %v3224_v39  ;;  %v3228_v24 = vadd.f32 %v3227_v46, %v7068_v5 }
 0x818   : > { %v3359_v42 = vadd.f32 %v3358_v48, %v7071_v50  ;;  %v3229_v36 = vpop.f32.mrb[121].mxu0  ;;  %v3360_v53 = vpop.f32.mrb[137].mxu1  ;;  %3818 = vst [vmem:[%s7096_s30 + $0x38] sm:$0xff] %v5209_v49  ;;  %5230 = vtanh.f32 %v3355_v41 }
 0x819   : > { %v5211_v54 = vpop.eup %5210  ;;  %v3230_v27 = vadd.f32 %v3229_v36, %v7074_v18  ;;  %v3361_v55 = vadd.f32 %v3360_v53, %v7077_v45  ;;  %v3231_v56 = vpop.f32.mrb[122].mxu0  ;;  %5232 = vtanh.f32 %v3228_v24 }
 0x81a   : > { %v3362_v51 = vpop.f32.mrb[138].mxu1  ;;  %v5213_v57 = vpop.eup %5212  ;;  %3820 = vst [vmem:[%s7096_s30 + $0x48] sm:$0xff] %v5211_v54  ;;  %v3232_v58 = vadd.f32 %v3231_v56, %v7068_v5  ;;  %5234 = vtanh.f32 %v3359_v42 }
 0x81b   : > { %v3233_v59 = vpop.f32.mrb[123].mxu0  ;;  %v3364_v32 = vpop.f32.mrb[139].mxu1  ;;  %3819 = vst [vmem:[%s7096_s30 + $0x40] sm:$0xff] %v5213_v57  ;;  %v3363_v47 = vadd.f32 %v3362_v51, %v7071_v50  ;;  %5236 = vtanh.f32 %v3230_v27 }
 0x81c   : > { %v5215_v60 = vpop.eup %5214  ;;  %v3234_v1 = vadd.f32 %v3233_v59, %v7074_v18  ;;  %5238 = vtanh.f32 %v3361_v55  ;;  %v3365_v43 = vadd.f32 %v3364_v32, %v7077_v45 }
 0x81d   : > { %v5217_v63 = vpop.eup %5216  ;;  %3821 = vst [vmem:[%s7096_s30 + $0x50] sm:$0xff] %v5215_v60  ;;  %5240 = vtanh.f32 %v3232_v58 }
 0x81e   : > { %v5219_v4 = vpop.eup %5218  ;;  %3825 = vst [vmem:[%s7096_s30 + $0x70] sm:$0xff] %v5217_v63  ;;  %5242 = vtanh.f32 %v3363_v47  ;;  %v3237_v9 = vpop.f32.mrb[124].mxu0 }
 0x81f   : > { %v5221_v8 = vpop.eup %5220  ;;  %3827 = vst [vmem:[%s7096_s30 + $0x80] sm:$0xff] %v5219_v4  ;;  %v3368_v10 = vpop.f32.mrb[140].mxu1  ;;  %5244 = vtanh.f32 %v3234_v1  ;;  %v3238_v30 = vadd.f32 %v3237_v9, %v7068_v5 }
 0x820   : > { %v5223_v52 = vpop.eup %5222  ;;  %3826 = vst [vmem:[%s7096_s30 + $0x78] sm:$0xff] %v5221_v8  ;;  %v3369_v13 = vadd.f32 %v3368_v10, %v7071_v50  ;;  %v3239_v14 = vpop.f32.mrb[125].mxu0  ;;  %5246 = vtanh.f32 %v3365_v43 }
 0x821   : > { %v5225_v7 = vpop.eup %5224  ;;  %3828 = vst [vmem:[%s7096_s30 + $0x88] sm:$0xff] %v5223_v52  ;;  %v3370_v15 = vpop.f32.mrb[141].mxu1  ;;  %v3240_v11 = vadd.f32 %v3239_v14, %v7074_v18  ;;  %5248 = vtanh.f32 %v3238_v30 }
 0x822   : > { %v5227_v17 = vpop.eup %5226  ;;  %3832 = vst [vmem:[%s7096_s30 + $0xa8] sm:$0xff] %v5225_v7  ;;  %v3371_v21 = vadd.f32 %v3370_v15, %v7077_v45  ;;  %v3241_v22 = vpop.f32.mrb[126].mxu0  ;;  %5250 = vtanh.f32 %v3369_v13 }
 0x823   : > { %v3372_v23 = vpop.f32.mrb[142].mxu1  ;;  %v5229_v61 = vpop.eup %5228  ;;  %3834 = vst [vmem:[%s7096_s30 + $0xb8] sm:$0xff] %v5227_v17  ;;  %v3242_v25 = vadd.f32 %v3241_v22, %v7068_v5  ;;  %5252 = vtanh.f32 %v3240_v11 }
 0x824   : > { %v3243_v26 = vpop.f32.mrb[127].mxu0  ;;  %v3374_v6 = vpop.f32.mrb[143].mxu1  ;;  %3833 = vst [vmem:[%s7096_s30 + $0xb0] sm:$0xff] %v5229_v61  ;;  %v3373_v12 = vadd.f32 %v3372_v23, %v7071_v50  ;;  %5254 = vtanh.f32 %v3371_v21 }
 0x825   : > { %v5231_v28 = vpop.eup %5230  ;;  %v3244_v0 = vadd.f32 %v3243_v26, %v7074_v18  ;;  %v3375_v31 = vadd.f32 %v3374_v6, %v7077_v45  ;;  %5256 = vtanh.f32 %v3242_v25 }
 0x826   : > { %v5233_v29 = vpop.eup %5232  ;;  %3835 = vst [vmem:[%s7096_s30 + $0xc0] sm:$0xff] %v5231_v28  ;;  %5258 = vtanh.f32 %v3373_v12  ;;  %v3247_v16 = vpop.f32.mrb[128].mxu0 }
 0x827   : > { %v5235_v3 = vpop.eup %5234  ;;  %3839 = vst [vmem:[%s7096_s30 + $0xe0] sm:$0xff] %v5233_v29  ;;  %v3378_v19 = vpop.f32.mrb[144].mxu1  ;;  %5260 = vtanh.f32 %v3244_v0  ;;  %v3248_v37 = vadd.f32 %v3247_v16, %v7068_v5 }
 0x828   : > { %v5237_v20 = vpop.eup %5236  ;;  %3841 = vst [vmem:[%s7096_s30 + $0xf0] sm:$0xff] %v5235_v3  ;;  %v3379_v38 = vadd.f32 %v3378_v19, %v7071_v50  ;;  %v3249_v39 = vpop.f32.mrb[129].mxu0  ;;  %5262 = vtanh.f32 %v3375_v31 }
 0x829   : > { %v5239_v62 = vpop.eup %5238  ;;  %3840 = vst [vmem:[%s7096_s30 + $0xe8] sm:$0xff] %v5237_v20  ;;  %v3380_v40 = vpop.f32.mrb[145].mxu1  ;;  %v3250_v44 = vadd.f32 %v3249_v39, %v7074_v18  ;;  %5264 = vtanh.f32 %v3248_v37 }
 0x82a   : > { %v5241_v35 = vpop.eup %5240  ;;  %3842 = vst [vmem:[%s7096_s30 + $0xf8] sm:$0xff] %v5239_v62  ;;  %v3381_v33 = vadd.f32 %v3380_v40, %v7077_v45  ;;  %v3251_v46 = vpop.f32.mrb[130].mxu0  ;;  %5266 = vtanh.f32 %v3379_v38 }
 0x82b   : > { %v5243_v41 = vpop.eup %5242  ;;  %3846 = vst [vmem:[%s7096_s30 + $0x118] sm:$0xff] %v5241_v35  ;;  %v3382_v48 = vpop.f32.mrb[146].mxu1  ;;  %v3252_v24 = vadd.f32 %v3251_v46, %v7068_v5  ;;  %5268 = vtanh.f32 %v3250_v44 }
 0x82c   : > { %v5245_v49 = vpop.eup %5244  ;;  %3848 = vst [vmem:[%s7096_s30 + $0x128] sm:$0xff] %v5243_v41  ;;  %v3253_v42 = vpop.f32.mrb[131].mxu0  ;;  %v3383_v54 = vadd.f32 %v3382_v48, %v7071_v50  ;;  %5270 = vtanh.f32 %v3381_v33 }
 0x82d   : > { %v3384_v36 = vpop.f32.mrb[147].mxu1  ;;  %v5247_v53 = vpop.eup %5246  ;;  %3847 = vst [vmem:[%s7096_s30 + $0x120] sm:$0xff] %v5245_v49  ;;  %v3254_v55 = vadd.f32 %v3253_v42, %v7074_v18  ;;  %5272 = vtanh.f32 %v3252_v24 }
 0x82e   : > { %v5249_v27 = vpop.eup %5248  ;;  %3849 = vst [vmem:[%s7096_s30 + $0x130] sm:$0xff] %v5247_v53  ;;  %v3385_v51 = vadd.f32 %v3384_v36, %v7077_v45  ;;  %5274 = vtanh.f32 %v3383_v54  ;;  %v3257_v59 = vpop.f32.mrb[132].mxu0 }
 0x82f   : > { %v5251_v56 = vpop.eup %5250  ;;  %3853 = vst [vmem:[%s7096_s30 + $0x150] sm:$0xff] %v5249_v27  ;;  %v3388_v32 = vpop.f32.mrb[148].mxu1  ;;  %5276 = vtanh.f32 %v3254_v55  ;;  %v3258_v47 = vadd.f32 %v3257_v59, %v7068_v5 }
 0x830   : > { %v5253_v57 = vpop.eup %5252  ;;  %3855 = vst [vmem:[%s7096_s30 + $0x160] sm:$0xff] %v5251_v56  ;;  %v3389_v63 = vadd.f32 %v3388_v32, %v7071_v50  ;;  %v3259_v1 = vpop.f32.mrb[133].mxu0  ;;  %5278 = vtanh.f32 %v3385_v51 }
 0x831   : > { %v5255_v58 = vpop.eup %5254  ;;  %3854 = vst [vmem:[%s7096_s30 + $0x158] sm:$0xff] %v5253_v57  ;;  %v3390_v4 = vpop.f32.mrb[149].mxu1  ;;  %v3260_v8 = vadd.f32 %v3259_v1, %v7074_v18  ;;  %5280 = vtanh.f32 %v3258_v47 }
 0x832   : > { %v5257_v60 = vpop.eup %5256  ;;  %3856 = vst [vmem:[%s7096_s30 + $0x168] sm:$0xff] %v5255_v58  ;;  %v3391_v52 = vadd.f32 %v3390_v4, %v7077_v45  ;;  %v3261_v9 = vpop.f32.mrb[134].mxu0  ;;  %5282 = vtanh.f32 %v3389_v63 }
 0x833   : > { %v5259_v43 = vpop.eup %5258  ;;  %3860 = vst [vmem:[%s7096_s30 + $0x188] sm:$0xff] %v5257_v60  ;;  %v3392_v10 = vpop.f32.mrb[150].mxu1  ;;  %v3262_v30 = vadd.f32 %v3261_v9, %v7068_v5  ;;  %5284 = vtanh.f32 %v3260_v8 }
 0x834   : > { %v5261_v7 = vpop.eup %5260  ;;  %3862 = vst [vmem:[%s7096_s30 + $0x198] sm:$0xff] %v5259_v43  ;;  %v3263_v13 = vpop.f32.mrb[135].mxu0  ;;  %v3393_v17 = vadd.f32 %v3392_v10, %v7071_v50  ;;  %5286 = vtanh.f32 %v3391_v52 }
 0x835   : > { %v3394_v14 = vpop.f32.mrb[151].mxu1  ;;  %v5263_v15 = vpop.eup %5262  ;;  %3861 = vst [vmem:[%s7096_s30 + $0x190] sm:$0xff] %v5261_v7  ;;  %v3264_v21 = vadd.f32 %v3263_v13, %v7074_v18  ;;  %5288 = vtanh.f32 %v3262_v30 }
 0x836   : > { %v5265_v11 = vpop.eup %5264  ;;  %3863 = vst [vmem:[%s7096_s30 + $0x1a0] sm:$0xff] %v5263_v15  ;;  %v3395_v23 = vadd.f32 %v3394_v14, %v7077_v45  ;;  %5290 = vtanh.f32 %v3393_v17  ;;  %v3267_v26 = vpop.f32.mrb[136].mxu0 }
 0x837   : > { %v5267_v22 = vpop.eup %5266  ;;  %3867 = vst [vmem:[%s7096_s30 + $0x1c0] sm:$0xff] %v5265_v11  ;;  %v3398_v6 = vpop.f32.mrb[152].mxu1  ;;  %5292 = vtanh.f32 %v3264_v21  ;;  %v3268_v12 = vadd.f32 %v3267_v26, %v7068_v5 }
 0x838   : > { %v5269_v61 = vpop.eup %5268  ;;  %3869 = vst [vmem:[%s7096_s30 + $0x1d0] sm:$0xff] %v5267_v22  ;;  %v3399_v29 = vadd.f32 %v3398_v6, %v7071_v50  ;;  %v3269_v0 = vpop.f32.mrb[137].mxu0  ;;  %5294 = vtanh.f32 %v3395_v23 }
 0x839   : > { %v5271_v25 = vpop.eup %5270  ;;  %3868 = vst [vmem:[%s7096_s30 + $0x1c8] sm:$0xff] %v5269_v61  ;;  %v3400_v3 = vpop.f32.mrb[153].mxu1  ;;  %v3270_v20 = vadd.f32 %v3269_v0, %v7074_v18  ;;  %5296 = vtanh.f32 %v3268_v12 }
 0x83a   : > { %v5273_v28 = vpop.eup %5272  ;;  %3870 = vst [vmem:[%s7096_s30 + $0x1d8] sm:$0xff] %v5271_v25  ;;  %v3401_v62 = vadd.f32 %v3400_v3, %v7077_v45  ;;  %v3271_v16 = vpop.f32.mrb[138].mxu0  ;;  %5298 = vtanh.f32 %v3399_v29 }
 0x83b   : > { %v5275_v31 = vpop.eup %5274  ;;  %3874 = vst [vmem:[%s7096_s30 + $0x1f8] sm:$0xff] %v5273_v28  ;;  %v3402_v19 = vpop.f32.mrb[154].mxu1  ;;  %v3272_v37 = vadd.f32 %v3271_v16, %v7068_v5  ;;  %5300 = vtanh.f32 %v3270_v20 }
 0x83c   : > { %v5277_v35 = vpop.eup %5276  ;;  %3876 = vst [vmem:[%s7096_s30 + $0x208] sm:$0xff] %v5275_v31  ;;  %v3273_v38 = vpop.f32.mrb[139].mxu0  ;;  %v3403_v41 = vadd.f32 %v3402_v19, %v7071_v50  ;;  %5302 = vtanh.f32 %v3401_v62 }
 0x83d   : > { %v3404_v39 = vpop.f32.mrb[155].mxu1  ;;  %v5279_v40 = vpop.eup %5278  ;;  %3875 = vst [vmem:[%s7096_s30 + $0x200] sm:$0xff] %v5277_v35  ;;  %v3274_v33 = vadd.f32 %v3273_v38, %v7074_v18  ;;  %5304 = vtanh.f32 %v3272_v37 }
 0x83e   : > { %v5281_v44 = vpop.eup %5280  ;;  %3877 = vst [vmem:[%s7096_s30 + $0x210] sm:$0xff] %v5279_v40  ;;  %v3405_v48 = vadd.f32 %v3404_v39, %v7077_v45  ;;  %5306 = vtanh.f32 %v3403_v41  ;;  %v3277_v42 = vpop.f32.mrb[140].mxu0  ;;  %v2868_v40 = vsub.s32 4, %v7059_v34 }
 0x83f   : > { %v5283_v46 = vpop.eup %5282  ;;  %3881 = vst [vmem:[%s7096_s30 + $0x230] sm:$0xff] %v5281_v44  ;;  %v3408_v36 = vpop.f32.mrb[156].mxu1  ;;  %5308 = vtanh.f32 %v3274_v33  ;;  %v3278_v54 = vadd.f32 %v3277_v42, %v7068_v5 }
 0x840   : > { %v5285_v49 = vpop.eup %5284  ;;  %3883 = vst [vmem:[%s7096_s30 + $0x240] sm:$0xff] %v5283_v46  ;;  %v3409_v27 = vadd.f32 %v3408_v36, %v7071_v50  ;;  %v3279_v55 = vpop.f32.mrb[141].mxu0  ;;  %5310 = vtanh.f32 %v3405_v48 }
 0x841   : > { %v5287_v24 = vpop.eup %5286  ;;  %3882 = vst [vmem:[%s7096_s30 + $0x238] sm:$0xff] %v5285_v49  ;;  %v3410_v56 = vpop.f32.mrb[157].mxu1  ;;  %v3280_v57 = vadd.f32 %v3279_v55, %v7074_v18  ;;  %5312 = vtanh.f32 %v3278_v54  ;;  %v2876_v49 = vsub.s32 6, %v7059_v34 }
 0x842   : > { %v5289_v53 = vpop.eup %5288  ;;  %3884 = vst [vmem:[%s7096_s30 + $0x248] sm:$0xff] %v5287_v24  ;;  %v3411_v58 = vadd.f32 %v3410_v56, %v7077_v45  ;;  %v3281_v59 = vpop.f32.mrb[142].mxu0  ;;  %5314 = vtanh.f32 %v3409_v27 }
 0x843   : > { %v5291_v51 = vpop.eup %5290  ;;  %3888 = vst [vmem:[%s7096_s30 + $0x268] sm:$0xff] %v5289_v53  ;;  %v3412_v32 = vpop.f32.mrb[158].mxu1  ;;  %v3282_v47 = vadd.f32 %v3281_v59, %v7068_v5  ;;  %5316 = vtanh.f32 %v3280_v57 }
 0x844   : > { %v5293_v60 = vpop.eup %5292  ;;  %3890 = vst [vmem:[%s7096_s30 + $0x278] sm:$0xff] %v5291_v51  ;;  %v3283_v63 = vpop.f32.mrb[143].mxu0  ;;  %v3413_v43 = vadd.f32 %v3412_v32, %v7071_v50  ;;  %5318 = vtanh.f32 %v3411_v58 }
 0x845   : > { %v3414_v1 = vpop.f32.mrb[159].mxu1  ;;  %v5295_v4 = vpop.eup %5294  ;;  %3889 = vst [vmem:[%s7096_s30 + $0x270] sm:$0xff] %v5293_v60  ;;  %v3284_v52 = vadd.f32 %v3283_v63, %v7074_v18  ;;  %5320 = vtanh.f32 %v3282_v47 }
 0x846   : > { %v5297_v8 = vpop.eup %5296  ;;  %3891 = vst [vmem:[%s7096_s30 + $0x280] sm:$0xff] %v5295_v4  ;;  %v3415_v10 = vadd.f32 %v3414_v1, %v7077_v45  ;;  %5322 = vtanh.f32 %v3413_v43  ;;  %v3287_v13 = vpop.f32.mrb[144].mxu0 }
 0x847   : > { %v5299_v9 = vpop.eup %5298  ;;  %3895 = vst [vmem:[%s7096_s30 + $0x2a0] sm:$0xff] %v5297_v8  ;;  %v3418_v14 = vpop.f32.mrb[160].mxu1  ;;  %5324 = vtanh.f32 %v3284_v52  ;;  %v3288_v17 = vadd.f32 %v3287_v13, %v7068_v5 }
 0x848   : > { %v5301_v7 = vpop.eup %5300  ;;  %3897 = vst [vmem:[%s7096_s30 + $0x2b0] sm:$0xff] %v5299_v9  ;;  %v3419_v11 = vadd.f32 %v3418_v14, %v7071_v50  ;;  %v3289_v21 = vpop.f32.mrb[145].mxu0  ;;  %5326 = vtanh.f32 %v3415_v10 }
 0x849   : > { %v5303_v30 = vpop.eup %5302  ;;  %3896 = vst [vmem:[%s7096_s30 + $0x2a8] sm:$0xff] %v5301_v7  ;;  %v3420_v22 = vpop.f32.mrb[161].mxu1  ;;  %v3290_v61 = vadd.f32 %v3289_v21, %v7074_v18  ;;  %5328 = vtanh.f32 %v3288_v17 }
 0x84a   : > { %v5305_v15 = vpop.eup %5304  ;;  %3898 = vst [vmem:[%s7096_s30 + $0x2b8] sm:$0xff] %v5303_v30  ;;  %v3421_v25 = vadd.f32 %v3420_v22, %v7077_v45  ;;  %v3291_v26 = vpop.f32.mrb[146].mxu0  ;;  %5330 = vtanh.f32 %v3419_v11 }
 0x84b   : > { %v5307_v23 = vpop.eup %5306  ;;  %3902 = vst [vmem:[%s7096_s30 + $0x2d8] sm:$0xff] %v5305_v15  ;;  %v3422_v6 = vpop.f32.mrb[162].mxu1  ;;  %v3292_v12 = vadd.f32 %v3291_v26, %v7068_v5  ;;  %5332 = vtanh.f32 %v3290_v61 }
 0x84c   : > { %v5309_v28 = vpop.eup %5308  ;;  %3904 = vst [vmem:[%s7096_s30 + $0x2e8] sm:$0xff] %v5307_v23  ;;  %v3293_v29 = vpop.f32.mrb[147].mxu0  ;;  %v3423_v31 = vadd.f32 %v3422_v6, %v7071_v50  ;;  %5334 = vtanh.f32 %v3421_v25 }
 0x84d   : > { %v3424_v0 = vpop.f32.mrb[163].mxu1  ;;  %v5311_v3 = vpop.eup %5310  ;;  %3903 = vst [vmem:[%s7096_s30 + $0x2e0] sm:$0xff] %v5309_v28  ;;  %v3294_v62 = vadd.f32 %v3293_v29, %v7074_v18  ;;  %5336 = vtanh.f32 %v3292_v12 }
 0x84e   : > { %v5313_v20 = vpop.eup %5312  ;;  %3905 = vst [vmem:[%s7096_s30 + $0x2f0] sm:$0xff] %v5311_v3  ;;  %v3425_v19 = vadd.f32 %v3424_v0, %v7077_v45  ;;  %5338 = vtanh.f32 %v3423_v31  ;;  %v3297_v38 = vpop.f32.mrb[148].mxu0 }
 0x84f   : > { %v5315_v16 = vpop.eup %5314  ;;  %3909 = vst [vmem:[%s7096_s30 + $0x310] sm:$0xff] %v5313_v20  ;;  %v3428_v39 = vpop.f32.mrb[164].mxu1  ;;  %5340 = vtanh.f32 %v3294_v62  ;;  %v3298_v44 = vadd.f32 %v3297_v38, %v7068_v5  ;;  %v2872_v5 = vsub.s32 5, %v7059_v34 }
 0x850   : > { %v5317_v35 = vpop.eup %5316  ;;  %3911 = vst [vmem:[%s7096_s30 + $0x320] sm:$0xff] %v5315_v16  ;;  %v3429_v33 = vadd.f32 %v3428_v39, %v7071_v50  ;;  %v3299_v46 = vpop.f32.mrb[149].mxu0  ;;  %5342 = vtanh.f32 %v3425_v19 }
 0x851   : > { %v5319_v37 = vpop.eup %5318  ;;  %3910 = vst [vmem:[%s7096_s30 + $0x318] sm:$0xff] %v5317_v35  ;;  %v3430_v48 = vpop.f32.mrb[165].mxu1  ;;  %v3300_v42 = vadd.f32 %v3299_v46, %v7074_v18  ;;  %5344 = vtanh.f32 %v3298_v44  ;;  %v7227_v18 = vrot.slane %v7063_v2, %v2868_v40  ;;  %v7234_v57 = vrot.slane %v7063_v2, %v2872_v5 }
 0x852   : > { %v5321_v41 = vpop.eup %5320  ;;  %3912 = vst [vmem:[%s7096_s30 + $0x328] sm:$0xff] %v5319_v37  ;;  %v3431_v36 = vadd.f32 %v3430_v48, %v7077_v45  ;;  %v3301_v53 = vpop.f32.mrb[150].mxu0  ;;  %5346 = vtanh.f32 %v3429_v33  ;;  %v7230_v45 = vrot.slane %v7063_v2, %v2876_v49 }
 0x853   : > { %v5323_v24 = vpop.eup %5322  ;;  %3916 = vst [vmem:[%s7096_s30 + $0x348] sm:$0xff] %v5321_v41  ;;  %v3432_v54 = vpop.f32.mrb[166].mxu1  ;;  %5348 = vtanh.f32 %v3300_v42 }
 0x854   : > { %v5325_v27 = vpop.eup %5324  ;;  %3918 = vst [vmem:[%s7096_s30 + $0x358] sm:$0xff] %v5323_v24  ;;  %v3302_v50 = vpop.f32.mrb[151].mxu0  ;;  %5350 = vtanh.f32 %v3431_v36 }
 0x855   : > { %v3433_v55 = vpop.f32.mrb[167].mxu1  ;;  %v5327_v56 = vpop.eup %5326  ;;  %3917 = vst [vmem:[%s7096_s30 + $0x350] sm:$0xff] %v5325_v27 }
 0x856   : > { %v5329_v51 = vpop.eup %5328  ;;  %3919 = vst [vmem:[%s7096_s30 + $0x360] sm:$0xff] %v5327_v56  ;;  %v3469_v32 = vpop.f32.mrb[152].mxu0 }
 0x857   : > { %v5331_v34 = vpop.eup %5330  ;;  %3923 = vst [vmem:[%s7096_s30 + $0x380] sm:$0xff] %v5329_v51  ;;  %v4847_v60 = vpop.f32.mrb[168].mxu1  ;;  %v3470_v63 = vadd.f32 %v3469_v32, %v7227_v18 }
 0x858   : > { %v5333_v58 = vpop.eup %5332  ;;  %3925 = vst [vmem:[%s7096_s30 + $0x390] sm:$0xff] %v5331_v34  ;;  %v3609_v1 = vadd.f32 %v4847_v60, %v7230_v45  ;;  %v3471_v4 = vpop.f32.mrb[153].mxu0 }
 0x859   : > { %v5335_v59 = vpop.eup %5334  ;;  %3924 = vst [vmem:[%s7096_s30 + $0x388] sm:$0xff] %v5333_v58  ;;  %v3600_v43 = vpop.f32.mrb[169].mxu1  ;;  %v3472_v2 = vadd.f32 %v3471_v4, %v7234_v57  ;;  %5352 = vtanh.f32 %v3470_v63 }
 0x85a   : > { %v5337_v47 = vpop.eup %5336  ;;  %3926 = vst [vmem:[%s7096_s30 + $0x398] sm:$0xff] %v5335_v59  ;;  %v3601_v52 = vadd.f32 %v3600_v43, %v7230_v45  ;;  %v3473_v9 = vpop.f32.mrb[154].mxu0  ;;  %5354 = vtanh.f32 %v3609_v1 }
 0x85b   : > { %v5339_v8 = vpop.eup %5338  ;;  %3930 = vst [vmem:[%s7096_s30 + $0x3b8] sm:$0xff] %v5337_v47  ;;  %v4848_v10 = vpop.f32.mrb[170].mxu1  ;;  %v3474_v30 = vadd.f32 %v3473_v9, %v7227_v18  ;;  %5356 = vtanh.f32 %v3472_v2 }
 0x85c   : > { %v5341_v7 = vpop.eup %5340  ;;  %3932 = vst [vmem:[%s7096_s30 + $0x3c8] sm:$0xff] %v5339_v8  ;;  %v3475_v13 = vpop.f32.mrb[155].mxu0  ;;  %v3612_v17 = vadd.f32 %v4848_v10, %v7230_v45  ;;  %5358 = vtanh.f32 %v3601_v52 }
 0x85d   : > { %v3603_v14 = vpop.f32.mrb[171].mxu1  ;;  %v5343_v15 = vpop.eup %5342  ;;  %3931 = vst [vmem:[%s7096_s30 + $0x3c0] sm:$0xff] %v5341_v7  ;;  %v3476_v21 = vadd.f32 %v3475_v13, %v7234_v57  ;;  %5360 = vtanh.f32 %v3474_v30 }
 0x85e   : > { %v5345_v11 = vpop.eup %5344  ;;  %3933 = vst [vmem:[%s7096_s30 + $0x3d0] sm:$0xff] %v5343_v15  ;;  %v3604_v23 = vadd.f32 %v3603_v14, %v7230_v45  ;;  %5362 = vtanh.f32 %v3612_v17  ;;  %v3479_v26 = vpop.f32.mrb[156].mxu0 }
 0x85f   : > { %v5347_v22 = vpop.eup %5346  ;;  %3937 = vst [vmem:[%s7096_s30 + $0x3f0] sm:$0xff] %v5345_v11  ;;  %v4851_v6 = vpop.f32.mrb[172].mxu1  ;;  %5364 = vtanh.f32 %v3476_v21  ;;  %v3480_v28 = vadd.f32 %v3479_v26, %v7227_v18 }
 0x860   : > { %v5349_v61 = vpop.eup %5348  ;;  %3939 = vst [vmem:[%s7096_s30 + $0x400] sm:$0xff] %v5347_v22  ;;  %v3625_v12 = vadd.f32 %v4851_v6, %v7230_v45  ;;  %v3481_v29 = vpop.f32.mrb[157].mxu0  ;;  %5366 = vtanh.f32 %v3604_v23 }
 0x861   : > { %v5351_v25 = vpop.eup %5350  ;;  %3938 = vst [vmem:[%s7096_s30 + $0x3f8] sm:$0xff] %v5349_v61  ;;  %v3616_v0 = vpop.f32.mrb[173].mxu1  ;;  %v3482_v3 = vadd.f32 %v3481_v29, %v7234_v57  ;;  %5368 = vtanh.f32 %v3480_v28 }
 0x862   : > { %3940 = vst [vmem:[%s7096_s30 + $0x408] sm:$0xff] %v5351_v25  ;;  %v3617_v31 = vadd.f32 %v3616_v0, %v7230_v45  ;;  %v3483_v20 = vpop.f32.mrb[158].mxu0  ;;  %v4852_v62 = vpop.f32.mrb[174].mxu1  ;;  %5370 = vtanh.f32 %v3625_v12 }
 0x863   : > { %v3484_v16 = vadd.f32 %v3483_v20, %v7227_v18  ;;  %v3485_v19 = vpop.f32.mrb[159].mxu0  ;;  %v3619_v35 = vpop.f32.mrb[175].mxu1  ;;  %v3628_v37 = vadd.f32 %v4852_v62, %v7230_v45  ;;  %5372 = vtanh.f32 %v3482_v3 }
 0x864   : > { %v5353_v38 = vpop.eup %5352  ;;  %v3486_v39 = vadd.f32 %v3485_v19, %v7234_v57  ;;  %5374 = vtanh.f32 %v3617_v31  ;;  %v3620_v41 = vadd.f32 %v3619_v35, %v7230_v45 }
 0x865   : > { %v5355_v40 = vpop.eup %5354  ;;  %3815 = vst [vmem:[%s7096_s30 + $0x20] sm:$0xff] %v5353_v38  ;;  %5376 = vtanh.f32 %v3484_v16 }
 0x866   : > { %v5357_v44 = vpop.eup %5356  ;;  %3831 = vst.msk [vmem:[%s7096_s30 + $0xa0] sm:$0xff] %vm1265_vm0, %v5355_v40  ;;  %5378 = vtanh.f32 %v3628_v37  ;;  %v3489_v46 = vpop.f32.mrb[160].mxu0 }
 0x867   : > { %v5359_v33 = vpop.eup %5358  ;;  %3816 = vst [vmem:[%s7096_s30 + $0x28] sm:$0xff] %v5357_v44  ;;  %v4855_v48 = vpop.f32.mrb[176].mxu1  ;;  %5380 = vtanh.f32 %v3486_v39  ;;  %v3490_v24 = vadd.f32 %v3489_v46, %v7227_v18 }
 0x868   : > { %v5361_v49 = vpop.eup %5360  ;;  %3817 = vst.msk [vmem:[%s7096_s30 + $0x30] sm:$0xff] %vm1265_vm0, %v5359_v33  ;;  %v3641_v42 = vadd.f32 %v4855_v48, %v7230_v45  ;;  %v3491_v36 = vpop.f32.mrb[161].mxu0  ;;  %5382 = vtanh.f32 %v3620_v41 }
 0x869   : > { %v3632_v53 = vpop.f32.mrb[177].mxu1  ;;  %v5363_v54 = vpop.eup %5362  ;;  %3822 = vst [vmem:[%s7096_s30 + $0x58] sm:$0xff] %v5361_v49  ;;  %v3492_v5 = vadd.f32 %v3491_v36, %v7234_v57  ;;  %5384 = vtanh.f32 %v3490_v24 }
 0x86a   : > { %v3633_v27 = vadd.f32 %v3632_v53, %v7230_v45  ;;  %v3493_v50 = vpop.f32.mrb[162].mxu0  ;;  %v4856_v55 = vpop.f32.mrb[178].mxu1  ;;  %3838 = vst.msk [vmem:[%s7096_s30 + $0xd8] sm:$0xff] %vm1265_vm0, %v5363_v54  ;;  %5386 = vtanh.f32 %v3641_v42 }
 0x86b   : > { %v5365_v56 = vpop.eup %5364  ;;  %v3494_v51 = vadd.f32 %v3493_v50, %v7227_v18  ;;  %v3495_v34 = vpop.f32.mrb[163].mxu0  ;;  %v3644_v32 = vadd.f32 %v4856_v55, %v7230_v45  ;;  %5388 = vtanh.f32 %v3492_v5 }
 0x86c   : > { %v3635_v58 = vpop.f32.mrb[179].mxu1  ;;  %v5367_v59 = vpop.eup %5366  ;;  %3823 = vst [vmem:[%s7096_s30 + $0x60] sm:$0xff] %v5365_v56  ;;  %v3496_v47 = vadd.f32 %v3495_v34, %v7234_v57  ;;  %5390 = vtanh.f32 %v3633_v27 }
 0x86d   : > { %v5369_v60 = vpop.eup %5368  ;;  %3824 = vst.msk [vmem:[%s7096_s30 + $0x68] sm:$0xff] %vm1265_vm0, %v5367_v59  ;;  %v3636_v1 = vadd.f32 %v3635_v58, %v7230_v45  ;;  %5392 = vtanh.f32 %v3494_v51 }
 0x86e   : > { %v5371_v63 = vpop.eup %5370  ;;  %3829 = vst [vmem:[%s7096_s30 + $0x90] sm:$0xff] %v5369_v60  ;;  %5394 = vtanh.f32 %v3644_v32  ;;  %v3499_v8 = vpop.f32.mrb[164].mxu0 }
 0x86f   : > { %v5373_v4 = vpop.eup %5372  ;;  %3859 = vst.msk [vmem:[%s7096_s30 + $0x180] sm:$0xff] %vm1265_vm0, %v5371_v63  ;;  %v4859_v2 = vpop.f32.mrb[180].mxu1  ;;  %5396 = vtanh.f32 %v3496_v47  ;;  %v3500_v9 = vadd.f32 %v3499_v8, %v7227_v18 }
 0x870   : > { %v5375_v43 = vpop.eup %5374  ;;  %3830 = vst [vmem:[%s7096_s30 + $0x98] sm:$0xff] %v5373_v4  ;;  %v3657_v10 = vadd.f32 %v4859_v2, %v7230_v45  ;;  %v3501_v7 = vpop.f32.mrb[165].mxu0  ;;  %5398 = vtanh.f32 %v3636_v1 }
 0x871   : > { %v5377_v52 = vpop.eup %5376  ;;  %3845 = vst.msk [vmem:[%s7096_s30 + $0x110] sm:$0xff] %vm1265_vm0, %v5375_v43  ;;  %v3648_v30 = vpop.f32.mrb[181].mxu1  ;;  %v3502_v14 = vadd.f32 %v3501_v7, %v7234_v57  ;;  %5400 = vtanh.f32 %v3500_v9 }
 0x872   : > { %v5379_v13 = vpop.eup %5378  ;;  %3836 = vst [vmem:[%s7096_s30 + $0xc8] sm:$0xff] %v5377_v52  ;;  %v3649_v15 = vadd.f32 %v3648_v30, %v7230_v45  ;;  %v3503_v17 = vpop.f32.mrb[166].mxu0  ;;  %5402 = vtanh.f32 %v3657_v10 }
 0x873   : > { %v4860_v11 = vpop.f32.mrb[182].mxu1  ;;  %v5381_v21 = vpop.eup %5380  ;;  %3866 = vst.msk [vmem:[%s7096_s30 + $0x1b8] sm:$0xff] %vm1265_vm0, %v5379_v13  ;;  %v3504_v22 = vadd.f32 %v3503_v17, %v7227_v18  ;;  %5404 = vtanh.f32 %v3502_v14 }
 0x874   : > { %v3505_v23 = vpop.f32.mrb[167].mxu0  ;;  %v3651_v61 = vpop.f32.mrb[183].mxu1  ;;  %3837 = vst [vmem:[%s7096_s30 + $0xd0] sm:$0xff] %v5381_v21  ;;  %v3660_v26 = vadd.f32 %v4860_v11, %v7230_v45  ;;  %5406 = vtanh.f32 %v3649_v15 }
 0x875   : > { %v5383_v25 = vpop.eup %5382  ;;  %v3506_v28 = vadd.f32 %v3505_v23, %v7234_v57  ;;  %v3652_v29 = vadd.f32 %v3651_v61, %v7230_v45  ;;  %5408 = vtanh.f32 %v3504_v22 }
 0x876   : > { %v5385_v6 = vpop.eup %5384  ;;  %3852 = vst.msk [vmem:[%s7096_s30 + $0x148] sm:$0xff] %vm1265_vm0, %v5383_v25  ;;  %5410 = vtanh.f32 %v3660_v26  ;;  %v3509_v31 = vpop.f32.mrb[168].mxu0 }
 0x877   : > { %v5387_v12 = vpop.eup %5386  ;;  %3843 = vst [vmem:[%s7096_s30 + $0x100] sm:$0xff] %v5385_v6  ;;  %v4863_v20 = vpop.f32.mrb[184].mxu1  ;;  %5412 = vtanh.f32 %v3506_v28  ;;  %v3510_v16 = vadd.f32 %v3509_v31, %v7227_v18 }
 0x878   : > { %v5389_v0 = vpop.eup %5388  ;;  %3887 = vst.msk [vmem:[%s7096_s30 + $0x260] sm:$0xff] %vm1265_vm0, %v5387_v12  ;;  %v3673_v19 = vadd.f32 %v4863_v20, %v7230_v45  ;;  %v3511_v35 = vpop.f32.mrb[169].mxu0  ;;  %5414 = vtanh.f32 %v3652_v29 }
 0x879   : > { %v5391_v3 = vpop.eup %5390  ;;  %3844 = vst [vmem:[%s7096_s30 + $0x108] sm:$0xff] %v5389_v0  ;;  %v3664_v37 = vpop.f32.mrb[185].mxu1  ;;  %v3512_v39 = vadd.f32 %v3511_v35, %v7234_v57  ;;  %5416 = vtanh.f32 %v3510_v16 }
 0x87a   : > { %v5393_v62 = vpop.eup %5392  ;;  %3873 = vst.msk [vmem:[%s7096_s30 + $0x1f0] sm:$0xff] %vm1265_vm0, %v5391_v3  ;;  %v3665_v40 = vadd.f32 %v3664_v37, %v7230_v45  ;;  %v3513_v41 = vpop.f32.mrb[170].mxu0  ;;  %5418 = vtanh.f32 %v3673_v19 }
 0x87b   : > { %v5395_v38 = vpop.eup %5394  ;;  %3850 = vst [vmem:[%s7096_s30 + $0x138] sm:$0xff] %v5393_v62  ;;  %v4864_v44 = vpop.f32.mrb[186].mxu1  ;;  %v3514_v46 = vadd.f32 %v3513_v41, %v7227_v18  ;;  %5420 = vtanh.f32 %v3512_v39 }
 0x87c   : > { %v5397_v33 = vpop.eup %5396  ;;  %3894 = vst.msk [vmem:[%s7096_s30 + $0x298] sm:$0xff] %vm1265_vm0, %v5395_v38  ;;  %v3515_v48 = vpop.f32.mrb[171].mxu0  ;;  %5422 = vtanh.f32 %v3665_v40 }
 0x87d   : > { %v3667_v49 = vpop.f32.mrb[187].mxu1  ;;  %v5399_v24 = vpop.eup %5398  ;;  %3851 = vst [vmem:[%s7096_s30 + $0x140] sm:$0xff] %v5397_v33  ;;  %v3516_v42 = vadd.f32 %v3515_v48, %v7234_v57  ;;  %5424 = vtanh.f32 %v3514_v46 }
 0x87e   : > { %v5401_v36 = vpop.eup %5400  ;;  %3880 = vst.msk [vmem:[%s7096_s30 + $0x228] sm:$0xff] %vm1265_vm0, %v5399_v24  ;;  %v3668_v53 = vadd.f32 %v3667_v49, %v7230_v45  ;;  %v3519_v50 = vpop.f32.mrb[172].mxu0 }
 0x87f   : > { %v5403_v54 = vpop.eup %5402  ;;  %3857 = vst [vmem:[%s7096_s30 + $0x170] sm:$0xff] %v5401_v36  ;;  %5426 = vtanh.f32 %v3516_v42  ;;  %v3520_v45 = vadd.f32 %v3519_v50, %v7227_v18  ;;  %v3521_v56 = vpop.f32.mrb[173].mxu0 }
 0x880   : > { %v5405_v5 = vpop.eup %5404  ;;  %3915 = vst.msk [vmem:[%s7096_s30 + $0x340] sm:$0xff] %vm1265_vm0, %v5403_v54  ;;  %5428 = vtanh.f32 %v3668_v53  ;;  %v3522_v34 = vadd.f32 %v3521_v56, %v7234_v57  ;;  %v3523_v58 = vpop.f32.mrb[174].mxu0 }
 0x881   : > { %v5407_v27 = vpop.eup %5406  ;;  %3858 = vst [vmem:[%s7096_s30 + $0x178] sm:$0xff] %v5405_v5  ;;  %5430 = vtanh.f32 %v3520_v45  ;;  %v3524_v32 = vadd.f32 %v3523_v58, %v7227_v18  ;;  %v3525_v60 = vpop.f32.mrb[175].mxu0 }
 0x882   : > { %v5409_v55 = vpop.eup %5408  ;;  %3901 = vst.msk [vmem:[%s7096_s30 + $0x2d0] sm:$0xff] %vm1265_vm0, %v5407_v27  ;;  %5432 = vtanh.f32 %v3522_v34  ;;  %v3526_v63 = vadd.f32 %v3525_v60, %v7234_v57 }
 0x883   : > { %v5411_v51 = vpop.eup %5410  ;;  %3864 = vst [vmem:[%s7096_s30 + $0x1a8] sm:$0xff] %v5409_v55  ;;  %5434 = vtanh.f32 %v3524_v32 }
 0x884   : > { %v5413_v59 = vpop.eup %5412  ;;  %3922 = vst.msk [vmem:[%s7096_s30 + $0x378] sm:$0xff] %vm1265_vm0, %v5411_v51  ;;  %5436 = vtanh.f32 %v3526_v63 }
 0x885   : > { %v5415_v47 = vpop.eup %5414  ;;  %3865 = vst [vmem:[%s7096_s30 + $0x1b0] sm:$0xff] %v5413_v59 }
 0x886   : > { %v5417_v1 = vpop.eup %5416  ;;  %3908 = vst.msk [vmem:[%s7096_s30 + $0x308] sm:$0xff] %vm1265_vm0, %v5415_v47  ;;  %v3529_v2 = vpop.f32.mrb[176].mxu0 }
 0x887   : > { %v5419_v4 = vpop.eup %5418  ;;  %3871 = vst [vmem:[%s7096_s30 + $0x1e0] sm:$0xff] %v5417_v1  ;;  %v3530_v9 = vadd.f32 %v3529_v2, %v7227_v18  ;;  %v3531_v10 = vpop.f32.mrb[177].mxu0 }
 0x888   : > { %v5421_v43 = vpop.eup %5420  ;;  %3943 = vst.msk [vmem:[%s7096_s30 + $0x420] sm:$0xff] %vm1265_vm0, %v5419_v4  ;;  %v3532_v30 = vadd.f32 %v3531_v10, %v7234_v57  ;;  %v3533_v13 = vpop.f32.mrb[178].mxu0 }
 0x889   : > { %v5423_v8 = vpop.eup %5422  ;;  %3872 = vst [vmem:[%s7096_s30 + $0x1e8] sm:$0xff] %v5421_v43  ;;  %5438 = vtanh.f32 %v3530_v9  ;;  %v3534_v15 = vadd.f32 %v3533_v13, %v7227_v18  ;;  %v3535_v17 = vpop.f32.mrb[179].mxu0 }
 0x88a   : > { %v5425_v52 = vpop.eup %5424  ;;  %3929 = vst.msk [vmem:[%s7096_s30 + $0x3b0] sm:$0xff] %vm1265_vm0, %v5423_v8  ;;  %5440 = vtanh.f32 %v3532_v30  ;;  %v3536_v11 = vadd.f32 %v3535_v17, %v7234_v57 }
 0x88b   : > { %v5427_v7 = vpop.eup %5426  ;;  %3878 = vst [vmem:[%s7096_s30 + $0x218] sm:$0xff] %v5425_v52  ;;  %5442 = vtanh.f32 %v3534_v15 }
 0x88c   : > { %v5429_v14 = vpop.eup %5428  ;;  %3879 = vst [vmem:[%s7096_s30 + $0x220] sm:$0xff] %v5427_v7  ;;  %5444 = vtanh.f32 %v3536_v11 }
 0x88d   : > { %3936 = vst.msk [vmem:[%s7096_s30 + $0x3e8] sm:$0xff] %vm1265_vm0, %v5429_v14  ;;  %v5431_v21 = vpop.eup %5430 }
 0x88e   : > { %v5433_v22 = vpop.eup %5432  ;;  %3885 = vst [vmem:[%s7096_s30 + $0x250] sm:$0xff] %v5431_v21  ;;  %v3539_v25 = vpop.f32.mrb[180].mxu0 }
 0x88f   : > { %v5435_v23 = vpop.eup %5434  ;;  %3886 = vst [vmem:[%s7096_s30 + $0x258] sm:$0xff] %v5433_v22  ;;  %v3540_v26 = vadd.f32 %v3539_v25, %v7227_v18  ;;  %v3541_v6 = vpop.f32.mrb[181].mxu0 }
 0x890   : > { %v5437_v61 = vpop.eup %5436  ;;  %3892 = vst [vmem:[%s7096_s30 + $0x288] sm:$0xff] %v5435_v23  ;;  %v3542_v28 = vadd.f32 %v3541_v6, %v7234_v57  ;;  %v3543_v12 = vpop.f32.mrb[182].mxu0 }
 0x891   : > { %3893 = vst [vmem:[%s7096_s30 + $0x290] sm:$0xff] %v5437_v61  ;;  %5446 = vtanh.f32 %v3540_v26  ;;  %v3544_v29 = vadd.f32 %v3543_v12, %v7227_v18  ;;  %v3545_v0 = vpop.f32.mrb[183].mxu0 }
 0x892   : > { %5448 = vtanh.f32 %v3542_v28  ;;  %v3546_v3 = vadd.f32 %v3545_v0, %v7234_v57 }
 0x893   : > { %v5439_v31 = vpop.eup %5438  ;;  %5450 = vtanh.f32 %v3544_v29 }
 0x894   : > { %v5441_v20 = vpop.eup %5440  ;;  %3899 = vst [vmem:[%s7096_s30 + $0x2c0] sm:$0xff] %v5439_v31  ;;  %5452 = vtanh.f32 %v3546_v3 }
 0x895   : > { %v5443_v62 = vpop.eup %5442  ;;  %3900 = vst [vmem:[%s7096_s30 + $0x2c8] sm:$0xff] %v5441_v20 }
 0x896   : > { %v5445_v16 = vpop.eup %5444  ;;  %3906 = vst [vmem:[%s7096_s30 + $0x2f8] sm:$0xff] %v5443_v62  ;;  %v3549_v19 = vpop.f32.mrb[184].mxu0 }
 0x897   : > { %3907 = vst [vmem:[%s7096_s30 + $0x300] sm:$0xff] %v5445_v16  ;;  %v3550_v35 = vadd.f32 %v3549_v19, %v7227_v18  ;;  %v3551_v37 = vpop.f32.mrb[185].mxu0 }
 0x898   : > { %v3552_v38 = vadd.f32 %v3551_v37, %v7234_v57  ;;  %v3553_v39 = vpop.f32.mrb[186].mxu0 }
 0x899   : > { %5454 = vtanh.f32 %v3550_v35  ;;  %v3554_v40 = vadd.f32 %v3553_v39, %v7227_v18  ;;  %v3555_v41 = vpop.f32.mrb[187].mxu0 }
 0x89a   : > { %5456 = vtanh.f32 %v3552_v38  ;;  %v3556_v44 = vadd.f32 %v3555_v41, %v7234_v57 }
 0x89b   : > { %v5447_v33 = vpop.eup %5446  ;;  %5458 = vtanh.f32 %v3554_v40 }
 0x89c   : > { %v5449_v46 = vpop.eup %5448  ;;  %3913 = vst [vmem:[%s7096_s30 + $0x330] sm:$0xff] %v5447_v33  ;;  %5460 = vtanh.f32 %v3556_v44 }
 0x89d   : > { %v5451_v48 = vpop.eup %5450  ;;  %3914 = vst [vmem:[%s7096_s30 + $0x338] sm:$0xff] %v5449_v46 }
 0x89e   : > { %v5453_v49 = vpop.eup %5452  ;;  %3920 = vst [vmem:[%s7096_s30 + $0x368] sm:$0xff] %v5451_v48  ;;  %v3559_v24 = vpop.f32.mrb[188].mxu0 }
 0x89f   : > { %3921 = vst [vmem:[%s7096_s30 + $0x370] sm:$0xff] %v5453_v49  ;;  %v3560_v42 = vadd.f32 %v3559_v24, %v7227_v18  ;;  %v3561_v36 = vpop.f32.mrb[189].mxu0 }
 0x8a0   : > { %v3562_v53 = vadd.f32 %v3561_v36, %v7234_v57  ;;  %v3563_v54 = vpop.f32.mrb[190].mxu0 }
 0x8a1   : > { %5462 = vtanh.f32 %v3560_v42  ;;  %v3564_v5 = vpop.f32.mrb[191].mxu0 }
 0x8a2   : > { %5464 = vtanh.f32 %v3562_v53 }
 0x8a3   : > { %v5455_v27 = vpop.eup %5454 }
 0x8a4   : > { %v5457_v50 = vpop.eup %5456  ;;  %3927 = vst [vmem:[%s7096_s30 + $0x3a0] sm:$0xff] %v5455_v27 }
 0x8a5   : > { %v5459_v55 = vpop.eup %5458  ;;  %3928 = vst [vmem:[%s7096_s30 + $0x3a8] sm:$0xff] %v5457_v50 }
 0x8a6   : > { %v5461_v45 = vpop.eup %5460  ;;  %3934 = vst [vmem:[%s7096_s30 + $0x3d8] sm:$0xff] %v5459_v55 }
 0x8a7   : > { %3935 = vst [vmem:[%s7096_s30 + $0x3e0] sm:$0xff] %v5461_v45 }
 0x8ab   : > { %v5463_v18 = vpop.eup %5462 }
 0x8ac   : > { %v5465_v57 = vpop.eup %5464  ;;  %3941 = vst [vmem:[%s7096_s30 + $0x410] sm:$0xff] %v5463_v18 }
 0x8ad   : > { %3942 = vst [vmem:[%s7096_s30 + $0x418] sm:$0xff] %v5465_v57 }
 0x8ae   : > { %5817 = shalt.err (!%p5814_p7)
}
 0x8af   : > { %s5818_s30 = scalar_lea.hbm %s7383_s2, 17024  ;;  %s5822_s24 = scalar_lea.hbm %s7506_s13, 34048 }
 0x8b0   : > { %p5819_p5 = scmp.ne.s32.totalorder %s7383_s2, %s5818_s30  ;;  %p5823_p13 = scmp.lt.u32.totalorder %s7383_s2, %s7506_s13 }
 0x8b1   : > { %p5824_p3 = scmp.lt.u32.totalorder %s5822_s24, %s5818_s30  ;;  %p5826_p2 = scmp.lt.u32.totalorder %s5818_s30, %s7383_s2 }
 0x8b2   : > { %p5820_p9 = pnand %p5819_p5, %p7507_p8 }
 0x8b3   : > { %p5825_p0 = por %p5824_p3, %p5823_p13 }
 0x8b4   : > { %p5821_p12 = pneg %p5820_p9 }
 0x8b5   : > { %p5827_p4 = por %p5826_p2, %p5825_p0 }
 0x8b7   : > { %p5828_p10 = pnand %p5827_p4, %p5821_p12 }
 0x8b9   : > { %5831 = shalt.err (!%p5828_p10)
}
 0x8ba   : > { %s5914_s4 = smov 896   ;;  %s5915_s5 = smov 56  }
 0x8bb   : > { %s7508_s7 = scalar_lea.sflag [#allocation4], %s6379_s23 }
 0x8bc   : > { %4933 = dma.vmem_to_hbm [thread:$0]  (%p7507_p8), %s7385_s29, 17024, %s7383_s2, %s7508_s7, %s5914_s4, %s5914_s4, %s5915_s5  }
 0x8bd PF: > { %s3974_s1 = sand.u32 1, %s5882_s18   ;;  %p7509_p11 = scmp.ne.s32.totalorder %s7484_s0, 0 }
 0x8be   : > { %p7510_p1 = scmp.ge.s32.totalorder %s5894_s21, 2  ;;  %s3975_s30 = scalar_lea.sflag [#allocation4], %s3974_s1 }
 0x8c0   : > { %p4974_p6 = pnand %p7510_p1, %p7509_p11 }
 0x8c2   : > { %5877 = dma.done.wait (!%p4974_p6), %s3975_s30, 17024  }
 0x8c3   : > { %5879 = vsyncadd (!%p4974_p6), %s3975_s30, 4294950272  ;;  %p34_p7 = scmp.ge.s32.totalorder %s6306_s16, 4   ;;  %s7511_s18 = smov %s5886_s19 }
 0x8c4   : > { %s7512_s19 = smov %s5890_s20  ;;  %s7513_s20 = smov %s6317_s3 }
 0x8c5   : > { %s7514_s21 = smov %s6306_s16  ;;  %36 = sbr.rel (!%p34_p7) target bundleno = 22 (0x16), region = 169 }
 0x8cc   :  { %3980 = vsyncpa [#allocation3], 1 }
 0x8cd   :  { %3982 = vsyncpa [#allocation3 + $0x1], 1 }
 0x8ce   :  { %3983 = vsyncpa [#allocation6], 1 }
 0x8cf   :  { %3984 = vsyncpa [#allocation9], 1 }
 0x8d0   :  { %3985 = vsyncpa [#allocation12], 1 }
 0x8d1   :  { %3986 = vsyncpa [#allocation15], 1 }
 0x8d2   :  { %3987 = vsyncpa [#allocation18], 1 }
 0x8d3   :  { %3988 = vsyncpa [#allocation21], 1 }
 0x8d4   :  { %3989 = vsyncpa [#allocation4], 1 }
 0x8d5   :  { %3991 = vsyncpa [#allocation4 + $0x1], 1 }

</bundles_post_ra>
